<compile_context>
chip_gen: v5e
topology: v5e:2x2
jax: 0.10.0
libtpu: 0.0.40
codegen_flags: <defaults>
</compile_context>

<pallas_src>
import functools

import jax
import jax.numpy as jnp
from jax import lax
from jax.experimental import pallas as pl
from jax.experimental.pallas import tpu as pltpu

EPS = 1e-5


# ----------------------------------------------------------------------------
# In-kernel helpers (traced inline inside the single fused kernel).
# Activations are laid out as (channels, flat_H*W): channels on sublanes,
# flattened spatial on lanes.
# ----------------------------------------------------------------------------
def _upsample2x_flat(x, src_row):
    """Nearest-neighbor 2x upsample via a 0/1 selection matmul.

    x:       (C, n_in)  flat row-major spatial on the lane axis.
    src_row: (1, n_out) int32, src_row[0, q] = flat source index of output q.
    returns  (C, n_out)
    """
    n_in = x.shape[1]
    n_out = src_row.shape[1]
    p = lax.broadcasted_iota(jnp.int32, (n_in, n_out), 0)
    sel = jnp.where(p == src_row, 1.0, 0.0).astype(jnp.float32)   # (n_in, n_out)
    return jnp.dot(x, sel, preferred_element_type=jnp.float32)


def _conv3x3_flat(x, w_ref, cidx_row, w_sp, *, scale, shift, act):
    """3x3, stride-1, pad-1 conv on a flat (Cin, H*W) activation.

    w_ref:    Ref of shape (3, 3, Cout, Cin)  (i.e. HWIO transposed to HWOI)
    cidx_row: (1, n) int32, column index (q % w_sp) of each flat position.
    scale:    (Cout, 1) or None;  shift: (Cout, 1) or (Cout, n).
    """
    cin, n = x.shape
    cout = w_ref.shape[2]
    pad = w_sp + 1
    zpad = jnp.zeros((cin, pad), jnp.float32)
    xp = jnp.concatenate([zpad, x, zpad], axis=1)          # (cin, n + 2*pad)

    not_left_edge = cidx_row >= 1                          # valid when reading col-1
    not_right_edge = cidx_row <= (w_sp - 2)                # valid when reading col+1

    acc = jnp.zeros((cout, n), jnp.float32)
    for kh in range(3):
        for kw in range(3):
            off = (kh - 1) * w_sp + (kw - 1)
            tap = xp[:, pad + off: pad + off + n]          # (cin, n)
            if kw == 0:
                tap = jnp.where(not_left_edge, tap, 0.0)
            elif kw == 2:
                tap = jnp.where(not_right_edge, tap, 0.0)
            acc = acc + jnp.dot(w_ref[kh, kw], tap,
                                preferred_element_type=jnp.float32)

    y = acc
    if scale is not None:
        y = y * scale
    y = y + shift
    if act == "leaky":
        y = jnp.where(y > 0, y, 0.2 * y)
    elif act == "sigmoid":
        y = jax.nn.sigmoid(y)
    return y


# ----------------------------------------------------------------------------
# The single fused kernel: one batch element per grid step ("parallel" axis).
# ----------------------------------------------------------------------------
def _generator_kernel(z_ref, w1_ref, s0_ref, sh0_ref,
                      src1_ref, cidx1_ref, wc1_ref, s1_ref, t1_ref,
                      src2_ref, cidx2_ref, wc2_ref, s2_ref, t2_ref,
                      wc3_ref, b3_ref,
                      o_ref, *, init, c0):
    b = pl.program_id(0)
    hw0 = init * init

    # ---- Linear (column-permuted weight) -> (hw0*c0, 1) ---------------------
    z_row = z_ref[pl.ds(b, 1), :]                                  # (1, nz)
    v = lax.dot_general(w1_ref[...], z_row,
                        dimension_numbers=(((1,), (1,)), ((), ())),
                        preferred_element_type=jnp.float32)        # (hw0*c0, 1)

    # un-flatten into (channels, flat HW):  x[c, p] = v[p*c0 + c]
    x = jnp.concatenate([v[p * c0:(p + 1) * c0, :] for p in range(hw0)], axis=1)
    # BatchNorm0 (+ linear bias), pre-folded into per-channel scale / shift.
    x = x * s0_ref[...] + sh0_ref[...]                             # (c0, hw0)

    # ---- Block 1: upsample x2 -> conv3x3 -> BN1 -> LeakyReLU(0.2) ----------
    x = _upsample2x_flat(x, src1_ref[...])                         # (c0, 4*hw0)
    x = _conv3x3_flat(x, wc1_ref, cidx1_ref[...], 2 * init,
                      scale=s1_ref[...], shift=t1_ref[...], act="leaky")

    # ---- Block 2: upsample x2 -> conv3x3 -> BN2 -> LeakyReLU(0.2) ----------
    x = _upsample2x_flat(x, src2_ref[...])                         # (c0, 16*hw0)
    x = _conv3x3_flat(x, wc2_ref, cidx2_ref[...], 4 * init,
                      scale=s2_ref[...], shift=t2_ref[...], act="leaky")

    # ---- Block 3: conv3x3 + bias -> Sigmoid (already flattened NCHW) -------
    x = _conv3x3_flat(x, wc3_ref, cidx2_ref[...], 4 * init,
                      scale=None, shift=b3_ref[...], act="sigmoid")

    o_ref[0] = x                                                   # (nc, img*img)


# ----------------------------------------------------------------------------
# Wrapper: parameter folding / permutation (pure layout plumbing on tiny
# weights) + one pallas_call.  Output reshape (B, nc, HW) -> (B, nc, H, W) is
# a free, layout-preserving reshape.
# ----------------------------------------------------------------------------
def generator_forward_pallas(z, P, *, nz, ngf, img_size, nc):
    init = img_size // 4
    B = z.shape[0]
    c0 = 2 * ngf
    hw0 = init * init
    w1sp, w2sp = 2 * init, 4 * init
    n1, n2 = w1sp * w1sp, w2sp * w2sp

    def bn_affine(g, be, m, v):
        s = g / jnp.sqrt(v + EPS)
        return s, be - m * s

    s0, t0 = bn_affine(P["g0"], P["be0"], P["m0"], P["v0"])
    s1, t1 = bn_affine(P["g1"], P["be1"], P["m1"], P["v1"])
    s2, t2 = bn_affine(P["g2"], P["be2"], P["m2"], P["v2"])

    # Permute linear weight columns so the matmul output is already in the
    # kernel's (flat-HW major, channel minor) order:  row p*c0 + c <- col c*hw0 + p
    w1p = P["w1"].reshape(nz, c0, hw0).transpose(2, 1, 0).reshape(hw0 * c0, nz)
    s0c = s0.reshape(c0, 1)
    sh0 = P["b1"].reshape(c0, hw0) * s0[:, None] + t0[:, None]     # (c0, hw0)

    # Conv weights: HWIO -> (kh, kw, Cout, Cin) for channels-on-sublanes matmuls.
    wc1t = P["wc1"].transpose(0, 1, 3, 2)
    wc2t = P["wc2"].transpose(0, 1, 3, 2)
    wc3t = P["wc3"].transpose(0, 1, 3, 2)

    # Static index helpers (constant-folded by XLA; tiny int32 vectors).
    def upsample_src(w):
        q = jnp.arange(4 * w * w, dtype=jnp.int32)
        r, c = q // (2 * w), q % (2 * w)
        return ((r // 2) * w + (c // 2)).reshape(1, -1)

    def col_index(w):
        q = jnp.arange(w * w, dtype=jnp.int32)
        return (q % w).reshape(1, -1)

    src1, src2 = upsample_src(init), upsample_src(w1sp)            # (1,n1), (1,n2)
    cidx1, cidx2 = col_index(w1sp), col_index(w2sp)                # (1,n1), (1,n2)

    kernel = functools.partial(_generator_kernel, init=init, c0=c0)

    def full(shape):
        return pl.BlockSpec(shape, lambda b, _s=shape: (0,) * len(_s))

    flops = B * 2 * (nz * hw0 * c0 + c0 * hw0 * n1 + 9 * c0 * c0 * n1
                     + c0 * n1 * n2 + 9 * c0 * ngf * n2 + 9 * ngf * nc * n2)
    bytes_accessed = 4 * (z.size + w1p.size + sh0.size + s0c.size
                          + wc1t.size + wc2t.size + wc3t.size
                          + 2 * (c0 + ngf) + nc + B * nc * n2) + 4 * (2 * n1 + 2 * n2)

    out = pl.pallas_call(
        kernel,
        out_shape=jax.ShapeDtypeStruct((B, nc, img_size * img_size), jnp.float32),
        grid=(B,),
        in_specs=[
            full((B, nz)),
            full((hw0 * c0, nz)),
            full((c0, 1)),
            full((c0, hw0)),
            full((1, n1)),
            full((1, n1)),
            full((3, 3, c0, c0)),
            full((c0, 1)),
            full((c0, 1)),
            full((1, n2)),
            full((1, n2)),
            full((3, 3, ngf, c0)),
            full((ngf, 1)),
            full((ngf, 1)),
            full((3, 3, nc, ngf)),
            full((nc, 1)),
        ],
        out_specs=pl.BlockSpec((1, nc, img_size * img_size), lambda b: (b, 0, 0)),
        compiler_params=pltpu.CompilerParams(dimension_semantics=("parallel",)),
        cost_estimate=pl.CostEstimate(flops=flops,
                                      transcendentals=B * nc * n2,
                                      bytes_accessed=bytes_accessed),
    )(z, w1p, s0c, sh0,
      src1, cidx1, wc1t, s1.reshape(c0, 1), t1.reshape(c0, 1),
      src2, cidx2, wc2t, s2.reshape(ngf, 1), t2.reshape(ngf, 1),
      wc3t, P["b3"].reshape(nc, 1))

    return out.reshape(B, nc, img_size, img_size)


# ----------------------------------------------------------------------------
# Pure-JAX reference (mirrors the PyTorch forward in eval mode), for checking.
# ----------------------------------------------------------------------------
def generator_forward_reference(z, P, *, nz, ngf, img_size, nc):
    init = img_size // 4
    B = z.shape[0]
    C0 = 2 * ngf

    def bn(x, g, be, m, v):
        return ((x - m[None, :, None, None]) / jnp.sqrt(v[None, :, None, None] + EPS)
                * g[None, :, None, None] + be[None, :, None, None])

    def conv(x, w_hwio):
        w_oihw = jnp.transpose(w_hwio, (3, 2, 0, 1))
        return lax.conv_general_dilated(
            x, w_oihw, (1, 1), ((1, 1), (1, 1)),
            dimension_numbers=("NCHW", "OIHW", "NCHW"))

    out = z @ P["w1"] + P["b1"]
    x = out.reshape(B, C0, init, init)
    x = bn(x, P["g0"], P["be0"], P["m0"], P["v0"])
    x = jnp.repeat(jnp.repeat(x, 2, axis=2), 2, axis=3)
    x = conv(x, P["wc1"])
    x = bn(x, P["g1"], P["be1"], P["m1"], P["v1"])
    x = jnp.where(x > 0, x, 0.2 * x)
    x = jnp.repeat(jnp.repeat(x, 2, axis=2), 2, axis=3)
    x = conv(x, P["wc2"])
    x = bn(x, P["g2"], P["be2"], P["m2"], P["v2"])
    x = jnp.where(x > 0, x, 0.2 * x)
    x = conv(x, P["wc3"]) + P["b3"][None, :, None, None]
    return jax.nn.sigmoid(x)


# ----------------------------------------------------------------------------
def make_params(key, *, nz, ngf, img_size, nc):
    init = img_size // 4
    C0 = 2 * ngf
    F = C0 * init * init
    ks = jax.random.split(key, 18)
    n = jax.random.normal
    u = jax.random.uniform
    return {
        # Linear(nz, F): stored as (nz, F) so the forward computes z @ w1 + b1
        "w1": 0.1 * n(ks[0], (nz, F), jnp.float32),
        "b1": 0.1 * n(ks[1], (F,), jnp.float32),
        # Conv weights stored HWIO (kh, kw, Cin, Cout)
        "wc1": 0.1 * n(ks[2], (3, 3, C0, C0), jnp.float32),
        "wc2": 0.1 * n(ks[3], (3, 3, C0, ngf), jnp.float32),
        "wc3": 0.1 * n(ks[4], (3, 3, ngf, nc), jnp.float32),
        "b3": 0.1 * n(ks[5], (nc,), jnp.float32),
        # BatchNorm (eval mode) params: gamma, beta, running_mean, running_var
        "g0": 1.0 + 0.1 * n(ks[6], (C0,), jnp.float32),
        "be0": 0.1 * n(ks[7], (C0,), jnp.float32),
        "m0": 0.1 * n(ks[8], (C0,), jnp.float32),
        "v0": u(ks[9], (C0,), jnp.float32, 0.5, 1.5),
        "g1": 1.0 + 0.1 * n(ks[10], (C0,), jnp.float32),
        "be1": 0.1 * n(ks[11], (C0,), jnp.float32),
        "m1": 0.1 * n(ks[12], (C0,), jnp.float32),
        "v1": u(ks[13], (C0,), jnp.float32, 0.5, 1.5),
        "g2": 1.0 + 0.1 * n(ks[14], (ngf,), jnp.float32),
        "be2": 0.1 * n(ks[15], (ngf,), jnp.float32),
        "m2": 0.1 * n(ks[16], (ngf,), jnp.float32),
        "v2": u(ks[17], (ngf,), jnp.float32, 0.5, 1.5),
    }


if __name__ == "__main__":
    # Small shapes consistent with the module: nz=32, ngf=16, img_size=16, nc=3
    B, nz, ngf, img_size, nc = 2, 32, 16, 16, 3

    key = jax.random.PRNGKey(0)
    kz, kp = jax.random.split(key)
    z = jax.random.normal(kz, (B, nz), jnp.float32)
    P = make_params(kp, nz=nz, ngf=ngf, img_size=img_size, nc=nc)

    fwd = jax.jit(functools.partial(
        generator_forward_pallas, nz=nz, ngf=ngf, img_size=img_size, nc=nc))
    img = jax.block_until_ready(fwd(z, P))

    ref = generator_forward_reference(z, P, nz=nz, ngf=ngf, img_size=img_size, nc=nc)
    assert img.shape == (B, nc, img_size, img_size), img.shape
    max_err = float(jnp.max(jnp.abs(img - ref)))
    assert max_err < 5e-4, max_err

    print("KERNEL_OK")
</pallas_src>

<mosaic_0001>
module attributes {stable_mosaic.version = 11 : i64} {
  func.func @_generator_kernel(%arg0: i32, %arg1: memref<2x32xf32, #tpu.memory_space<vmem>>, %arg2: memref<512x32xf32, #tpu.memory_space<vmem>>, %arg3: memref<32x1xf32, #tpu.memory_space<vmem>>, %arg4: memref<32x16xf32, #tpu.memory_space<vmem>>, %arg5: memref<1x64xi32, #tpu.memory_space<vmem>>, %arg6: memref<1x64xi32, #tpu.memory_space<vmem>>, %arg7: memref<3x3x32x32xf32, #tpu.memory_space<vmem>>, %arg8: memref<32x1xf32, #tpu.memory_space<vmem>>, %arg9: memref<32x1xf32, #tpu.memory_space<vmem>>, %arg10: memref<1x256xi32, #tpu.memory_space<vmem>>, %arg11: memref<1x256xi32, #tpu.memory_space<vmem>>, %arg12: memref<3x3x16x32xf32, #tpu.memory_space<vmem>>, %arg13: memref<16x1xf32, #tpu.memory_space<vmem>>, %arg14: memref<16x1xf32, #tpu.memory_space<vmem>>, %arg15: memref<3x3x3x16xf32, #tpu.memory_space<vmem>>, %arg16: memref<3x1xf32, #tpu.memory_space<vmem>>, %arg17: memref<1x3x256xf32, #tpu.memory_space<vmem>>) attributes {dimension_semantics = [#tpu.dimension_semantics<parallel>], iteration_bounds = array<i64: 2>, scalar_prefetch = 0 : i64, scratch_operands = 0 : i64, tpu.core_type = #tpu.core_type<tc>, window_params = [{pipeline_mode = #tpu.pipeline_mode<synchronous>, transform_indices = @transform_0, window_bounds = array<i64: 2, 32>}, {pipeline_mode = #tpu.pipeline_mode<synchronous>, transform_indices = @transform_1, window_bounds = array<i64: 512, 32>}, {pipeline_mode = #tpu.pipeline_mode<synchronous>, transform_indices = @transform_2, window_bounds = array<i64: 32, 1>}, {pipeline_mode = #tpu.pipeline_mode<synchronous>, transform_indices = @transform_3, window_bounds = array<i64: 32, 16>}, {pipeline_mode = #tpu.pipeline_mode<synchronous>, transform_indices = @transform_4, window_bounds = array<i64: 1, 64>}, {pipeline_mode = #tpu.pipeline_mode<synchronous>, transform_indices = @transform_5, window_bounds = array<i64: 1, 64>}, {pipeline_mode = #tpu.pipeline_mode<synchronous>, transform_indices = @transform_6, window_bounds = array<i64: 3, 3, 32, 32>}, {pipeline_mode = #tpu.pipeline_mode<synchronous>, transform_indices = @transform_7, window_bounds = array<i64: 32, 1>}, {pipeline_mode = #tpu.pipeline_mode<synchronous>, transform_indices = @transform_8, window_bounds = array<i64: 32, 1>}, {pipeline_mode = #tpu.pipeline_mode<synchronous>, transform_indices = @transform_9, window_bounds = array<i64: 1, 256>}, {pipeline_mode = #tpu.pipeline_mode<synchronous>, transform_indices = @transform_10, window_bounds = array<i64: 1, 256>}, {pipeline_mode = #tpu.pipeline_mode<synchronous>, transform_indices = @transform_11, window_bounds = array<i64: 3, 3, 16, 32>}, {pipeline_mode = #tpu.pipeline_mode<synchronous>, transform_indices = @transform_12, window_bounds = array<i64: 16, 1>}, {pipeline_mode = #tpu.pipeline_mode<synchronous>, transform_indices = @transform_13, window_bounds = array<i64: 16, 1>}, {pipeline_mode = #tpu.pipeline_mode<synchronous>, transform_indices = @transform_14, window_bounds = array<i64: 3, 3, 3, 16>}, {pipeline_mode = #tpu.pipeline_mode<synchronous>, transform_indices = @transform_15, window_bounds = array<i64: 3, 1>}, {transform_indices = @transform_16, window_bounds = array<i64: 1, 3, 256>}]} {
    %0 = arith.index_cast %arg0 : i32 to index
    %c0 = arith.constant 0 : index
    %1 = vector.load %arg1[%0, %c0] : memref<2x32xf32, #tpu.memory_space<vmem>>, vector<1x32xf32>
    %c0_0 = arith.constant 0 : index
    %c0_1 = arith.constant 0 : index
    %2 = vector.load %arg2[%c0_0, %c0_1] : memref<512x32xf32, #tpu.memory_space<vmem>>, vector<512x32xf32>
    %cst = arith.constant dense<0.000000e+00> : vector<512x1xf32>
    %3 = tpu.matmul %2, %1, %cst {dimension_numbers = #tpu.dot_dimension_numbers<[1], [1], [0], [0], [0, 0, 1, 0], [], []>} : vector<512x32xf32>, vector<1x32xf32>, vector<512x1xf32> -> vector<512x1xf32>
    %4 = vector.extract_strided_slice %3 {offsets = [0, 0], sizes = [32, 1], strides = [1, 1]} : vector<512x1xf32> to vector<32x1xf32>
    %5 = vector.extract_strided_slice %3 {offsets = [32, 0], sizes = [32, 1], strides = [1, 1]} : vector<512x1xf32> to vector<32x1xf32>
    %6 = vector.extract_strided_slice %3 {offsets = [64, 0], sizes = [32, 1], strides = [1, 1]} : vector<512x1xf32> to vector<32x1xf32>
    %7 = vector.extract_strided_slice %3 {offsets = [96, 0], sizes = [32, 1], strides = [1, 1]} : vector<512x1xf32> to vector<32x1xf32>
    %8 = vector.extract_strided_slice %3 {offsets = [128, 0], sizes = [32, 1], strides = [1, 1]} : vector<512x1xf32> to vector<32x1xf32>
    %9 = vector.extract_strided_slice %3 {offsets = [160, 0], sizes = [32, 1], strides = [1, 1]} : vector<512x1xf32> to vector<32x1xf32>
    %10 = vector.extract_strided_slice %3 {offsets = [192, 0], sizes = [32, 1], strides = [1, 1]} : vector<512x1xf32> to vector<32x1xf32>
    %11 = vector.extract_strided_slice %3 {offsets = [224, 0], sizes = [32, 1], strides = [1, 1]} : vector<512x1xf32> to vector<32x1xf32>
    %12 = vector.extract_strided_slice %3 {offsets = [256, 0], sizes = [32, 1], strides = [1, 1]} : vector<512x1xf32> to vector<32x1xf32>
    %13 = vector.extract_strided_slice %3 {offsets = [288, 0], sizes = [32, 1], strides = [1, 1]} : vector<512x1xf32> to vector<32x1xf32>
    %14 = vector.extract_strided_slice %3 {offsets = [320, 0], sizes = [32, 1], strides = [1, 1]} : vector<512x1xf32> to vector<32x1xf32>
    %15 = vector.extract_strided_slice %3 {offsets = [352, 0], sizes = [32, 1], strides = [1, 1]} : vector<512x1xf32> to vector<32x1xf32>
    %16 = vector.extract_strided_slice %3 {offsets = [384, 0], sizes = [32, 1], strides = [1, 1]} : vector<512x1xf32> to vector<32x1xf32>
    %17 = vector.extract_strided_slice %3 {offsets = [416, 0], sizes = [32, 1], strides = [1, 1]} : vector<512x1xf32> to vector<32x1xf32>
    %18 = vector.extract_strided_slice %3 {offsets = [448, 0], sizes = [32, 1], strides = [1, 1]} : vector<512x1xf32> to vector<32x1xf32>
    %19 = vector.extract_strided_slice %3 {offsets = [480, 0], sizes = [32, 1], strides = [1, 1]} : vector<512x1xf32> to vector<32x1xf32>
    %20 = tpu.concatenate %4, %5, %6, %7, %8, %9, %10, %11, %12, %13, %14, %15, %16, %17, %18, %19 in 1 : vector<32x1xf32>, vector<32x1xf32>, vector<32x1xf32>, vector<32x1xf32>, vector<32x1xf32>, vector<32x1xf32>, vector<32x1xf32>, vector<32x1xf32>, vector<32x1xf32>, vector<32x1xf32>, vector<32x1xf32>, vector<32x1xf32>, vector<32x1xf32>, vector<32x1xf32>, vector<32x1xf32>, vector<32x1xf32> -> vector<32x16xf32>
    %c0_2 = arith.constant 0 : index
    %c0_3 = arith.constant 0 : index
    %21 = vector.load %arg3[%c0_2, %c0_3] : memref<32x1xf32, #tpu.memory_space<vmem>>, vector<32x1xf32>
    %22 = vector.broadcast %21 : vector<32x1xf32> to vector<32x16xf32>
    %23 = arith.mulf %20, %22 : vector<32x16xf32>
    %c0_4 = arith.constant 0 : index
    %c0_5 = arith.constant 0 : index
    %24 = vector.load %arg4[%c0_4, %c0_5] : memref<32x16xf32, #tpu.memory_space<vmem>>, vector<32x16xf32>
    %25 = arith.addf %23, %24 : vector<32x16xf32>
    %c0_6 = arith.constant 0 : index
    %c0_7 = arith.constant 0 : index
    %26 = vector.load %arg5[%c0_6, %c0_7] : memref<1x64xi32, #tpu.memory_space<vmem>>, vector<1x64xi32>
    %27 = tpu.iota {dimensions = array<i32: 0>} : vector<16x64xi32>
    %28 = vector.broadcast %26 : vector<1x64xi32> to vector<16x64xi32>
    %29 = arith.cmpi eq, %27, %28 : vector<16x64xi32>
    %cst_8 = arith.constant 1.000000e+00 : f32
    %cst_9 = arith.constant 0.000000e+00 : f32
    %30 = vector.broadcast %cst_8 : f32 to vector<16x64xf32>
    %31 = vector.broadcast %cst_9 : f32 to vector<16x64xf32>
    %32 = arith.select %29, %30, %31 : vector<16x64xi1>, vector<16x64xf32>
    %cst_10 = arith.constant dense<0.000000e+00> : vector<32x64xf32>
    %33 = tpu.matmul %25, %32, %cst_10 {dimension_numbers = #tpu.dot_dimension_numbers<[1], [0], [0], [1], [0, 0, 1, 1], [], []>} : vector<32x16xf32>, vector<16x64xf32>, vector<32x64xf32> -> vector<32x64xf32>
    %c0_11 = arith.constant 0 : index
    %c0_12 = arith.constant 0 : index
    %34 = vector.load %arg6[%c0_11, %c0_12] : memref<1x64xi32, #tpu.memory_space<vmem>>, vector<1x64xi32>
    %c0_13 = arith.constant 0 : index
    %c0_14 = arith.constant 0 : index
    %35 = vector.load %arg8[%c0_13, %c0_14] : memref<32x1xf32, #tpu.memory_space<vmem>>, vector<32x1xf32>
    %c0_15 = arith.constant 0 : index
    %c0_16 = arith.constant 0 : index
    %36 = vector.load %arg9[%c0_15, %c0_16] : memref<32x1xf32, #tpu.memory_space<vmem>>, vector<32x1xf32>
    %cst_17 = arith.constant 0.000000e+00 : f32
    %37 = vector.broadcast %cst_17 : f32 to vector<32x9xf32>
    %38 = tpu.concatenate %37, %33, %37 in 1 : vector<32x9xf32>, vector<32x64xf32>, vector<32x9xf32> -> vector<32x82xf32>
    %c1_i32 = arith.constant 1 : i32
    %39 = vector.broadcast %c1_i32 : i32 to vector<1x64xi32>
    %40 = arith.cmpi sge, %34, %39 : vector<1x64xi32>
    %c6_i32 = arith.constant 6 : i32
    %41 = vector.broadcast %c6_i32 : i32 to vector<1x64xi32>
    %42 = arith.cmpi sle, %34, %41 : vector<1x64xi32>
    %cst_18 = arith.constant 0.000000e+00 : f32
    %43 = vector.broadcast %cst_18 : f32 to vector<32x64xf32>
    %44 = vector.extract_strided_slice %38 {offsets = [0, 0], sizes = [32, 64], strides = [1, 1]} : vector<32x82xf32> to vector<32x64xf32>
    %cst_19 = arith.constant 0.000000e+00 : f32
    %45 = vector.shape_cast %40 : vector<1x64xi1> to vector<1x64xi1>
    %46 = vector.broadcast %45 : vector<1x64xi1> to vector<32x64xi1>
    %47 = vector.broadcast %cst_19 : f32 to vector<32x64xf32>
    %48 = arith.select %46, %44, %47 : vector<32x64xi1>, vector<32x64xf32>
    %c0_20 = arith.constant 0 : index
    %c0_21 = arith.constant 0 : index
    %c0_22 = arith.constant 0 : index
    %c0_23 = arith.constant 0 : index
    %49 = vector.load %arg7[%c0_20, %c0_21, %c0_22, %c0_23] : memref<3x3x32x32xf32, #tpu.memory_space<vmem>>, vector<1x1x32x32xf32>
    %50 = vector.shape_cast %49 : vector<1x1x32x32xf32> to vector<32x32xf32>
    %cst_24 = arith.constant dense<0.000000e+00> : vector<32x64xf32>
    %51 = tpu.matmul %50, %48, %cst_24 {dimension_numbers = #tpu.dot_dimension_numbers<[1], [0], [0], [1], [0, 0, 1, 1], [], []>} : vector<32x32xf32>, vector<32x64xf32>, vector<32x64xf32> -> vector<32x64xf32>
    %52 = arith.addf %43, %51 : vector<32x64xf32>
    %53 = vector.extract_strided_slice %38 {offsets = [0, 1], sizes = [32, 64], strides = [1, 1]} : vector<32x82xf32> to vector<32x64xf32>
    %c0_25 = arith.constant 0 : index
    %c1 = arith.constant 1 : index
    %c0_26 = arith.constant 0 : index
    %c0_27 = arith.constant 0 : index
    %54 = vector.load %arg7[%c0_25, %c1, %c0_26, %c0_27] : memref<3x3x32x32xf32, #tpu.memory_space<vmem>>, vector<1x1x32x32xf32>
    %55 = vector.shape_cast %54 : vector<1x1x32x32xf32> to vector<32x32xf32>
    %cst_28 = arith.constant dense<0.000000e+00> : vector<32x64xf32>
    %56 = tpu.matmul %55, %53, %cst_28 {dimension_numbers = #tpu.dot_dimension_numbers<[1], [0], [0], [1], [0, 0, 1, 1], [], []>} : vector<32x32xf32>, vector<32x64xf32>, vector<32x64xf32> -> vector<32x64xf32>
    %57 = arith.addf %52, %56 : vector<32x64xf32>
    %58 = vector.extract_strided_slice %38 {offsets = [0, 2], sizes = [32, 64], strides = [1, 1]} : vector<32x82xf32> to vector<32x64xf32>
    %cst_29 = arith.constant 0.000000e+00 : f32
    %59 = vector.shape_cast %42 : vector<1x64xi1> to vector<1x64xi1>
    %60 = vector.broadcast %59 : vector<1x64xi1> to vector<32x64xi1>
    %61 = vector.broadcast %cst_29 : f32 to vector<32x64xf32>
    %62 = arith.select %60, %58, %61 : vector<32x64xi1>, vector<32x64xf32>
    %c0_30 = arith.constant 0 : index
    %c2 = arith.constant 2 : index
    %c0_31 = arith.constant 0 : index
    %c0_32 = arith.constant 0 : index
    %63 = vector.load %arg7[%c0_30, %c2, %c0_31, %c0_32] : memref<3x3x32x32xf32, #tpu.memory_space<vmem>>, vector<1x1x32x32xf32>
    %64 = vector.shape_cast %63 : vector<1x1x32x32xf32> to vector<32x32xf32>
    %cst_33 = arith.constant dense<0.000000e+00> : vector<32x64xf32>
    %65 = tpu.matmul %64, %62, %cst_33 {dimension_numbers = #tpu.dot_dimension_numbers<[1], [0], [0], [1], [0, 0, 1, 1], [], []>} : vector<32x32xf32>, vector<32x64xf32>, vector<32x64xf32> -> vector<32x64xf32>
    %66 = arith.addf %57, %65 : vector<32x64xf32>
    %67 = vector.extract_strided_slice %38 {offsets = [0, 8], sizes = [32, 64], strides = [1, 1]} : vector<32x82xf32> to vector<32x64xf32>
    %cst_34 = arith.constant 0.000000e+00 : f32
    %68 = vector.shape_cast %40 : vector<1x64xi1> to vector<1x64xi1>
    %69 = vector.broadcast %68 : vector<1x64xi1> to vector<32x64xi1>
    %70 = vector.broadcast %cst_34 : f32 to vector<32x64xf32>
    %71 = arith.select %69, %67, %70 : vector<32x64xi1>, vector<32x64xf32>
    %c1_35 = arith.constant 1 : index
    %c0_36 = arith.constant 0 : index
    %c0_37 = arith.constant 0 : index
    %c0_38 = arith.constant 0 : index
    %72 = vector.load %arg7[%c1_35, %c0_36, %c0_37, %c0_38] : memref<3x3x32x32xf32, #tpu.memory_space<vmem>>, vector<1x1x32x32xf32>
    %73 = vector.shape_cast %72 : vector<1x1x32x32xf32> to vector<32x32xf32>
    %cst_39 = arith.constant dense<0.000000e+00> : vector<32x64xf32>
    %74 = tpu.matmul %73, %71, %cst_39 {dimension_numbers = #tpu.dot_dimension_numbers<[1], [0], [0], [1], [0, 0, 1, 1], [], []>} : vector<32x32xf32>, vector<32x64xf32>, vector<32x64xf32> -> vector<32x64xf32>
    %75 = arith.addf %66, %74 : vector<32x64xf32>
    %76 = vector.extract_strided_slice %38 {offsets = [0, 9], sizes = [32, 64], strides = [1, 1]} : vector<32x82xf32> to vector<32x64xf32>
    %c1_40 = arith.constant 1 : index
    %c1_41 = arith.constant 1 : index
    %c0_42 = arith.constant 0 : index
    %c0_43 = arith.constant 0 : index
    %77 = vector.load %arg7[%c1_40, %c1_41, %c0_42, %c0_43] : memref<3x3x32x32xf32, #tpu.memory_space<vmem>>, vector<1x1x32x32xf32>
    %78 = vector.shape_cast %77 : vector<1x1x32x32xf32> to vector<32x32xf32>
    %cst_44 = arith.constant dense<0.000000e+00> : vector<32x64xf32>
    %79 = tpu.matmul %78, %76, %cst_44 {dimension_numbers = #tpu.dot_dimension_numbers<[1], [0], [0], [1], [0, 0, 1, 1], [], []>} : vector<32x32xf32>, vector<32x64xf32>, vector<32x64xf32> -> vector<32x64xf32>
    %80 = arith.addf %75, %79 : vector<32x64xf32>
    %81 = vector.extract_strided_slice %38 {offsets = [0, 10], sizes = [32, 64], strides = [1, 1]} : vector<32x82xf32> to vector<32x64xf32>
    %cst_45 = arith.constant 0.000000e+00 : f32
    %82 = vector.shape_cast %42 : vector<1x64xi1> to vector<1x64xi1>
    %83 = vector.broadcast %82 : vector<1x64xi1> to vector<32x64xi1>
    %84 = vector.broadcast %cst_45 : f32 to vector<32x64xf32>
    %85 = arith.select %83, %81, %84 : vector<32x64xi1>, vector<32x64xf32>
    %c1_46 = arith.constant 1 : index
    %c2_47 = arith.constant 2 : index
    %c0_48 = arith.constant 0 : index
    %c0_49 = arith.constant 0 : index
    %86 = vector.load %arg7[%c1_46, %c2_47, %c0_48, %c0_49] : memref<3x3x32x32xf32, #tpu.memory_space<vmem>>, vector<1x1x32x32xf32>
    %87 = vector.shape_cast %86 : vector<1x1x32x32xf32> to vector<32x32xf32>
    %cst_50 = arith.constant dense<0.000000e+00> : vector<32x64xf32>
    %88 = tpu.matmul %87, %85, %cst_50 {dimension_numbers = #tpu.dot_dimension_numbers<[1], [0], [0], [1], [0, 0, 1, 1], [], []>} : vector<32x32xf32>, vector<32x64xf32>, vector<32x64xf32> -> vector<32x64xf32>
    %89 = arith.addf %80, %88 : vector<32x64xf32>
    %90 = vector.extract_strided_slice %38 {offsets = [0, 16], sizes = [32, 64], strides = [1, 1]} : vector<32x82xf32> to vector<32x64xf32>
    %cst_51 = arith.constant 0.000000e+00 : f32
    %91 = vector.shape_cast %40 : vector<1x64xi1> to vector<1x64xi1>
    %92 = vector.broadcast %91 : vector<1x64xi1> to vector<32x64xi1>
    %93 = vector.broadcast %cst_51 : f32 to vector<32x64xf32>
    %94 = arith.select %92, %90, %93 : vector<32x64xi1>, vector<32x64xf32>
    %c2_52 = arith.constant 2 : index
    %c0_53 = arith.constant 0 : index
    %c0_54 = arith.constant 0 : index
    %c0_55 = arith.constant 0 : index
    %95 = vector.load %arg7[%c2_52, %c0_53, %c0_54, %c0_55] : memref<3x3x32x32xf32, #tpu.memory_space<vmem>>, vector<1x1x32x32xf32>
    %96 = vector.shape_cast %95 : vector<1x1x32x32xf32> to vector<32x32xf32>
    %cst_56 = arith.constant dense<0.000000e+00> : vector<32x64xf32>
    %97 = tpu.matmul %96, %94, %cst_56 {dimension_numbers = #tpu.dot_dimension_numbers<[1], [0], [0], [1], [0, 0, 1, 1], [], []>} : vector<32x32xf32>, vector<32x64xf32>, vector<32x64xf32> -> vector<32x64xf32>
    %98 = arith.addf %89, %97 : vector<32x64xf32>
    %99 = vector.extract_strided_slice %38 {offsets = [0, 17], sizes = [32, 64], strides = [1, 1]} : vector<32x82xf32> to vector<32x64xf32>
    %c2_57 = arith.constant 2 : index
    %c1_58 = arith.constant 1 : index
    %c0_59 = arith.constant 0 : index
    %c0_60 = arith.constant 0 : index
    %100 = vector.load %arg7[%c2_57, %c1_58, %c0_59, %c0_60] : memref<3x3x32x32xf32, #tpu.memory_space<vmem>>, vector<1x1x32x32xf32>
    %101 = vector.shape_cast %100 : vector<1x1x32x32xf32> to vector<32x32xf32>
    %cst_61 = arith.constant dense<0.000000e+00> : vector<32x64xf32>
    %102 = tpu.matmul %101, %99, %cst_61 {dimension_numbers = #tpu.dot_dimension_numbers<[1], [0], [0], [1], [0, 0, 1, 1], [], []>} : vector<32x32xf32>, vector<32x64xf32>, vector<32x64xf32> -> vector<32x64xf32>
    %103 = arith.addf %98, %102 : vector<32x64xf32>
    %104 = vector.extract_strided_slice %38 {offsets = [0, 18], sizes = [32, 64], strides = [1, 1]} : vector<32x82xf32> to vector<32x64xf32>
    %cst_62 = arith.constant 0.000000e+00 : f32
    %105 = vector.shape_cast %42 : vector<1x64xi1> to vector<1x64xi1>
    %106 = vector.broadcast %105 : vector<1x64xi1> to vector<32x64xi1>
    %107 = vector.broadcast %cst_62 : f32 to vector<32x64xf32>
    %108 = arith.select %106, %104, %107 : vector<32x64xi1>, vector<32x64xf32>
    %c2_63 = arith.constant 2 : index
    %c2_64 = arith.constant 2 : index
    %c0_65 = arith.constant 0 : index
    %c0_66 = arith.constant 0 : index
    %109 = vector.load %arg7[%c2_63, %c2_64, %c0_65, %c0_66] : memref<3x3x32x32xf32, #tpu.memory_space<vmem>>, vector<1x1x32x32xf32>
    %110 = vector.shape_cast %109 : vector<1x1x32x32xf32> to vector<32x32xf32>
    %cst_67 = arith.constant dense<0.000000e+00> : vector<32x64xf32>
    %111 = tpu.matmul %110, %108, %cst_67 {dimension_numbers = #tpu.dot_dimension_numbers<[1], [0], [0], [1], [0, 0, 1, 1], [], []>} : vector<32x32xf32>, vector<32x64xf32>, vector<32x64xf32> -> vector<32x64xf32>
    %112 = arith.addf %103, %111 : vector<32x64xf32>
    %113 = vector.broadcast %35 : vector<32x1xf32> to vector<32x64xf32>
    %114 = arith.mulf %112, %113 : vector<32x64xf32>
    %115 = vector.broadcast %36 : vector<32x1xf32> to vector<32x64xf32>
    %116 = arith.addf %114, %115 : vector<32x64xf32>
    %cst_68 = arith.constant 0.000000e+00 : f32
    %117 = vector.broadcast %cst_68 : f32 to vector<32x64xf32>
    %118 = arith.cmpf ogt, %116, %117 : vector<32x64xf32>
    %cst_69 = arith.constant 2.000000e-01 : f32
    %119 = vector.broadcast %cst_69 : f32 to vector<32x64xf32>
    %120 = arith.mulf %119, %116 : vector<32x64xf32>
    %121 = arith.select %118, %116, %120 : vector<32x64xi1>, vector<32x64xf32>
    %c0_70 = arith.constant 0 : index
    %c0_71 = arith.constant 0 : index
    %122 = vector.load %arg10[%c0_70, %c0_71] : memref<1x256xi32, #tpu.memory_space<vmem>>, vector<1x256xi32>
    %123 = tpu.iota {dimensions = array<i32: 0>} : vector<64x256xi32>
    %124 = vector.broadcast %122 : vector<1x256xi32> to vector<64x256xi32>
    %125 = arith.cmpi eq, %123, %124 : vector<64x256xi32>
    %cst_72 = arith.constant 1.000000e+00 : f32
    %cst_73 = arith.constant 0.000000e+00 : f32
    %126 = vector.broadcast %cst_72 : f32 to vector<64x256xf32>
    %127 = vector.broadcast %cst_73 : f32 to vector<64x256xf32>
    %128 = arith.select %125, %126, %127 : vector<64x256xi1>, vector<64x256xf32>
    %cst_74 = arith.constant dense<0.000000e+00> : vector<32x256xf32>
    %129 = tpu.matmul %121, %128, %cst_74 {dimension_numbers = #tpu.dot_dimension_numbers<[1], [0], [0], [1], [0, 0, 1, 1], [], []>} : vector<32x64xf32>, vector<64x256xf32>, vector<32x256xf32> -> vector<32x256xf32>
    %c0_75 = arith.constant 0 : index
    %c0_76 = arith.constant 0 : index
    %130 = vector.load %arg11[%c0_75, %c0_76] : memref<1x256xi32, #tpu.memory_space<vmem>>, vector<1x256xi32>
    %c0_77 = arith.constant 0 : index
    %c0_78 = arith.constant 0 : index
    %131 = vector.load %arg13[%c0_77, %c0_78] : memref<16x1xf32, #tpu.memory_space<vmem>>, vector<16x1xf32>
    %c0_79 = arith.constant 0 : index
    %c0_80 = arith.constant 0 : index
    %132 = vector.load %arg14[%c0_79, %c0_80] : memref<16x1xf32, #tpu.memory_space<vmem>>, vector<16x1xf32>
    %cst_81 = arith.constant 0.000000e+00 : f32
    %133 = vector.broadcast %cst_81 : f32 to vector<32x17xf32>
    %134 = tpu.concatenate %133, %129, %133 in 1 : vector<32x17xf32>, vector<32x256xf32>, vector<32x17xf32> -> vector<32x290xf32>
    %c1_i32_82 = arith.constant 1 : i32
    %135 = vector.broadcast %c1_i32_82 : i32 to vector<1x256xi32>
    %136 = arith.cmpi sge, %130, %135 : vector<1x256xi32>
    %c14_i32 = arith.constant 14 : i32
    %137 = vector.broadcast %c14_i32 : i32 to vector<1x256xi32>
    %138 = arith.cmpi sle, %130, %137 : vector<1x256xi32>
    %cst_83 = arith.constant 0.000000e+00 : f32
    %139 = vector.broadcast %cst_83 : f32 to vector<16x256xf32>
    %140 = vector.extract_strided_slice %134 {offsets = [0, 0], sizes = [32, 256], strides = [1, 1]} : vector<32x290xf32> to vector<32x256xf32>
    %cst_84 = arith.constant 0.000000e+00 : f32
    %141 = vector.shape_cast %136 : vector<1x256xi1> to vector<1x256xi1>
    %142 = vector.broadcast %141 : vector<1x256xi1> to vector<32x256xi1>
    %143 = vector.broadcast %cst_84 : f32 to vector<32x256xf32>
    %144 = arith.select %142, %140, %143 : vector<32x256xi1>, vector<32x256xf32>
    %c0_85 = arith.constant 0 : index
    %c0_86 = arith.constant 0 : index
    %c0_87 = arith.constant 0 : index
    %c0_88 = arith.constant 0 : index
    %145 = vector.load %arg12[%c0_85, %c0_86, %c0_87, %c0_88] : memref<3x3x16x32xf32, #tpu.memory_space<vmem>>, vector<1x1x16x32xf32>
    %146 = vector.shape_cast %145 : vector<1x1x16x32xf32> to vector<16x32xf32>
    %cst_89 = arith.constant dense<0.000000e+00> : vector<16x256xf32>
    %147 = tpu.matmul %146, %144, %cst_89 {dimension_numbers = #tpu.dot_dimension_numbers<[1], [0], [0], [1], [0, 0, 1, 1], [], []>} : vector<16x32xf32>, vector<32x256xf32>, vector<16x256xf32> -> vector<16x256xf32>
    %148 = arith.addf %139, %147 : vector<16x256xf32>
    %149 = vector.extract_strided_slice %134 {offsets = [0, 1], sizes = [32, 256], strides = [1, 1]} : vector<32x290xf32> to vector<32x256xf32>
    %c0_90 = arith.constant 0 : index
    %c1_91 = arith.constant 1 : index
    %c0_92 = arith.constant 0 : index
    %c0_93 = arith.constant 0 : index
    %150 = vector.load %arg12[%c0_90, %c1_91, %c0_92, %c0_93] : memref<3x3x16x32xf32, #tpu.memory_space<vmem>>, vector<1x1x16x32xf32>
    %151 = vector.shape_cast %150 : vector<1x1x16x32xf32> to vector<16x32xf32>
    %cst_94 = arith.constant dense<0.000000e+00> : vector<16x256xf32>
    %152 = tpu.matmul %151, %149, %cst_94 {dimension_numbers = #tpu.dot_dimension_numbers<[1], [0], [0], [1], [0, 0, 1, 1], [], []>} : vector<16x32xf32>, vector<32x256xf32>, vector<16x256xf32> -> vector<16x256xf32>
    %153 = arith.addf %148, %152 : vector<16x256xf32>
    %154 = vector.extract_strided_slice %134 {offsets = [0, 2], sizes = [32, 256], strides = [1, 1]} : vector<32x290xf32> to vector<32x256xf32>
    %cst_95 = arith.constant 0.000000e+00 : f32
    %155 = vector.shape_cast %138 : vector<1x256xi1> to vector<1x256xi1>
    %156 = vector.broadcast %155 : vector<1x256xi1> to vector<32x256xi1>
    %157 = vector.broadcast %cst_95 : f32 to vector<32x256xf32>
    %158 = arith.select %156, %154, %157 : vector<32x256xi1>, vector<32x256xf32>
    %c0_96 = arith.constant 0 : index
    %c2_97 = arith.constant 2 : index
    %c0_98 = arith.constant 0 : index
    %c0_99 = arith.constant 0 : index
    %159 = vector.load %arg12[%c0_96, %c2_97, %c0_98, %c0_99] : memref<3x3x16x32xf32, #tpu.memory_space<vmem>>, vector<1x1x16x32xf32>
    %160 = vector.shape_cast %159 : vector<1x1x16x32xf32> to vector<16x32xf32>
    %cst_100 = arith.constant dense<0.000000e+00> : vector<16x256xf32>
    %161 = tpu.matmul %160, %158, %cst_100 {dimension_numbers = #tpu.dot_dimension_numbers<[1], [0], [0], [1], [0, 0, 1, 1], [], []>} : vector<16x32xf32>, vector<32x256xf32>, vector<16x256xf32> -> vector<16x256xf32>
    %162 = arith.addf %153, %161 : vector<16x256xf32>
    %163 = vector.extract_strided_slice %134 {offsets = [0, 16], sizes = [32, 256], strides = [1, 1]} : vector<32x290xf32> to vector<32x256xf32>
    %cst_101 = arith.constant 0.000000e+00 : f32
    %164 = vector.shape_cast %136 : vector<1x256xi1> to vector<1x256xi1>
    %165 = vector.broadcast %164 : vector<1x256xi1> to vector<32x256xi1>
    %166 = vector.broadcast %cst_101 : f32 to vector<32x256xf32>
    %167 = arith.select %165, %163, %166 : vector<32x256xi1>, vector<32x256xf32>
    %c1_102 = arith.constant 1 : index
    %c0_103 = arith.constant 0 : index
    %c0_104 = arith.constant 0 : index
    %c0_105 = arith.constant 0 : index
    %168 = vector.load %arg12[%c1_102, %c0_103, %c0_104, %c0_105] : memref<3x3x16x32xf32, #tpu.memory_space<vmem>>, vector<1x1x16x32xf32>
    %169 = vector.shape_cast %168 : vector<1x1x16x32xf32> to vector<16x32xf32>
    %cst_106 = arith.constant dense<0.000000e+00> : vector<16x256xf32>
    %170 = tpu.matmul %169, %167, %cst_106 {dimension_numbers = #tpu.dot_dimension_numbers<[1], [0], [0], [1], [0, 0, 1, 1], [], []>} : vector<16x32xf32>, vector<32x256xf32>, vector<16x256xf32> -> vector<16x256xf32>
    %171 = arith.addf %162, %170 : vector<16x256xf32>
    %172 = vector.extract_strided_slice %134 {offsets = [0, 17], sizes = [32, 256], strides = [1, 1]} : vector<32x290xf32> to vector<32x256xf32>
    %c1_107 = arith.constant 1 : index
    %c1_108 = arith.constant 1 : index
    %c0_109 = arith.constant 0 : index
    %c0_110 = arith.constant 0 : index
    %173 = vector.load %arg12[%c1_107, %c1_108, %c0_109, %c0_110] : memref<3x3x16x32xf32, #tpu.memory_space<vmem>>, vector<1x1x16x32xf32>
    %174 = vector.shape_cast %173 : vector<1x1x16x32xf32> to vector<16x32xf32>
    %cst_111 = arith.constant dense<0.000000e+00> : vector<16x256xf32>
    %175 = tpu.matmul %174, %172, %cst_111 {dimension_numbers = #tpu.dot_dimension_numbers<[1], [0], [0], [1], [0, 0, 1, 1], [], []>} : vector<16x32xf32>, vector<32x256xf32>, vector<16x256xf32> -> vector<16x256xf32>
    %176 = arith.addf %171, %175 : vector<16x256xf32>
    %177 = vector.extract_strided_slice %134 {offsets = [0, 18], sizes = [32, 256], strides = [1, 1]} : vector<32x290xf32> to vector<32x256xf32>
    %cst_112 = arith.constant 0.000000e+00 : f32
    %178 = vector.shape_cast %138 : vector<1x256xi1> to vector<1x256xi1>
    %179 = vector.broadcast %178 : vector<1x256xi1> to vector<32x256xi1>
    %180 = vector.broadcast %cst_112 : f32 to vector<32x256xf32>
    %181 = arith.select %179, %177, %180 : vector<32x256xi1>, vector<32x256xf32>
    %c1_113 = arith.constant 1 : index
    %c2_114 = arith.constant 2 : index
    %c0_115 = arith.constant 0 : index
    %c0_116 = arith.constant 0 : index
    %182 = vector.load %arg12[%c1_113, %c2_114, %c0_115, %c0_116] : memref<3x3x16x32xf32, #tpu.memory_space<vmem>>, vector<1x1x16x32xf32>
    %183 = vector.shape_cast %182 : vector<1x1x16x32xf32> to vector<16x32xf32>
    %cst_117 = arith.constant dense<0.000000e+00> : vector<16x256xf32>
    %184 = tpu.matmul %183, %181, %cst_117 {dimension_numbers = #tpu.dot_dimension_numbers<[1], [0], [0], [1], [0, 0, 1, 1], [], []>} : vector<16x32xf32>, vector<32x256xf32>, vector<16x256xf32> -> vector<16x256xf32>
    %185 = arith.addf %176, %184 : vector<16x256xf32>
    %186 = vector.extract_strided_slice %134 {offsets = [0, 32], sizes = [32, 256], strides = [1, 1]} : vector<32x290xf32> to vector<32x256xf32>
    %cst_118 = arith.constant 0.000000e+00 : f32
    %187 = vector.shape_cast %136 : vector<1x256xi1> to vector<1x256xi1>
    %188 = vector.broadcast %187 : vector<1x256xi1> to vector<32x256xi1>
    %189 = vector.broadcast %cst_118 : f32 to vector<32x256xf32>
    %190 = arith.select %188, %186, %189 : vector<32x256xi1>, vector<32x256xf32>
    %c2_119 = arith.constant 2 : index
    %c0_120 = arith.constant 0 : index
    %c0_121 = arith.constant 0 : index
    %c0_122 = arith.constant 0 : index
    %191 = vector.load %arg12[%c2_119, %c0_120, %c0_121, %c0_122] : memref<3x3x16x32xf32, #tpu.memory_space<vmem>>, vector<1x1x16x32xf32>
    %192 = vector.shape_cast %191 : vector<1x1x16x32xf32> to vector<16x32xf32>
    %cst_123 = arith.constant dense<0.000000e+00> : vector<16x256xf32>
    %193 = tpu.matmul %192, %190, %cst_123 {dimension_numbers = #tpu.dot_dimension_numbers<[1], [0], [0], [1], [0, 0, 1, 1], [], []>} : vector<16x32xf32>, vector<32x256xf32>, vector<16x256xf32> -> vector<16x256xf32>
    %194 = arith.addf %185, %193 : vector<16x256xf32>
    %195 = vector.extract_strided_slice %134 {offsets = [0, 33], sizes = [32, 256], strides = [1, 1]} : vector<32x290xf32> to vector<32x256xf32>
    %c2_124 = arith.constant 2 : index
    %c1_125 = arith.constant 1 : index
    %c0_126 = arith.constant 0 : index
    %c0_127 = arith.constant 0 : index
    %196 = vector.load %arg12[%c2_124, %c1_125, %c0_126, %c0_127] : memref<3x3x16x32xf32, #tpu.memory_space<vmem>>, vector<1x1x16x32xf32>
    %197 = vector.shape_cast %196 : vector<1x1x16x32xf32> to vector<16x32xf32>
    %cst_128 = arith.constant dense<0.000000e+00> : vector<16x256xf32>
    %198 = tpu.matmul %197, %195, %cst_128 {dimension_numbers = #tpu.dot_dimension_numbers<[1], [0], [0], [1], [0, 0, 1, 1], [], []>} : vector<16x32xf32>, vector<32x256xf32>, vector<16x256xf32> -> vector<16x256xf32>
    %199 = arith.addf %194, %198 : vector<16x256xf32>
    %200 = vector.extract_strided_slice %134 {offsets = [0, 34], sizes = [32, 256], strides = [1, 1]} : vector<32x290xf32> to vector<32x256xf32>
    %cst_129 = arith.constant 0.000000e+00 : f32
    %201 = vector.shape_cast %138 : vector<1x256xi1> to vector<1x256xi1>
    %202 = vector.broadcast %201 : vector<1x256xi1> to vector<32x256xi1>
    %203 = vector.broadcast %cst_129 : f32 to vector<32x256xf32>
    %204 = arith.select %202, %200, %203 : vector<32x256xi1>, vector<32x256xf32>
    %c2_130 = arith.constant 2 : index
    %c2_131 = arith.constant 2 : index
    %c0_132 = arith.constant 0 : index
    %c0_133 = arith.constant 0 : index
    %205 = vector.load %arg12[%c2_130, %c2_131, %c0_132, %c0_133] : memref<3x3x16x32xf32, #tpu.memory_space<vmem>>, vector<1x1x16x32xf32>
    %206 = vector.shape_cast %205 : vector<1x1x16x32xf32> to vector<16x32xf32>
    %cst_134 = arith.constant dense<0.000000e+00> : vector<16x256xf32>
    %207 = tpu.matmul %206, %204, %cst_134 {dimension_numbers = #tpu.dot_dimension_numbers<[1], [0], [0], [1], [0, 0, 1, 1], [], []>} : vector<16x32xf32>, vector<32x256xf32>, vector<16x256xf32> -> vector<16x256xf32>
    %208 = arith.addf %199, %207 : vector<16x256xf32>
    %209 = vector.broadcast %131 : vector<16x1xf32> to vector<16x256xf32>
    %210 = arith.mulf %208, %209 : vector<16x256xf32>
    %211 = vector.broadcast %132 : vector<16x1xf32> to vector<16x256xf32>
    %212 = arith.addf %210, %211 : vector<16x256xf32>
    %cst_135 = arith.constant 0.000000e+00 : f32
    %213 = vector.broadcast %cst_135 : f32 to vector<16x256xf32>
    %214 = arith.cmpf ogt, %212, %213 : vector<16x256xf32>
    %cst_136 = arith.constant 2.000000e-01 : f32
    %215 = vector.broadcast %cst_136 : f32 to vector<16x256xf32>
    %216 = arith.mulf %215, %212 : vector<16x256xf32>
    %217 = arith.select %214, %212, %216 : vector<16x256xi1>, vector<16x256xf32>
    %c0_137 = arith.constant 0 : index
    %c0_138 = arith.constant 0 : index
    %218 = vector.load %arg11[%c0_137, %c0_138] : memref<1x256xi32, #tpu.memory_space<vmem>>, vector<1x256xi32>
    %c0_139 = arith.constant 0 : index
    %c0_140 = arith.constant 0 : index
    %219 = vector.load %arg16[%c0_139, %c0_140] : memref<3x1xf32, #tpu.memory_space<vmem>>, vector<3x1xf32>
    %cst_141 = arith.constant 0.000000e+00 : f32
    %220 = vector.broadcast %cst_141 : f32 to vector<16x17xf32>
    %221 = tpu.concatenate %220, %217, %220 in 1 : vector<16x17xf32>, vector<16x256xf32>, vector<16x17xf32> -> vector<16x290xf32>
    %c1_i32_142 = arith.constant 1 : i32
    %222 = vector.broadcast %c1_i32_142 : i32 to vector<1x256xi32>
    %223 = arith.cmpi sge, %218, %222 : vector<1x256xi32>
    %c14_i32_143 = arith.constant 14 : i32
    %224 = vector.broadcast %c14_i32_143 : i32 to vector<1x256xi32>
    %225 = arith.cmpi sle, %218, %224 : vector<1x256xi32>
    %cst_144 = arith.constant 0.000000e+00 : f32
    %226 = vector.broadcast %cst_144 : f32 to vector<3x256xf32>
    %227 = vector.extract_strided_slice %221 {offsets = [0, 0], sizes = [16, 256], strides = [1, 1]} : vector<16x290xf32> to vector<16x256xf32>
    %cst_145 = arith.constant 0.000000e+00 : f32
    %228 = vector.shape_cast %223 : vector<1x256xi1> to vector<1x256xi1>
    %229 = vector.broadcast %228 : vector<1x256xi1> to vector<16x256xi1>
    %230 = vector.broadcast %cst_145 : f32 to vector<16x256xf32>
    %231 = arith.select %229, %227, %230 : vector<16x256xi1>, vector<16x256xf32>
    %c0_146 = arith.constant 0 : index
    %c0_147 = arith.constant 0 : index
    %c0_148 = arith.constant 0 : index
    %c0_149 = arith.constant 0 : index
    %232 = vector.load %arg15[%c0_146, %c0_147, %c0_148, %c0_149] : memref<3x3x3x16xf32, #tpu.memory_space<vmem>>, vector<1x1x3x16xf32>
    %233 = vector.shape_cast %232 : vector<1x1x3x16xf32> to vector<3x16xf32>
    %cst_150 = arith.constant dense<0.000000e+00> : vector<3x256xf32>
    %234 = tpu.matmul %233, %231, %cst_150 {dimension_numbers = #tpu.dot_dimension_numbers<[1], [0], [0], [1], [0, 0, 1, 1], [], []>} : vector<3x16xf32>, vector<16x256xf32>, vector<3x256xf32> -> vector<3x256xf32>
    %235 = arith.addf %226, %234 : vector<3x256xf32>
    %236 = vector.extract_strided_slice %221 {offsets = [0, 1], sizes = [16, 256], strides = [1, 1]} : vector<16x290xf32> to vector<16x256xf32>
    %c0_151 = arith.constant 0 : index
    %c1_152 = arith.constant 1 : index
    %c0_153 = arith.constant 0 : index
    %c0_154 = arith.constant 0 : index
    %237 = vector.load %arg15[%c0_151, %c1_152, %c0_153, %c0_154] : memref<3x3x3x16xf32, #tpu.memory_space<vmem>>, vector<1x1x3x16xf32>
    %238 = vector.shape_cast %237 : vector<1x1x3x16xf32> to vector<3x16xf32>
    %cst_155 = arith.constant dense<0.000000e+00> : vector<3x256xf32>
    %239 = tpu.matmul %238, %236, %cst_155 {dimension_numbers = #tpu.dot_dimension_numbers<[1], [0], [0], [1], [0, 0, 1, 1], [], []>} : vector<3x16xf32>, vector<16x256xf32>, vector<3x256xf32> -> vector<3x256xf32>
    %240 = arith.addf %235, %239 : vector<3x256xf32>
    %241 = vector.extract_strided_slice %221 {offsets = [0, 2], sizes = [16, 256], strides = [1, 1]} : vector<16x290xf32> to vector<16x256xf32>
    %cst_156 = arith.constant 0.000000e+00 : f32
    %242 = vector.shape_cast %225 : vector<1x256xi1> to vector<1x256xi1>
    %243 = vector.broadcast %242 : vector<1x256xi1> to vector<16x256xi1>
    %244 = vector.broadcast %cst_156 : f32 to vector<16x256xf32>
    %245 = arith.select %243, %241, %244 : vector<16x256xi1>, vector<16x256xf32>
    %c0_157 = arith.constant 0 : index
    %c2_158 = arith.constant 2 : index
    %c0_159 = arith.constant 0 : index
    %c0_160 = arith.constant 0 : index
    %246 = vector.load %arg15[%c0_157, %c2_158, %c0_159, %c0_160] : memref<3x3x3x16xf32, #tpu.memory_space<vmem>>, vector<1x1x3x16xf32>
    %247 = vector.shape_cast %246 : vector<1x1x3x16xf32> to vector<3x16xf32>
    %cst_161 = arith.constant dense<0.000000e+00> : vector<3x256xf32>
    %248 = tpu.matmul %247, %245, %cst_161 {dimension_numbers = #tpu.dot_dimension_numbers<[1], [0], [0], [1], [0, 0, 1, 1], [], []>} : vector<3x16xf32>, vector<16x256xf32>, vector<3x256xf32> -> vector<3x256xf32>
    %249 = arith.addf %240, %248 : vector<3x256xf32>
    %250 = vector.extract_strided_slice %221 {offsets = [0, 16], sizes = [16, 256], strides = [1, 1]} : vector<16x290xf32> to vector<16x256xf32>
    %cst_162 = arith.constant 0.000000e+00 : f32
    %251 = vector.shape_cast %223 : vector<1x256xi1> to vector<1x256xi1>
    %252 = vector.broadcast %251 : vector<1x256xi1> to vector<16x256xi1>
    %253 = vector.broadcast %cst_162 : f32 to vector<16x256xf32>
    %254 = arith.select %252, %250, %253 : vector<16x256xi1>, vector<16x256xf32>
    %c1_163 = arith.constant 1 : index
    %c0_164 = arith.constant 0 : index
    %c0_165 = arith.constant 0 : index
    %c0_166 = arith.constant 0 : index
    %255 = vector.load %arg15[%c1_163, %c0_164, %c0_165, %c0_166] : memref<3x3x3x16xf32, #tpu.memory_space<vmem>>, vector<1x1x3x16xf32>
    %256 = vector.shape_cast %255 : vector<1x1x3x16xf32> to vector<3x16xf32>
    %cst_167 = arith.constant dense<0.000000e+00> : vector<3x256xf32>
    %257 = tpu.matmul %256, %254, %cst_167 {dimension_numbers = #tpu.dot_dimension_numbers<[1], [0], [0], [1], [0, 0, 1, 1], [], []>} : vector<3x16xf32>, vector<16x256xf32>, vector<3x256xf32> -> vector<3x256xf32>
    %258 = arith.addf %249, %257 : vector<3x256xf32>
    %259 = vector.extract_strided_slice %221 {offsets = [0, 17], sizes = [16, 256], strides = [1, 1]} : vector<16x290xf32> to vector<16x256xf32>
    %c1_168 = arith.constant 1 : index
    %c1_169 = arith.constant 1 : index
    %c0_170 = arith.constant 0 : index
    %c0_171 = arith.constant 0 : index
    %260 = vector.load %arg15[%c1_168, %c1_169, %c0_170, %c0_171] : memref<3x3x3x16xf32, #tpu.memory_space<vmem>>, vector<1x1x3x16xf32>
    %261 = vector.shape_cast %260 : vector<1x1x3x16xf32> to vector<3x16xf32>
    %cst_172 = arith.constant dense<0.000000e+00> : vector<3x256xf32>
    %262 = tpu.matmul %261, %259, %cst_172 {dimension_numbers = #tpu.dot_dimension_numbers<[1], [0], [0], [1], [0, 0, 1, 1], [], []>} : vector<3x16xf32>, vector<16x256xf32>, vector<3x256xf32> -> vector<3x256xf32>
    %263 = arith.addf %258, %262 : vector<3x256xf32>
    %264 = vector.extract_strided_slice %221 {offsets = [0, 18], sizes = [16, 256], strides = [1, 1]} : vector<16x290xf32> to vector<16x256xf32>
    %cst_173 = arith.constant 0.000000e+00 : f32
    %265 = vector.shape_cast %225 : vector<1x256xi1> to vector<1x256xi1>
    %266 = vector.broadcast %265 : vector<1x256xi1> to vector<16x256xi1>
    %267 = vector.broadcast %cst_173 : f32 to vector<16x256xf32>
    %268 = arith.select %266, %264, %267 : vector<16x256xi1>, vector<16x256xf32>
    %c1_174 = arith.constant 1 : index
    %c2_175 = arith.constant 2 : index
    %c0_176 = arith.constant 0 : index
    %c0_177 = arith.constant 0 : index
    %269 = vector.load %arg15[%c1_174, %c2_175, %c0_176, %c0_177] : memref<3x3x3x16xf32, #tpu.memory_space<vmem>>, vector<1x1x3x16xf32>
    %270 = vector.shape_cast %269 : vector<1x1x3x16xf32> to vector<3x16xf32>
    %cst_178 = arith.constant dense<0.000000e+00> : vector<3x256xf32>
    %271 = tpu.matmul %270, %268, %cst_178 {dimension_numbers = #tpu.dot_dimension_numbers<[1], [0], [0], [1], [0, 0, 1, 1], [], []>} : vector<3x16xf32>, vector<16x256xf32>, vector<3x256xf32> -> vector<3x256xf32>
    %272 = arith.addf %263, %271 : vector<3x256xf32>
    %273 = vector.extract_strided_slice %221 {offsets = [0, 32], sizes = [16, 256], strides = [1, 1]} : vector<16x290xf32> to vector<16x256xf32>
    %cst_179 = arith.constant 0.000000e+00 : f32
    %274 = vector.shape_cast %223 : vector<1x256xi1> to vector<1x256xi1>
    %275 = vector.broadcast %274 : vector<1x256xi1> to vector<16x256xi1>
    %276 = vector.broadcast %cst_179 : f32 to vector<16x256xf32>
    %277 = arith.select %275, %273, %276 : vector<16x256xi1>, vector<16x256xf32>
    %c2_180 = arith.constant 2 : index
    %c0_181 = arith.constant 0 : index
    %c0_182 = arith.constant 0 : index
    %c0_183 = arith.constant 0 : index
    %278 = vector.load %arg15[%c2_180, %c0_181, %c0_182, %c0_183] : memref<3x3x3x16xf32, #tpu.memory_space<vmem>>, vector<1x1x3x16xf32>
    %279 = vector.shape_cast %278 : vector<1x1x3x16xf32> to vector<3x16xf32>
    %cst_184 = arith.constant dense<0.000000e+00> : vector<3x256xf32>
    %280 = tpu.matmul %279, %277, %cst_184 {dimension_numbers = #tpu.dot_dimension_numbers<[1], [0], [0], [1], [0, 0, 1, 1], [], []>} : vector<3x16xf32>, vector<16x256xf32>, vector<3x256xf32> -> vector<3x256xf32>
    %281 = arith.addf %272, %280 : vector<3x256xf32>
    %282 = vector.extract_strided_slice %221 {offsets = [0, 33], sizes = [16, 256], strides = [1, 1]} : vector<16x290xf32> to vector<16x256xf32>
    %c2_185 = arith.constant 2 : index
    %c1_186 = arith.constant 1 : index
    %c0_187 = arith.constant 0 : index
    %c0_188 = arith.constant 0 : index
    %283 = vector.load %arg15[%c2_185, %c1_186, %c0_187, %c0_188] : memref<3x3x3x16xf32, #tpu.memory_space<vmem>>, vector<1x1x3x16xf32>
    %284 = vector.shape_cast %283 : vector<1x1x3x16xf32> to vector<3x16xf32>
    %cst_189 = arith.constant dense<0.000000e+00> : vector<3x256xf32>
    %285 = tpu.matmul %284, %282, %cst_189 {dimension_numbers = #tpu.dot_dimension_numbers<[1], [0], [0], [1], [0, 0, 1, 1], [], []>} : vector<3x16xf32>, vector<16x256xf32>, vector<3x256xf32> -> vector<3x256xf32>
    %286 = arith.addf %281, %285 : vector<3x256xf32>
    %287 = vector.extract_strided_slice %221 {offsets = [0, 34], sizes = [16, 256], strides = [1, 1]} : vector<16x290xf32> to vector<16x256xf32>
    %cst_190 = arith.constant 0.000000e+00 : f32
    %288 = vector.shape_cast %225 : vector<1x256xi1> to vector<1x256xi1>
    %289 = vector.broadcast %288 : vector<1x256xi1> to vector<16x256xi1>
    %290 = vector.broadcast %cst_190 : f32 to vector<16x256xf32>
    %291 = arith.select %289, %287, %290 : vector<16x256xi1>, vector<16x256xf32>
    %c2_191 = arith.constant 2 : index
    %c2_192 = arith.constant 2 : index
    %c0_193 = arith.constant 0 : index
    %c0_194 = arith.constant 0 : index
    %292 = vector.load %arg15[%c2_191, %c2_192, %c0_193, %c0_194] : memref<3x3x3x16xf32, #tpu.memory_space<vmem>>, vector<1x1x3x16xf32>
    %293 = vector.shape_cast %292 : vector<1x1x3x16xf32> to vector<3x16xf32>
    %cst_195 = arith.constant dense<0.000000e+00> : vector<3x256xf32>
    %294 = tpu.matmul %293, %291, %cst_195 {dimension_numbers = #tpu.dot_dimension_numbers<[1], [0], [0], [1], [0, 0, 1, 1], [], []>} : vector<3x16xf32>, vector<16x256xf32>, vector<3x256xf32> -> vector<3x256xf32>
    %295 = arith.addf %286, %294 : vector<3x256xf32>
    %296 = vector.broadcast %219 : vector<3x1xf32> to vector<3x256xf32>
    %297 = arith.addf %295, %296 : vector<3x256xf32>
    %298 = arith.negf %297 : vector<3x256xf32>
    %299 = math.exp %298 : vector<3x256xf32>
    %cst_196 = arith.constant 1.000000e+00 : f32
    %300 = vector.broadcast %cst_196 : f32 to vector<3x256xf32>
    %301 = arith.addf %300, %299 : vector<3x256xf32>
    %302 = arith.divf %300, %301 : vector<3x256xf32>
    %c0_197 = arith.constant 0 : index
    %c0_198 = arith.constant 0 : index
    %c0_199 = arith.constant 0 : index
    %303 = vector.load %arg17[%c0_197, %c0_198, %c0_199] : memref<1x3x256xf32, #tpu.memory_space<vmem>>, vector<1x3x256xf32>
    %304 = vector.shape_cast %303 : vector<1x3x256xf32> to vector<3x256xf32>
    %305 = vector.shape_cast %302 : vector<3x256xf32> to vector<1x3x256xf32>
    tpu.vector_store %arg17[%c0_197, %c0_198, %c0_199], %305 {strides = array<i32>} : memref<1x3x256xf32, #tpu.memory_space<vmem>>, vector<1x3x256xf32>,
    return
  }
  func.func @transform_0(%arg0: i32) -> (i32, i32) {
    %c0_i32 = arith.constant 0 : i32
    %c0_i32_0 = arith.constant 0 : i32
    %c0_i32_1 = arith.constant 0 : i32
    return %c0_i32, %c0_i32_0 : i32, i32
  }
  func.func @transform_1(%arg0: i32) -> (i32, i32) {
    %c0_i32 = arith.constant 0 : i32
    %c0_i32_0 = arith.constant 0 : i32
    %c0_i32_1 = arith.constant 0 : i32
    return %c0_i32, %c0_i32_0 : i32, i32
  }
  func.func @transform_2(%arg0: i32) -> (i32, i32) {
    %c0_i32 = arith.constant 0 : i32
    %c0_i32_0 = arith.constant 0 : i32
    %c0_i32_1 = arith.constant 0 : i32
    return %c0_i32, %c0_i32_0 : i32, i32
  }
  func.func @transform_3(%arg0: i32) -> (i32, i32) {
    %c0_i32 = arith.constant 0 : i32
    %c0_i32_0 = arith.constant 0 : i32
    %c0_i32_1 = arith.constant 0 : i32
    return %c0_i32, %c0_i32_0 : i32, i32
  }
  func.func @transform_4(%arg0: i32) -> (i32, i32) {
    %c0_i32 = arith.constant 0 : i32
    %c0_i32_0 = arith.constant 0 : i32
    %c0_i32_1 = arith.constant 0 : i32
    return %c0_i32, %c0_i32_0 : i32, i32
  }
  func.func @transform_5(%arg0: i32) -> (i32, i32) {
    %c0_i32 = arith.constant 0 : i32
    %c0_i32_0 = arith.constant 0 : i32
    %c0_i32_1 = arith.constant 0 : i32
    return %c0_i32, %c0_i32_0 : i32, i32
  }
  func.func @transform_6(%arg0: i32) -> (i32, i32, i32, i32) {
    %c0_i32 = arith.constant 0 : i32
    %c0_i32_0 = arith.constant 0 : i32
    %c0_i32_1 = arith.constant 0 : i32
    %c0_i32_2 = arith.constant 0 : i32
    %c0_i32_3 = arith.constant 0 : i32
    return %c0_i32, %c0_i32_0, %c0_i32_1, %c0_i32_2 : i32, i32, i32, i32
  }
  func.func @transform_7(%arg0: i32) -> (i32, i32) {
    %c0_i32 = arith.constant 0 : i32
    %c0_i32_0 = arith.constant 0 : i32
    %c0_i32_1 = arith.constant 0 : i32
    return %c0_i32, %c0_i32_0 : i32, i32
  }
  func.func @transform_8(%arg0: i32) -> (i32, i32) {
    %c0_i32 = arith.constant 0 : i32
    %c0_i32_0 = arith.constant 0 : i32
    %c0_i32_1 = arith.constant 0 : i32
    return %c0_i32, %c0_i32_0 : i32, i32
  }
  func.func @transform_9(%arg0: i32) -> (i32, i32) {
    %c0_i32 = arith.constant 0 : i32
    %c0_i32_0 = arith.constant 0 : i32
    %c0_i32_1 = arith.constant 0 : i32
    return %c0_i32, %c0_i32_0 : i32, i32
  }
  func.func @transform_10(%arg0: i32) -> (i32, i32) {
    %c0_i32 = arith.constant 0 : i32
    %c0_i32_0 = arith.constant 0 : i32
    %c0_i32_1 = arith.constant 0 : i32
    return %c0_i32, %c0_i32_0 : i32, i32
  }
  func.func @transform_11(%arg0: i32) -> (i32, i32, i32, i32) {
    %c0_i32 = arith.constant 0 : i32
    %c0_i32_0 = arith.constant 0 : i32
    %c0_i32_1 = arith.constant 0 : i32
    %c0_i32_2 = arith.constant 0 : i32
    %c0_i32_3 = arith.constant 0 : i32
    return %c0_i32, %c0_i32_0, %c0_i32_1, %c0_i32_2 : i32, i32, i32, i32
  }
  func.func @transform_12(%arg0: i32) -> (i32, i32) {
    %c0_i32 = arith.constant 0 : i32
    %c0_i32_0 = arith.constant 0 : i32
    %c0_i32_1 = arith.constant 0 : i32
    return %c0_i32, %c0_i32_0 : i32, i32
  }
  func.func @transform_13(%arg0: i32) -> (i32, i32) {
    %c0_i32 = arith.constant 0 : i32
    %c0_i32_0 = arith.constant 0 : i32
    %c0_i32_1 = arith.constant 0 : i32
    return %c0_i32, %c0_i32_0 : i32, i32
  }
  func.func @transform_14(%arg0: i32) -> (i32, i32, i32, i32) {
    %c0_i32 = arith.constant 0 : i32
    %c0_i32_0 = arith.constant 0 : i32
    %c0_i32_1 = arith.constant 0 : i32
    %c0_i32_2 = arith.constant 0 : i32
    %c0_i32_3 = arith.constant 0 : i32
    return %c0_i32, %c0_i32_0, %c0_i32_1, %c0_i32_2 : i32, i32, i32, i32
  }
  func.func @transform_15(%arg0: i32) -> (i32, i32) {
    %c0_i32 = arith.constant 0 : i32
    %c0_i32_0 = arith.constant 0 : i32
    %c0_i32_1 = arith.constant 0 : i32
    return %c0_i32, %c0_i32_0 : i32, i32
  }
  func.func @transform_16(%arg0: i32) -> (i32, i32, i32) {
    %c0_i32 = arith.constant 0 : i32
    %c0_i32_0 = arith.constant 0 : i32
    %c0_i32_1 = arith.constant 0 : i32
    return %arg0, %c0_i32, %c0_i32_0 : i32, i32, i32
  }
}

</mosaic_0001>

<bundles_post_ra>
// kernel: generator_forward_pallas.1
= control target key start
LH: loop header
LB: loop body
LE: loop exit
PB: predicated region body
PF: predicated region fallthrough
CT: control target
= control target key end

     0   :  { %s4099_s21 = smov 0   ;;  %s5908_s0 = inlined_call_operand.vmem [shape: f32[2,32], index: 0, kind: input, shape index: {}]   ;;  %s5909_s1 = inlined_call_operand.vmem [shape: f32[512,32], index: 1, kind: input, shape index: {}]   ;;  %s5910_s2 = inlined_call_operand.vmem [shape: f32[32,1], index: 2, kind: input, shape index: {}]   ;;  %s5911_s3 = inlined_call_operand.vmem [shape: f32[32,16], index: 3, kind: input, shape index: {}]   ;;  %s5912_s4 = inlined_call_operand.vmem [shape: s32[1,64], index: 4, kind: input, shape index: {}]   ;;  %s5913_s5 = inlined_call_operand.vmem [shape: s32[1,64], index: 5, kind: input, shape index: {}]   ;;  %s5914_s6 = inlined_call_operand.vmem [shape: f32[3,3,32,32], index: 6, kind: input, shape index: {}]   ;;  %s5915_s7 = inlined_call_operand.vmem [shape: f32[32,1], index: 7, kind: input, shape index: {}]   ;;  %s5916_s8 = inlined_call_operand.vmem [shape: f32[32,1], index: 8, kind: input, shape index: {}]   ;;  %s5917_s9 = inlined_call_operand.vmem [shape: s32[1,256], index: 9, kind: input, shape index: {}]   ;;  %s5918_s10 = inlined_call_operand.vmem [shape: s32[1,256], index: 10, kind: input, shape index: {}]   ;;  %s5919_s11 = inlined_call_operand.vmem [shape: f32[3,3,16,32], index: 11, kind: input, shape index: {}]   ;;  %s5920_s12 = inlined_call_operand.vmem [shape: f32[16,1], index: 12, kind: input, shape index: {}]   ;;  %s5921_s13 = inlined_call_operand.vmem [shape: f32[16,1], index: 13, kind: input, shape index: {}]   ;;  %s5922_s14 = inlined_call_operand.vmem [shape: f32[3,3,3,16], index: 14, kind: input, shape index: {}]   ;;  %s5923_s15 = inlined_call_operand.vmem [shape: f32[3,1], index: 15, kind: input, shape index: {}]   ;;  %s5924_s16 = inlined_call_operand.vmem [shape: f32[2,3,256], index: 16, kind: output, shape index: {}]  }
   0x1   :  { %5945 = sst [smem:[#allocation2_spill]] %s5908_s0 }
   0x2 LB: > { %s4105_s22 = sadd.s32 4294967295, %s3997_s21   ;;  %p3509_p0 = scmp.ge.s32.totalorder %s3997_s21, 1  ;;  %s3997_s21 = sphi %s4099_s21, %s26_s21  }
   0x3   : > { %p452_p1 = scmp.lt.s32.totalorder %s3997_s21, 3 }
   0x5   : > { %p453_p2 = pnand %p3509_p0, %p452_p1 }
   0x6   : > { %s5946_s25 = sld [smem:[#allocation2_spill]] (!%p453_p2)  ;;  %s4001_s19 = smov (!%p453_p2), 9  }
   0x7   : > { %456 = sbr.rel (%p453_p2) target bundleno = 2127 (0x84f), region = 84  ;;  %s4002_s20 = smov (!%p453_p2), 126  }
   0x8   : > { %s4003_s23 = smov (!%p453_p2), 120   ;;  %s4004_s24 = smov (!%p453_p2), 127  }
   0x9   : > { %s4007_s27 = smov (!%p453_p2), 119   ;;  %s5928_s28 = smov (!%p453_p2), 110  }
   0xa   : > { %s5926_s29 = smov (!%p453_p2), 111   ;;  %s4010_s17 = smov (!%p453_p2), 17  }
   0xb   : > { %s6030_s18 = smov (!%p453_p2), 95   ;;  %p497_p3 = scmp.lt.s32.totalorder (!%p453_p2), %s4105_s22, 1 }
   0xc   : > { %s502_s26 = scalar_lea.vmem %s5946_s25, %s4105_s22  ;;  %v520_v0 = vld [vmem:[%s5909_s1 + $0x80] sm:$0xff]  ;;  %vm5925_vm0 = vcmask 261120   ;;  %v509_v29 = vld [vmem:[%s5909_s1 + $0x28] sm:$0xff]  ;;  %vm826_vm3 = vcmask 7168   ;;  %vm831_vm4 = vcmask 15360   ;;  %vm836_vm7 = vcmask 23552  }
   0xd   : > { %v512_v1 = vld [vmem:[%s5909_s1 + $0x40] sm:$0xff]  ;;  %v505_v30 = vld [vmem:[%s5909_s1 + $0x8] sm:$0xff]  ;;  %vm841_vm8 = vcmask 31744   ;;  %vm846_vm9 = vcmask 39936   ;;  %vm851_vm10 = vcmask 48128   ;;  %vm856_vm11 = vcmask 56320  }
   0xe   : > { %v504_v2 = vld [vmem:[%s5909_s1] sm:$0xff]  ;;  %v517_v37 = vld [vmem:[%s5909_s1 + $0x68] sm:$0xff]  ;;  %vm861_vm12 = vcmask 64512   ;;  %vm866_vm13 = vcmask 72704   ;;  %vm871_vm14 = vcmask 80896   ;;  %vm876_vm15 = vcmask 89088  }
   0xf   : > { %v4122_v3 = vld [vmem:[%s502_s26] ss:$0 sm:$0xff]  ;;  %v513_v39 = vld [vmem:[%s5909_s1 + $0x48] sm:$0xff]  ;;  %s4005_s25 = smov 118   ;;  %s4006_s26 = smov 112  }
  0x10   : > { %v585_v4 = vmul.f32 %v4122_v3, %v520_v0  ;;  %v577_v5 = vmul.f32 %v4122_v3, %v512_v1  ;;  %v569_v6 = vmul.f32 %v4122_v3, %v504_v2  ;;  %v524_v7 = vld [vmem:[%s5909_s1 + $0xa0] sm:$0xff]  ;;  %v574_v32 = vmul.f32 %v4122_v3, %v509_v29  ;;  %v521_v47 = vld [vmem:[%s5909_s1 + $0x88] sm:$0xff]  ;;  %v546_v29 = vld [vmem:[%s5909_s1 + $0x150] sm:$0xff]  ;;  %s6049_s22 = smov (!%p497_p3, %s4105_s22), 1 }
  0x11   : > { %v516_v8 = vld [vmem:[%s5909_s1 + $0x60] sm:$0xff]  ;;  %v589_v13 = vmul.f32 %v4122_v3, %v524_v7  ;;  %v570_v33 = vmul.f32 %v4122_v3, %v505_v30  ;;  %v582_v40 = vmul.f32 %v4122_v3, %v517_v37  ;;  %v578_v42 = vmul.f32 %v4122_v3, %v513_v39  ;;  %v529_v55 = vld [vmem:[%s5909_s1 + $0xc8] sm:$0xff]  ;;  %v522_v37 = vld [vmem:[%s5909_s1 + $0x90] sm:$0xff] }
  0x12   : > { %v682_v9 = vsel %vm5925_vm0, %v585_v4, 0.0  ;;  %v658_v10 = vsel %vm5925_vm0, %v577_v5, 0.0  ;;  %v634_v11 = vsel %vm5925_vm0, %v569_v6, 0.0  ;;  %v508_v12 = vld [vmem:[%s5909_s1 + $0x20] sm:$0xff]  ;;  %v581_v14 = vmul.f32 %v4122_v3, %v516_v8  ;;  %v525_v57 = vld [vmem:[%s5909_s1 + $0xa8] sm:$0xff] }
  0x13   : > { %683 = vadd.xlane.f32.xlu2 %v682_v9  ;;  %659 = vadd.xlane.f32.xlu1 %v658_v10  ;;  %v573_v15 = vmul.f32 %v4122_v3, %v508_v12  ;;  %v694_v16 = vsel %vm5925_vm0, %v589_v13, 0.0  ;;  %v536_v19 = vld [vmem:[%s5909_s1 + $0x100] sm:$0xff]  ;;  %v649_v35 = vsel %vm5925_vm0, %v574_v32, 0.0  ;;  %v637_v36 = vsel %vm5925_vm0, %v570_v33, 0.0  ;;  %v533_v1 = vld [vmem:[%s5909_s1 + $0xe8] sm:$0xff]  ;;  %v510_v10 = vld [vmem:[%s5909_s1 + $0x30] sm:$0xff] }
  0x14   : > { %635 = vadd.xlane.f32.xlu0 %v634_v11  ;;  %v670_v17 = vsel %vm5925_vm0, %v581_v14, 0.0  ;;  %v532_v20 = vld [vmem:[%s5909_s1 + $0xe0] sm:$0xff]  ;;  %v601_v22 = vmul.f32 %v4122_v3, %v536_v19  ;;  %v673_v43 = vsel %vm5925_vm0, %v582_v40, 0.0  ;;  %v661_v45 = vsel %vm5925_vm0, %v578_v42, 0.0  ;;  %v506_v11 = vld [vmem:[%s5909_s1 + $0x10] sm:$0xff]  ;;  %v537_v12 = vld [vmem:[%s5909_s1 + $0x108] sm:$0xff] }
  0x15   : > { %v646_v18 = vsel %vm5925_vm0, %v573_v15, 0.0  ;;  %v528_v21 = vld [vmem:[%s5909_s1 + $0xc0] sm:$0xff]  ;;  %v597_v23 = vmul.f32 %v4122_v3, %v532_v20  ;;  %v586_v50 = vmul.f32 %v4122_v3, %v521_v47  ;;  %v594_v58 = vmul.f32 %v4122_v3, %v529_v55  ;;  %v514_v19 = vld [vmem:[%s5909_s1 + $0x50] sm:$0xff]  ;;  %v557_v20 = vld [vmem:[%s5909_s1 + $0x1a8] sm:$0xff] }
  0x16   : > { %v593_v24 = vmul.f32 %v4122_v3, %v528_v21  ;;  %v730_v25 = vsel %vm5925_vm0, %v601_v22, 0.0  ;;  %v540_v28 = vld [vmem:[%s5909_s1 + $0x120] sm:$0xff]  ;;  %v590_v60 = vmul.f32 %v4122_v3, %v525_v57  ;;  %v598_v5 = vmul.f32 %v4122_v3, %v533_v1  ;;  %v541_v21 = vld [vmem:[%s5909_s1 + $0x128] sm:$0xff]  ;;  %v554_v47 = vld [vmem:[%s5909_s1 + $0x190] sm:$0xff] }
  0x17   : > { %v718_v26 = vsel %vm5925_vm0, %v597_v23, 0.0  ;;  %v605_v31 = vmul.f32 %v4122_v3, %v540_v28  ;;  %v544_v38 = vld [vmem:[%s5909_s1 + $0x140] sm:$0xff]  ;;  %v685_v53 = vsel %vm5925_vm0, %v586_v50, 0.0  ;;  %v709_v61 = vsel %vm5925_vm0, %v594_v58, 0.0  ;;  %v518_v28 = vld [vmem:[%s5909_s1 + $0x70] sm:$0xff]  ;;  %v545_v30 = vld [vmem:[%s5909_s1 + $0x148] sm:$0xff] }
  0x18   : > { %v706_v27 = vsel %vm5925_vm0, %v593_v24, 0.0  ;;  %v609_v41 = vmul.f32 %v4122_v3, %v544_v38  ;;  %v552_v46 = vld [vmem:[%s5909_s1 + $0x180] sm:$0xff]  ;;  %v697_v63 = vsel %vm5925_vm0, %v590_v60, 0.0  ;;  %v721_v8 = vsel %vm5925_vm0, %v598_v5, 0.0  ;;  %v550_v38 = vld [vmem:[%s5909_s1 + $0x170] sm:$0xff]  ;;  %v549_v39 = vld [vmem:[%s5909_s1 + $0x168] sm:$0xff] }
  0x19   : > { %v742_v34 = vsel %vm5925_vm0, %v605_v31, 0.0  ;;  %v548_v48 = vld [vmem:[%s5909_s1 + $0x160] sm:$0xff]  ;;  %v617_v49 = vmul.f32 %v4122_v3, %v552_v46  ;;  %v575_v13 = vmul.f32 %v4122_v3, %v510_v10  ;;  %v571_v14 = vmul.f32 %v4122_v3, %v506_v11  ;;  %v526_v46 = vld [vmem:[%s5909_s1 + $0xb0] sm:$0xff]  ;;  %v561_v55 = vld [vmem:[%s5909_s1 + $0x1c8] sm:$0xff] }
  0x1a   : > { %v754_v44 = vsel %vm5925_vm0, %v609_v41, 0.0  ;;  %v613_v51 = vmul.f32 %v4122_v3, %v548_v48  ;;  %v556_v56 = vld [vmem:[%s5909_s1 + $0x1a0] sm:$0xff]  ;;  %v602_v15 = vmul.f32 %v4122_v3, %v537_v12  ;;  %v579_v22 = vmul.f32 %v4122_v3, %v514_v19  ;;  %v553_v48 = vld [vmem:[%s5909_s1 + $0x188] sm:$0xff]  ;;  %v530_v57 = vld [vmem:[%s5909_s1 + $0xd0] sm:$0xff] }
  0x1b   : > { %695 = vadd.xlane.f32.xlu2 %v694_v16  ;;  %671 = vadd.xlane.f32.xlu1 %v670_v17  ;;  %v778_v52 = vsel %vm5925_vm0, %v617_v49, 0.0  ;;  %v621_v59 = vmul.f32 %v4122_v3, %v556_v56  ;;  %v564_v0 = vld [vmem:[%s5909_s1 + $0x1e0] sm:$0xff]  ;;  %v652_v16 = vsel %vm5925_vm0, %v575_v13, 0.0  ;;  %v640_v17 = vsel %vm5925_vm0, %v571_v14, 0.0  ;;  %v558_v56 = vld [vmem:[%s5909_s1 + $0x1b0] sm:$0xff]  ;;  %v507_v12 = vld [vmem:[%s5909_s1 + $0x18] sm:$0xff] }
  0x1c   : > { %647 = vadd.xlane.f32.xlu0 %v646_v18  ;;  %v766_v54 = vsel %vm5925_vm0, %v613_v51, 0.0  ;;  %v560_v2 = vld [vmem:[%s5909_s1 + $0x1c0] sm:$0xff]  ;;  %v629_v4 = vmul.f32 %v4122_v3, %v564_v0  ;;  %v733_v18 = vsel %vm5925_vm0, %v602_v15, 0.0  ;;  %v622_v23 = vmul.f32 %v4122_v3, %v557_v20  ;;  %v562_v1 = vld [vmem:[%s5909_s1 + $0x1d0] sm:$0xff]  ;;  %v539_v13 = vld [vmem:[%s5909_s1 + $0x118] sm:$0xff] }
  0x1d   : > { %v790_v62 = vsel %vm5925_vm0, %v621_v59, 0.0  ;;  %v625_v6 = vmul.f32 %v4122_v3, %v560_v2  ;;  %v606_v24 = vmul.f32 %v4122_v3, %v541_v21  ;;  %v583_v31 = vmul.f32 %v4122_v3, %v518_v28  ;;  %v534_v2 = vld [vmem:[%s5909_s1 + $0xf0] sm:$0xff]  ;;  %v1767_v10 = vld [vmem:[%s5918_s10] sm:$0x3]  ;;  %v511_v28 = vld [vmem:[%s5909_s1 + $0x38] sm:$0xff] }
  0x1e   : > { %v814_v7 = vsel %vm5925_vm0, %v629_v4, 0.0  ;;  %v611_v32 = vmul.f32 %v4122_v3, %v546_v29  ;;  %v610_v33 = vmul.f32 %v4122_v3, %v545_v30  ;;  %v587_v40 = vmul.f32 %v4122_v3, %v522_v37  ;;  %v538_v15 = vld [vmem:[%s5909_s1 + $0x110] sm:$0xff] }
  0x1f   : > { %v802_v9 = vsel %vm5925_vm0, %v625_v6, 0.0  ;;  %v615_v41 = vmul.f32 %v4122_v3, %v550_v38  ;;  %v614_v42 = vmul.f32 %v4122_v3, %v549_v39  ;;  %v591_v49 = vmul.f32 %v4122_v3, %v526_v46 }
  0x20   : > { %v619_v50 = vmul.f32 %v4122_v3, %v554_v47  ;;  %v618_v51 = vmul.f32 %v4122_v3, %v553_v48  ;;  %v626_v58 = vmul.f32 %v4122_v3, %v561_v55  ;;  %v623_v59 = vmul.f32 %v4122_v3, %v558_v56  ;;  %v901_v48 = vld [vmem:[%s5910_s2] sm:$0xff]  ;;  %v527_v56 = vld [vmem:[%s5909_s1 + $0xb8] sm:$0xff] }
  0x21   : > { %v595_v60 = vmul.f32 %v4122_v3, %v530_v57  ;;  %v627_v5 = vmul.f32 %v4122_v3, %v562_v1  ;;  %v599_v6 = vmul.f32 %v4122_v3, %v534_v2  ;;  %vm1822_vm2 = vcmp.le.s32.totalorder %v1767_v10, 14  ;;  %v903_v57 = vld [vmem:[%s5910_s2 + $0x10] sm:$0xff] }
  0x22   : > { %v3999_v14 = vmov 0   ;;  %v604_v19 = vmul.f32 %v4122_v3, %v539_v13  ;;  %v603_v20 = vmul.f32 %v4122_v3, %v538_v15  ;;  %v576_v30 = vmul.f32 %v4122_v3, %v511_v28  ;;  %v543_v13 = vld [vmem:[%s5909_s1 + $0x138] sm:$0xff] }
  0x23   : > { %731 = vadd.xlane.f32.xlu2 %v730_v25  ;;  %719 = vadd.xlane.f32.xlu1 %v718_v26  ;;  %v664_v25 = vsel %vm5925_vm0, %v579_v22, 0.0  ;;  %v793_v26 = vsel %vm5925_vm0, %v622_v23, 0.0  ;;  %v712_v0 = vsel %vm5925_vm0, %v595_v60, 0.0  ;;  %v724_v11 = vsel %vm5925_vm0, %v599_v6, 0.0  ;;  %v566_v6 = vld [vmem:[%s5909_s1 + $0x1f0] sm:$0xff] }
  0x24   : > { %707 = vadd.xlane.f32.xlu0 %v706_v27  ;;  %v745_v27 = vsel %vm5925_vm0, %v606_v24, 0.0  ;;  %3813 = vset.pattern.permute.xlu1 %v3999_v14  ;;  %v608_v15 = vmul.f32 %v4122_v3, %v543_v13 }
  0x25   : > { %3812 = vset.pattern.permute.xlu0 %v3999_v14  ;;  %3814 = vset.pattern.permute.xlu2 %v3999_v14 }
  0x2b   : > { %743 = vadd.xlane.f32.xlu2 %v742_v34  ;;  %650 = vadd.xlane.f32.xlu1 %v649_v35  ;;  %v676_v34 = vsel %vm5925_vm0, %v583_v31, 0.0  ;;  %v760_v35 = vsel %vm5925_vm0, %v611_v32, 0.0 }
  0x2c   : > { %638 = vadd.xlane.f32.xlu0 %v637_v36  ;;  %v757_v36 = vsel %vm5925_vm0, %v610_v33, 0.0 }
  0x33   : > { %674 = vadd.xlane.f32.xlu2 %v673_v43  ;;  %755 = vadd.xlane.f32.xlu1 %v754_v44  ;;  %v688_v43 = vsel %vm5925_vm0, %v587_v40, 0.0  ;;  %v772_v44 = vsel %vm5925_vm0, %v615_v41, 0.0 }
  0x34   : > { %662 = vadd.xlane.f32.xlu0 %v661_v45  ;;  %v769_v45 = vsel %vm5925_vm0, %v614_v42, 0.0  ;;  %v519_v42 = vld [vmem:[%s5909_s1 + $0x78] sm:$0xff] }
  0x3b   : > { %779 = vadd.xlane.f32.xlu2 %v778_v52  ;;  %686 = vadd.xlane.f32.xlu1 %v685_v53  ;;  %v700_v52 = vsel %vm5925_vm0, %v591_v49, 0.0  ;;  %v784_v53 = vsel %vm5925_vm0, %v619_v50, 0.0  ;;  %v523_v49 = vld [vmem:[%s5909_s1 + $0x98] sm:$0xff] }
  0x3c   : > { %767 = vadd.xlane.f32.xlu0 %v766_v54  ;;  %v781_v54 = vsel %vm5925_vm0, %v618_v51, 0.0  ;;  %v588_v50 = vmul.f32 %v4122_v3, %v523_v49  ;;  %v902_v51 = vld [vmem:[%s5910_s2 + $0x8] sm:$0xff] }
  0x3e   : > { %v691_v55 = vsel %vm5925_vm0, %v588_v50, 0.0 }
  0x43   : > { %710 = vadd.xlane.f32.xlu2 %v709_v61  ;;  %791 = vadd.xlane.f32.xlu1 %v790_v62  ;;  %v805_v61 = vsel %vm5925_vm0, %v626_v58, 0.0  ;;  %v796_v62 = vsel %vm5925_vm0, %v623_v59, 0.0  ;;  %v592_v58 = vmul.f32 %v4122_v3, %v527_v56 }
  0x44   : > { %698 = vadd.xlane.f32.xlu0 %v697_v63  ;;  %v565_v63 = vld [vmem:[%s5909_s1 + $0x1e8] sm:$0xff] }
  0x45   : > { %v630_v4 = vmul.f32 %v4122_v3, %v565_v63  ;;  %v531_v63 = vld [vmem:[%s5909_s1 + $0xd8] sm:$0xff] }
  0x4b   : > { %815 = vadd.xlane.f32.xlu2 %v814_v7  ;;  %722 = vadd.xlane.f32.xlu1 %v721_v8  ;;  %v817_v7 = vsel %vm5925_vm0, %v630_v4, 0.0  ;;  %v808_v8 = vsel %vm5925_vm0, %v627_v5, 0.0 }
  0x4c   : > { %803 = vadd.xlane.f32.xlu0 %v802_v9  ;;  %v4342_v9 = vld [vmem:[%s5913_s5] sm:$0x1] }
  0x4d   : > { %vm1023_vm1 = vcmp.le.s32.totalorder %v4342_v9, 6 }
  0x53   : > { %653 = vadd.xlane.f32.xlu2 %v652_v16  ;;  %641 = vadd.xlane.f32.xlu1 %v640_v17  ;;  %v4361_v16 = vsel %vm1023_vm1, 1, %v3999_v14  ;;  %v4364_v17 = vsel %vm1822_vm2, 1, %v3999_v14  ;;  %vm881_vm1 = vcmask 97280   ;;  %vm886_vm2 = vcmask 105472  }
  0x54   : > { %734 = vadd.xlane.f32.xlu0 %v733_v18  ;;  %v572_v18 = vmul.f32 %v4122_v3, %v507_v12 }
  0x56   : > { %v643_v24 = vsel %vm5925_vm0, %v572_v18, 0.0 }
  0x5b   : > { %665 = vadd.xlane.f32.xlu2 %v664_v25  ;;  %794 = vadd.xlane.f32.xlu1 %v793_v26  ;;  %v739_v25 = vsel %vm5925_vm0, %v604_v19, 0.0  ;;  %v736_v26 = vsel %vm5925_vm0, %v603_v20, 0.0 }
  0x5c   : > { %746 = vadd.xlane.f32.xlu0 %v745_v27  ;;  %v542_v27 = vld [vmem:[%s5909_s1 + $0x130] sm:$0xff] }
  0x5d   : > { %v607_v29 = vmul.f32 %v4122_v3, %v542_v27 }
  0x63   : > { %677 = vadd.xlane.f32.xlu2 %v676_v34  ;;  %761 = vadd.xlane.f32.xlu1 %v760_v35  ;;  %v748_v34 = vsel %vm5925_vm0, %v607_v29, 0.0  ;;  %v655_v35 = vsel %vm5925_vm0, %v576_v30, 0.0  ;;  %v559_v29 = vld [vmem:[%s5909_s1 + $0x1b8] sm:$0xff] }
  0x64   : > { %758 = vadd.xlane.f32.xlu0 %v757_v36  ;;  %v515_v36 = vld [vmem:[%s5909_s1 + $0x58] sm:$0xff] }
  0x65   : > { %v580_v37 = vmul.f32 %v4122_v3, %v515_v36  ;;  %v624_v36 = vmul.f32 %v4122_v3, %v559_v29 }
  0x67   : > { %v667_v41 = vsel %vm5925_vm0, %v580_v37, 0.0 }
  0x6b   : > { %689 = vadd.xlane.f32.xlu2 %v688_v43  ;;  %773 = vadd.xlane.f32.xlu1 %v772_v44  ;;  %v584_v43 = vmul.f32 %v4122_v3, %v519_v42  ;;  %v567_v42 = vld [vmem:[%s5909_s1 + $0x1f8] sm:$0xff] }
  0x6c   : > { %770 = vadd.xlane.f32.xlu0 %v769_v45 }
  0x6d   : > { %v679_v47 = vsel %vm5925_vm0, %v584_v43, 0.0  ;;  %v551_v43 = vld [vmem:[%s5909_s1 + $0x178] sm:$0xff] }
  0x6e   : > { %v616_v49 = vmul.f32 %v4122_v3, %v551_v43  ;;  %v4000_v43 = vmov 1.0  }
  0x70   : > { %v775_v56 = vsel %vm5925_vm0, %v616_v49, 0.0  ;;  %v904_v49 = vld [vmem:[%s5910_s2 + $0x18] sm:$0xff] }
  0x73   : > { %701 = vadd.xlane.f32.xlu2 %v700_v52  ;;  %785 = vadd.xlane.f32.xlu1 %v784_v53 }
  0x74   : > { %782 = vadd.xlane.f32.xlu0 %v781_v54 }
  0x7b   : > { %806 = vadd.xlane.f32.xlu2 %v805_v61  ;;  %797 = vadd.xlane.f32.xlu1 %v796_v62  ;;  %v703_v62 = vsel %vm5925_vm0, %v592_v58, 0.0 }
  0x7c   : > { %713 = vadd.xlane.f32.xlu0 %v712_v0  ;;  %v596_v0 = vmul.f32 %v4122_v3, %v531_v63 }
  0x7e   : > { %v715_v5 = vsel %vm5925_vm0, %v596_v0, 0.0 }
  0x83   : > { %818 = vadd.xlane.f32.xlu2 %v817_v7  ;;  %809 = vadd.xlane.f32.xlu1 %v808_v8  ;;  %v631_v7 = vmul.f32 %v4122_v3, %v566_v6  ;;  %v563_v6 = vld [vmem:[%s5909_s1 + $0x1d8] sm:$0xff] }
  0x84   : > { %725 = vadd.xlane.f32.xlu0 %v724_v11 }
  0x85   : > { %v820_v12 = vsel %vm5925_vm0, %v631_v7, 0.0  ;;  %v628_v7 = vmul.f32 %v4122_v3, %v563_v6 }
  0x86   : > { %v4370_v21 = vpop.xlane.xlu2 %683  ;;  %v4372_v22 = vpop.xlane.xlu1 %659 }
  0x87   : > { %v4374_v23 = vpop.xlane.xlu0 %635 }
  0x8b   : > { %644 = vadd.xlane.f32.xlu2 %v643_v24  ;;  %740 = vadd.xlane.f32.xlu1 %v739_v25  ;;  %v751_v24 = vsel %vm5925_vm0, %v608_v15, 0.0  ;;  %v535_v25 = vld [vmem:[%s5909_s1 + $0xf8] sm:$0xff]  ;;  %v811_v15 = vsel %vm5925_vm0, %v628_v7, 0.0 }
  0x8c   : > { %737 = vadd.xlane.f32.xlu0 %v736_v26  ;;  %v547_v26 = vld [vmem:[%s5909_s1 + $0x158] sm:$0xff]  ;;  %v600_v27 = vmul.f32 %v4122_v3, %v535_v25 }
  0x8d   : > { %v612_v28 = vmul.f32 %v4122_v3, %v547_v26 }
  0x8e   : > { %v4387_v31 = vpop.xlane.xlu2 %695  ;;  %v4389_v32 = vpop.xlane.xlu1 %671 }
  0x8f   : > { %v4391_v33 = vpop.xlane.xlu0 %647  ;;  %v763_v37 = vsel %vm5925_vm0, %v612_v28, 0.0 }
  0x93   : > { %749 = vadd.xlane.f32.xlu2 %v748_v34 }
  0x94   : > { %656 = vadd.xlane.f32.xlu0 %v655_v35  ;;  %v727_v35 = vsel %vm5925_vm0, %v600_v27, 0.0  ;;  %v938_v27 = vlaneseq }
  0x96   : > { %v4399_v38 = vpop.xlane.xlu2 %731  ;;  %v4401_v39 = vpop.xlane.xlu1 %719  ;;  %v4544_v29 = vshrl.u32 %v938_v27, 7 }
  0x97   : > { %v4403_v40 = vpop.xlane.xlu0 %707 }
  0x9b   : > { %668 = vadd.xlane.f32.xlu2 %v667_v41 }
  0x9e   : > { %v4410_v44 = vpop.xlane.xlu2 %743  ;;  %v4412_v45 = vpop.xlane.xlu1 %650 }
  0x9f   : > { %v4414_v46 = vpop.xlane.xlu0 %638 }
  0xa3   : > { %680 = vadd.xlane.f32.xlu2 %v679_v47  ;;  %v799_v47 = vsel %vm5925_vm0, %v624_v36, 0.0  ;;  %v3981_v36 = vld [vmem:[%s5912_s4] ss:$0 sm:$0xff] }
  0xa4   : > { %907 = vperm.xlu1 %3813, %v901_v48   ;;  %v632_v48 = vmul.f32 %v4122_v3, %v567_v42  ;;  %vm942_vm6 = vcmp.eq.s32.totalorder %v4544_v29, %v3981_v36 }
  0xa6   : > { %v4427_v52 = vpop.xlane.xlu2 %674  ;;  %v4429_v53 = vpop.xlane.xlu1 %755 }
  0xa7   : > { %v4431_v54 = vpop.xlane.xlu0 %662 }
  0xa8   : > { %912 = vperm.xlu0 %3812, %v902_v51  }
  0xab   : > { %692 = vadd.xlane.f32.xlu2 %v691_v55  ;;  %v823_v55 = vsel %vm5925_vm0, %v632_v48, 0.0 }
  0xac   : > { %917 = vperm.xlu1 %3813, %v903_v57   ;;  %v555_v57 = vld [vmem:[%s5909_s1 + $0x198] sm:$0xff] }
  0xae   : > { %v4441_v59 = vpop.xlane.xlu2 %779  ;;  %v4443_v60 = vpop.xlane.xlu1 %686 }
  0xaf   : > { %v4445_v61 = vpop.xlane.xlu0 %767 }
  0xb3   : > { %704 = vadd.xlane.f32.xlu2 %v703_v62  ;;  %v620_v62 = vmul.f32 %v4122_v3, %v555_v57  ;;  %v828_v57 = vsel %vm826_vm3, %v4414_v46, %v4412_v45 }
  0xb4   : > { %v833_v6 = vsel %vm831_vm4, %v828_v57, %v4431_v54 }
  0xb5   : > { %v838_v45 = vsel %vm836_vm7, %v833_v6, %v4427_v52 }
  0xb6   : > { %v4452_v1 = vpop.xlane.xlu2 %710  ;;  %v4454_v2 = vpop.xlane.xlu1 %791  ;;  %v843_v7 = vsel %vm841_vm8, %v838_v45, %v4443_v60 }
  0xb7   : > { %v4456_v4 = vpop.xlane.xlu0 %698 }
  0xbb   : > { %716 = vadd.xlane.f32.xlu2 %v715_v5  ;;  %v787_v5 = vsel %vm5925_vm0, %v620_v62, 0.0  ;;  %vm946_vm0 = vcmask 130048  }
  0xbe   : > { %v4463_v8 = vpop.xlane.xlu2 %815  ;;  %v4465_v10 = vpop.xlane.xlu1 %722 }
  0xbf   : > { %v4467_v11 = vpop.xlane.xlu0 %803 }
  0xc3   : > { %821 = vadd.xlane.f32.xlu2 %v820_v12 }
  0xc6   : > { %v4474_v18 = vpop.xlane.xlu2 %653  ;;  %v4478_v20 = vpop.xlane.xlu1 %641 }
  0xc7   : > { %v4476_v19 = vpop.xlane.xlu0 %734 }
  0xcb   : > { %752 = vadd.xlane.f32.xlu2 %v751_v24 }
  0xce   : > { %v4492_v30 = vpop.xlane.xlu2 %665  ;;  %v4499_v41 = vpop.xlane.xlu1 %794 }
  0xcf   : > { %v4494_v34 = vpop.xlane.xlu0 %746 }
  0xd2   : > { %728 = vadd.xlane.f32.xlu0 %v727_v35  ;;  %v4549_v35 = vadd.s32 8, %v4544_v29 }
  0xd3   : > { %764 = vadd.xlane.f32.xlu2 %v763_v37  ;;  %v827_v37 = vsel %vm826_vm3, %v4374_v23, %v4391_v33 }
  0xd4   : > { %vm943_vm5 = vcmp.eq.s32.totalorder %v4549_v35, %v3981_v36 }
  0xd5   : > { %3512 = vmatpush.msk.msra.mxu0 %vm943_vm5, %v4000_v43  ;;  %vm891_vm5 = vcmask 113664  }
  0xd6   : > { %v4510_v50 = vpop.xlane.xlu2 %677  ;;  %800 = vadd.xlane.f32.xlu1 %v799_v47  ;;  %v4519_v58 = vpop.xlane.xlu1 %761  ;;  %v832_v47 = vsel %vm831_vm4, %v827_v37, %v4372_v22 }
  0xd7   : > { %v4512_v51 = vpop.xlane.xlu0 %758  ;;  %3513 = vmatpush.msk.msra.mxu0 %vm942_vm6, %v4000_v43  ;;  %v837_v48 = vsel %vm836_vm7, %v832_v47, %v4389_v32  ;;  %vm896_vm6 = vcmask 121856  }
  0xda   : > { %824 = vadd.xlane.f32.xlu0 %v823_v55  ;;  %v842_v55 = vsel %vm841_vm8, %v837_v48, %v4370_v21 }
  0xdb   : > { %776 = vadd.xlane.f32.xlu2 %v775_v56  ;;  %v847_v32 = vsel %vm846_vm9, %v842_v55, %v4387_v31 }
  0xdc   : > { %v852_v56 = vsel %vm851_vm10, %v847_v32, %v4403_v40  ;;  %v829_v32 = vsel %vm826_vm3, %v4478_v20, %v4474_v18 }
  0xdd   : > { %v857_v21 = vsel %vm856_vm11, %v852_v56, %v4401_v39 }
  0xde   : > { %v4522_v63 = vpop.xlane.xlu2 %689  ;;  %v4531_v12 = vpop.xlane.xlu1 %773  ;;  %v862_v31 = vsel %vm861_vm12, %v857_v21, %v4399_v38  ;;  %v848_v38 = vsel %vm846_vm9, %v843_v7, %v4456_v4 }
  0xdf   : > { %v4524_v0 = vpop.xlane.xlu0 %770  ;;  %v867_v40 = vsel %vm866_vm13, %v862_v31, %v4410_v44  ;;  %v853_v52 = vsel %vm851_vm10, %v848_v38, %v4452_v1 }
  0xe0   : > { %v872_v39 = vsel %vm871_vm14, %v867_v40, %v4429_v53  ;;  %v858_v60 = vsel %vm856_vm11, %v853_v52, %v4465_v10  ;;  %v929_v10 = vld [vmem:[%s5911_s3] sm:$0xff] }
  0xe1   : > { %v877_v54 = vsel %vm876_vm15, %v872_v39, %v4445_v61  ;;  %v863_v4 = vsel %vm861_vm12, %v858_v60, %v4476_v19 }
  0xe2   : > { %v882_v44 = vsel %vm881_vm1, %v877_v54, %v4441_v59  ;;  %v868_v59 = vsel %vm866_vm13, %v863_v4, %v4494_v34 }
  0xe3   : > { %788 = vadd.xlane.f32.xlu2 %v787_v5  ;;  %v887_v53 = vsel %vm886_vm2, %v882_v44, %v4454_v2  ;;  %v873_v1 = vsel %vm871_vm14, %v868_v59, %v4512_v51 }
  0xe4   : > { %v892_v27 = vsel %vm891_vm5, %v887_v53, %v4467_v11  ;;  %v878_v2 = vsel %vm876_vm15, %v873_v1, %v4524_v0 }
  0xe5   : > { %v897_v11 = vsel %vm896_vm6, %v892_v27, %v4463_v8  ;;  %v930_v8 = vld [vmem:[%s5911_s3 + $0x8] sm:$0xff] }
  0xe6   : > { %v4533_v13 = vpop.xlane.xlu2 %701  ;;  %v4540_v26 = vpop.xlane.xlu1 %785 }
  0xe7   : > { %v4536_v24 = vpop.xlane.xlu0 %782 }
  0xe8   : > { %v883_v19 = vsel %vm881_vm1, %v878_v2, %v4536_v24 }
  0xe9   : > { %v888_v51 = vsel %vm886_vm2, %v883_v19, %v4499_v41  ;;  %v834_v41 = vsel %vm831_vm4, %v829_v32, %v4492_v30 }
  0xeb   : > { %812 = vadd.xlane.f32.xlu2 %v811_v15 }
  0xee   : > { %v4538_v25 = vpop.xlane.xlu2 %806  ;;  %v4557_v42 = vpop.xlane.xlu1 %797 }
  0xef   : > { %v4542_v28 = vpop.xlane.xlu0 %713  ;;  %v893_v0 = vsel %vm891_vm5, %v888_v51, %v4538_v25  ;;  %v839_v25 = vsel %vm836_vm7, %v834_v41, %v4510_v50 }
  0xf6   : > { %v4546_v3 = vpop.xlane.xlu2 %818  ;;  %v4576_v22 = vpop.xlane.xlu1 %809 }
  0xf7   : > { %v4567_v23 = vpop.xlane.xlu0 %725 }
  0xfe   : > { %v4569_v33 = vpop.xlane.xlu2 %644  ;;  %v4595_v46 = vpop.xlane.xlu1 %740 }
  0xff   : > { %v738_v5 = vpop.xlane.xlu0 %737 }
 0x103   : > { %922 = vperm.xlu2 %3814, %v904_v49   ;;  %v898_v49 = vsel %vm896_vm6, %v893_v0, %v4546_v3  ;;  %v844_v3 = vsel %vm841_vm8, %v839_v25, %v4522_v63 }
 0x104   : > { %v849_v57 = vsel %vm846_vm9, %v844_v3, %v4533_v13  ;;  %v3559_v3 = vld [vmem:[%s5914_s6 + $0x88] sm:$0xff] }
 0x105   : > { %v854_v21 = vsel %vm851_vm10, %v849_v57, %v4542_v28 }
 0x106   : > { %v750_v62 = vpop.xlane.xlu2 %749  ;;  %v859_v18 = vsel %vm856_vm11, %v854_v21, %v4567_v23 }
 0x107   : > { %v657_v61 = vpop.xlane.xlu0 %656  ;;  %v864_v20 = vsel %vm861_vm12, %v859_v18, %v738_v5 }
 0x108   : > { %v869_v50 = vsel %vm866_vm13, %v864_v20, %v750_v62 }
 0x109   : > { %v874_v6 = vsel %vm871_vm14, %v869_v50, %v4519_v58  ;;  %v931_v58 = vld [vmem:[%s5911_s3 + $0x10] sm:$0xff] }
 0x10a   : > { %v879_v63 = vsel %vm876_vm15, %v874_v6, %v4531_v12 }
 0x10b   : > { %v884_v31 = vsel %vm881_vm1, %v879_v63, %v4540_v26 }
 0x10c   : > { %v889_v28 = vsel %vm886_vm2, %v884_v31, %v4557_v42  ;;  %v830_v42 = vsel %vm826_vm3, %v4569_v33, %v657_v61  ;;  %vm1017_vm3 = vcmask 596992   ;;  %v991_v31 = vld [vmem:[%s5915_s7 + $0x10] sm:$0xff] }
 0x10d   : > { %v894_v23 = vsel %vm891_vm5, %v889_v28, %v4576_v22  ;;  %v990_v28 = vld [vmem:[%s5915_s7 + $0x8] sm:$0xff] }
 0x10e   : > { %v669_v15 = vpop.xlane.xlu2 %668 }
 0x10f   : > { %v835_v22 = vsel %vm831_vm4, %v830_v42, %v669_v15  ;;  %vm1022_vm4 = vcmp.ge.s32.totalorder %v4342_v9, 1  ;;  %v1033_v42 = vld [vmem:[%s5914_s6 + $0x10] sm:$0xff] }
 0x110   : > { %v1024_v41 = vsel %vm1022_vm4, 1, %v3999_v14 }
 0x111   : > { %v1025_v25 = vperm.slane %v1024_v41, 0  ;;  %v3537_v41 = vld [vmem:[%s5914_s6 + $0x58] sm:$0xff] }
 0x116   : > { %v681_v36 = vpop.xlane.xlu2 %680  ;;  %v908_v37 = vpop.permute.xlu1 %907 }
 0x117   : > { %v925_v47 = vmul.f32 %v908_v37, %v897_v11  ;;  %v840_v54 = vsel %vm836_vm7, %v835_v22, %v681_v36  ;;  %vm4700_vm7 = vcmp.eq.s32.totalorder %v1025_v25, 1  ;;  %v1139_v22 = vperm.slane %v4361_v16, 0 }
 0x119   : > { %v933_v34 = vadd.f32 %v929_v10, %v925_v47 }
 0x11a   : > { %v913_v48 = vpop.permute.xlu0 %912 }
 0x11b   : > { %3514 = vmatmul.msk.f32.vlgmr.msra.gmra.mxu0 %vm946_vm0, %v933_v34  ;;  %v926_v55 = vmul.f32 %v913_v48, %v898_v49 }
 0x11d   : > { %v934_v56 = vadd.f32 %v930_v8, %v926_v55 }
 0x11e   : > { %v693_v24 = vpop.xlane.xlu2 %692  ;;  %v918_v40 = vpop.permute.xlu1 %917 }
 0x11f   : > { %v845_v38 = vsel %vm841_vm8, %v840_v54, %v693_v24  ;;  %vm5949_vm8 = vcmask 261120  }
 0x123   : > { %3515 = vmatmul.msk.f32.gmra.mxu0 %vm946_vm0, %v934_v56 }
 0x126   : > { %v705_v30 = vpop.xlane.xlu2 %704 }
 0x127   : > { %v850_v52 = vsel %vm846_vm9, %v845_v38, %v705_v30  ;;  %vm5950_vm9 = vmmov %vm5949_vm8  ;;  %v1034_v38 = vld [vmem:[%s5914_s6 + $0x18] sm:$0xff] }
 0x12e   : > { %v717_v13 = vpop.xlane.xlu2 %716 }
 0x12f   : > { %v855_v53 = vsel %vm851_vm10, %v850_v52, %v717_v13  ;;  %v993_v13 = vld [vmem:[%s5916_s8] sm:$0xff]  ;;  %vm5951_vm10 = vmmov %vm5949_vm8 }
 0x136   : > { %v822_v5 = vpop.xlane.xlu2 %821 }
 0x137   : > { %v899_v62 = vsel %vm896_vm6, %v894_v23, %v822_v5  ;;  %v996_v23 = vld [vmem:[%s5916_s8 + $0x18] sm:$0xff]  ;;  %v995_v5 = vld [vmem:[%s5916_s8 + $0x10] sm:$0xff] }
 0x138   : > { %v927_v45 = vmul.f32 %v918_v40, %v899_v62  ;;  %v989_v40 = vld [vmem:[%s5915_s7] sm:$0xff]  ;;  %v994_v62 = vld [vmem:[%s5916_s8 + $0x8] sm:$0xff] }
 0x13a   : > { %v935_v12 = vadd.f32 %v931_v58, %v927_v45  ;;  %v1031_v58 = vld [vmem:[%s5914_s6] sm:$0xff]  ;;  %v992_v45 = vld [vmem:[%s5915_s7 + $0x18] sm:$0xff] }
 0x13c   : > { %3516 = vmatmul.msk.f32.gmra.mxu0 %vm946_vm0, %v935_v12  ;;  %v1032_v12 = vld [vmem:[%s5914_s6 + $0x8] sm:$0xff] }
 0x13e   : > { %v753_v39 = vpop.xlane.xlu2 %752 }
 0x145   : > { %v729_v44 = vpop.xlane.xlu0 %728 }
 0x146   : > { %v765_v26 = vpop.xlane.xlu2 %764  ;;  %v860_v60 = vsel %vm856_vm11, %v855_v53, %v729_v44  ;;  %vm4772_vm11 = vcmp.eq.s32.totalorder %v1139_v22, 1  ;;  %v3580_v22 = vld [vmem:[%s5914_s6 + $0xd0] sm:$0xff]  ;;  %v3561_v44 = vld [vmem:[%s5914_s6 + $0x98] sm:$0xff] }
 0x147   : > { %v865_v4 = vsel %vm861_vm12, %v860_v60, %v4595_v46  ;;  %v932_v46 = vld [vmem:[%s5911_s3 + $0x18] sm:$0xff]  ;;  %vm5954_vm12 = vmmov %vm5949_vm8 }
 0x148   : > { %v870_v33 = vsel %vm866_vm13, %v865_v4, %v753_v39  ;;  %v3534_v4 = vld [vmem:[%s5914_s6 + $0x40] sm:$0xff] }
 0x149   : > { %v875_v61 = vsel %vm871_vm14, %v870_v33, %v765_v26  ;;  %v801_v2 = vpop.xlane.xlu1 %800  ;;  %vm5956_vm14 = vmmov %vm5949_vm8 }
 0x14d   : > { %v825_v37 = vpop.xlane.xlu0 %824 }
 0x14e   : > { %v777_v7 = vpop.xlane.xlu2 %776 }
 0x14f   : > { %v880_v15 = vsel %vm876_vm15, %v875_v61, %v777_v7  ;;  %vm5957_vm15 = vmmov %vm5949_vm8 }
 0x156   : > { %v789_v27 = vpop.xlane.xlu2 %788 }
 0x157   : > { %v885_v1 = vsel %vm881_vm1, %v880_v15, %v789_v27  ;;  %vm5958_vm1 = vmmov %vm5949_vm8 }
 0x158   : > { %v890_v36 = vsel %vm886_vm2, %v885_v1, %v801_v2  ;;  %vm5959_vm2 = vmmov %vm5958_vm1 }
 0x159   : > { %vm5963_vm4 = vmmov %vm5958_vm1 }
 0x15e   : > { %v813_v59 = vpop.xlane.xlu2 %812 }
 0x15f   : > { %v895_v10 = vsel %vm891_vm5, %v890_v36, %v813_v59  ;;  %v3518_v59 = vld [vmem:[%s5914_s6 + $0x20] sm:$0xff]  ;;  %vm5960_vm5 = vmmov %vm5958_vm1 }
 0x160   : > { %v900_v11 = vsel %vm896_vm6, %v895_v10, %v825_v37  ;;  %v3535_v37 = vld [vmem:[%s5914_s6 + $0x48] sm:$0xff]  ;;  %vm5961_vm6 = vmmov %vm5958_vm1 }
 0x166   : > { %v923_v19 = vpop.permute.xlu2 %922 }
 0x167   : > { %v928_v47 = vmul.f32 %v923_v19, %v900_v11  ;;  %v3546_v19 = vld [vmem:[%s5914_s6 + $0x60] sm:$0xff] }
 0x169   : > { %v936_v34 = vadd.f32 %v932_v46, %v928_v47  ;;  %v3519_v46 = vld [vmem:[%s5914_s6 + $0x28] sm:$0xff] }
 0x16b   : > { %3517 = vmatmul.msk.f32.gmra.mxu0 %vm946_vm0, %v936_v34 }
 0x198   : > { %v976_v51 = vpop.f32.mrf.mxu0 }
 0x1a0   : > { %v979_v48 = vpop.f32.mrf.mxu0 }
 0x1a1   : > { %1003 = vrot.lane.b32.xlu2 %v979_v48, %s4001_s19 }
 0x1b9   : > { %v982_v0 = vpop.f32.mrf.mxu0 }
 0x1ba   : > { %1005 = vrot.lane.b32.xlu0 %v982_v0, %s4001_s19  ;;  %v3536_v0 = vld [vmem:[%s5914_s6 + $0x50] sm:$0xff] }
 0x1e8   : > { %v985_v49 = vpop.f32.mrf.mxu0 }
 0x1e9   : > { %1007 = vrot.lane.b32.xlu0 %v985_v49, %s4001_s19 }
 0x1f1   : > { %1001 = vrot.lane.b32.xlu0 %v976_v51, %s4001_s19  ;;  %s5986_s19 = smov 110  }
 0x1fb   : > { %v1004_v55 = vpop.permute.xlu2 %1003 }
 0x1fc   : > { %v1014_v8 = vsel %vm866_vm13, 0.0, %v1004_v55  ;;  %v3520_v55 = vld [vmem:[%s5914_s6 + $0x30] sm:$0xff] }
 0x1fd   : > { %v1019_v24 = vsel %vm1017_vm3, %v1014_v8, 0.0  ;;  %v3547_v8 = vld [vmem:[%s5914_s6 + $0x68] sm:$0xff] }
 0x1fe   : > { %1143 = vrot.lane.b32.xlu0 %v1019_v24, %s4002_s20 }
 0x206   : > { %1209 = vrot.lane.b32.xlu0 %v1019_v24, %s4003_s23 }
 0x22c   : > { %v1006_v32 = vpop.permute.xlu0 %1005 }
 0x22d   : > { %v1015_v56 = vsel %vm866_vm13, 0.0, %v1006_v32 }
 0x22e   : > { %v1020_v18 = vsel %vm1017_vm3, %v1015_v56, 0.0  ;;  %v3521_v56 = vld [vmem:[%s5914_s6 + $0x38] sm:$0xff] }
 0x25b   : > { %v1008_v57 = vpop.permute.xlu0 %1007 }
 0x25c   : > { %v1016_v21 = vsel %vm866_vm13, 0.0, %v1008_v57  ;;  %v3548_v57 = vld [vmem:[%s5914_s6 + $0x70] sm:$0xff] }
 0x25d   : > { %v1021_v20 = vsel %vm1017_vm3, %v1016_v21, 0.0 }
 0x25e   : > { %1147 = vrot.lane.b32.xlu0 %v1021_v20, %s4002_s20  ;;  %3526 = vmatpush.msk.msra.mxu2 %vm4700_vm7, %v1021_v20  ;;  %v3815_v9 = vpack.i.bf16 %v1020_v18, %v1021_v20 }
 0x260   : > { %3816 = vrot.lane.b32.xlu1 %v3815_v9, %s4004_s24  ;;  %3527 = vmatpush.msk.msra.mxu2 %vm4700_vm7, %v1020_v18 }
 0x262   : > { %3528 = vmatpush.msk.msra.mxu2 %vm4700_vm7, %v1019_v24 }
 0x263   : > { %v1002_v30 = vpop.permute.xlu0 %1001 }
 0x264   : > { %v1013_v50 = vsel %vm866_vm13, 0.0, %v1002_v30  ;;  %vm5955_vm13 = vmmov %vm5949_vm8  ;;  %v3549_v30 = vld [vmem:[%s5914_s6 + $0x78] sm:$0xff] }
 0x265   : > { %v1018_v6 = vsel %vm1017_vm3, %v1013_v50, 0.0  ;;  %vm5962_vm3 = vmmov %vm5958_vm1  ;;  %v3558_v50 = vld [vmem:[%s5914_s6 + $0x80] sm:$0xff] }
 0x266   : > { %1213 = vrot.lane.b32.xlu0 %v1021_v20, %s4003_s23  ;;  %3529 = vmatpush.msk.msra.mxu2 %vm4700_vm7, %v1018_v6  ;;  %v3820_v63 = vpack.i.bf16 %v1018_v6, %v1019_v24 }
 0x267   : > { %3530 = vmatmul.msk.f32.vlgmr.msra.gmra.mxu2 %vm5949_vm8, %v1031_v58  ;;  %vm5964_vm8 = vmmov %vm5958_vm1 }
 0x268   : > { %1211 = vrot.lane.b32.xlu1 %v1020_v18, %s4003_s23  ;;  %3821 = vrot.lane.b32.xlu2 %v3820_v63, %s4004_s24 }
 0x26e   : > { %1337 = vrot.lane.b32.xlu0 %v1019_v24, %s4005_s25 }
 0x26f   : > { %3531 = vmatmul.msk.f32.gmra.mxu2 %vm5950_vm9, %v1032_v12  ;;  %vm5965_vm9 = vmmov %vm5958_vm1 }
 0x270   : > { %1207 = vrot.lane.b32.xlu1 %v1018_v6, %s4003_s23  ;;  %1145 = vrot.lane.b32.xlu2 %v1020_v18, %s4002_s20  ;;  %v1144_v39 = vpop.permute.xlu0 %1143  ;;  %s5991_s23 = smov 111  }
 0x276   : > { %1403 = vrot.lane.b32.xlu0 %v1019_v24, %s4006_s26 }
 0x277   : > { %3532 = vmatmul.msk.f32.gmra.mxu2 %vm5951_vm10, %v1033_v42  ;;  %vm5966_vm10 = vmmov %vm5958_vm1  ;;  %v3560_v42 = vld [vmem:[%s5914_s6 + $0x90] sm:$0xff] }
 0x278   : > { %1339 = vrot.lane.b32.xlu1 %v1020_v18, %s4005_s25  ;;  %1141 = vrot.lane.b32.xlu2 %v1018_v6, %s4002_s20  ;;  %v1210_v7 = vpop.permute.xlu0 %1209 }
 0x27e   : > { %1341 = vrot.lane.b32.xlu0 %v1021_v20, %s4005_s25 }
 0x27f   : > { %3533 = vmatmul.msk.f32.gmra.mxu2 %vm5954_vm12, %v1034_v38  ;;  %vm5967_vm12 = vmmov %vm5958_vm1  ;;  %v3591_v38 = vld [vmem:[%s5914_s6 + $0xe8] sm:$0xff] }
 0x280   : > { %1405 = vrot.lane.b32.xlu1 %v1020_v18, %s4006_s26  ;;  %3826 = vrot.lane.b32.xlu2 %v3815_v9, %s4007_s27 }
 0x286   : > { %1535 = vrot.lane.b32.xlu0 %v1021_v20, %s5928_s28 }
 0x288   : > { %1401 = vrot.lane.b32.xlu1 %v1018_v6, %s4006_s26  ;;  %3831 = vrot.lane.b32.xlu2 %v3820_v63, %s4007_s27  ;;  %s5934_s27 = smov 94  }
 0x28e   : > { %1531 = vrot.lane.b32.xlu0 %v1019_v24, %s5928_s28 }
 0x290   : > { %3836 = vrot.lane.b32.xlu1 %v3820_v63, %s5926_s29  ;;  %1335 = vrot.lane.b32.xlu2 %v1018_v6, %s4005_s25  ;;  %s5930_s25 = smov 95  }
 0x296   : > { %1621 = vperm.xlu0 %3812, %v993_v13   ;;  %v3578_v13 = vld [vmem:[%s5914_s6 + $0xc0] sm:$0xff] }
 0x298   : > { %1529 = vrot.lane.b32.xlu1 %v1018_v6, %s5928_s28  ;;  %1407 = vrot.lane.b32.xlu2 %v1021_v20, %s4006_s26  ;;  %v3566_v20 = vld [vmem:[%s5914_s6 + $0xa0] sm:$0xff] }
 0x29e   : > { %1607 = vperm.xlu0 %3812, %v991_v31  }
 0x2a0   : > { %1602 = vperm.xlu1 %3813, %v990_v28   ;;  %3841 = vrot.lane.b32.xlu2 %v3815_v9, %s5926_s29  ;;  %s3788_s29 = sshll.u32 %s6049_s22, 3 }
 0x2a6   : > { %1636 = vperm.xlu0 %3812, %v996_v23   ;;  %v3567_v23 = vld [vmem:[%s5914_s6 + $0xa8] sm:$0xff] }
 0x2a8   : > { %1631 = vperm.xlu1 %3813, %v995_v5   ;;  %1533 = vrot.lane.b32.xlu2 %v1020_v18, %s5928_s28  ;;  %s5932_s28 = smov 96  }
 0x2b0   : > { %1597 = vperm.xlu2 %3814, %v989_v40  }
 0x2b8   : > { %1626 = vperm.xlu2 %3814, %v994_v62   ;;  %v3579_v62 = vld [vmem:[%s5914_s6 + $0xc8] sm:$0xff] }
 0x2c0   : > { %1612 = vperm.xlu2 %3814, %v992_v45  }
 0x2c2   : > { %v3822_v26 = vpop.permute.xlu2 %3821 }
 0x2c3   : > { %v3823_v33 = vunpack.i.l.bf16 %v3822_v26  ;;  %v3824_v15 = vunpack.i.h.bf16 %v3822_v26  ;;  %v3590_v26 = vld [vmem:[%s5914_s6 + $0xe0] sm:$0xff] }
 0x2ca   : > { %v1146_v54 = vpop.permute.xlu2 %1145 }
 0x2d0   : > { %v1148_v52 = vpop.permute.xlu0 %1147 }
 0x2d1   : > { %3538 = vmatpush.msk.msra.mxu3 %vm4772_vm11, %v1148_v52  ;;  %v3581_v52 = vld [vmem:[%s5914_s6 + $0xd8] sm:$0xff] }
 0x2d2   : > { %v3817_v53 = vpop.permute.xlu1 %3816  ;;  %v1142_v60 = vpop.permute.xlu2 %1141 }
 0x2d3   : > { %3539 = vmatpush.msk.msra.mxu3 %vm4772_vm11, %v1146_v54  ;;  %v3818_v16 = vunpack.i.l.bf16 %v3817_v53  ;;  %v3819_v27 = vunpack.i.h.bf16 %v3817_v53  ;;  %v3569_v54 = vld [vmem:[%s5914_s6 + $0xb8] sm:$0xff]  ;;  %v3592_v53 = vld [vmem:[%s5914_s6 + $0xf0] sm:$0xff] }
 0x2d5   : > { %1080 = vmatpush.msra.mxu1 %v3818_v16  ;;  %3540 = vmatpush.msk.msra.mxu3 %vm4772_vm11, %v1144_v39  ;;  %v3568_v39 = vld [vmem:[%s5914_s6 + $0xb0] sm:$0xff]  ;;  %v3593_v16 = vld [vmem:[%s5914_s6 + $0xf8] sm:$0xff] }
 0x2d7   : > { %1081 = vmatpush.msra.mxu1 %v3819_v27  ;;  %3541 = vmatpush.msk.msra.mxu3 %vm4772_vm11, %v1142_v60  ;;  %v3598_v60 = vld [vmem:[%s5914_s6 + $0x100] sm:$0xff]  ;;  %v3599_v27 = vld [vmem:[%s5914_s6 + $0x108] sm:$0xff] }
 0x2d8   : > { %3542 = vmatmul.msk.f32.vlgmr.msra.gmra.mxu3 %vm5955_vm13, %v3534_v4  ;;  %v1214_v61 = vpop.permute.xlu0 %1213  ;;  %vm5968_vm13 = vmmov %vm5958_vm1  ;;  %v3600_v4 = vld [vmem:[%s5914_s6 + $0x110] sm:$0xff] }
 0x2d9   : > { %1082 = vmatpush.msra.mxu1 %v3823_v33  ;;  %3550 = vmatpush.msk.msrb.mxu0 %vm4700_vm7, %v1214_v61  ;;  %v3601_v33 = vld [vmem:[%s5914_s6 + $0x118] sm:$0xff] }
 0x2da   : > { %v1212_v1 = vpop.permute.xlu1 %1211  ;;  %v3827_v2 = vpop.permute.xlu2 %3826 }
 0x2db   : > { %1083 = vmatpush.msra.mxu1 %v3824_v15  ;;  %3551 = vmatpush.msk.msrb.mxu0 %vm4700_vm7, %v1212_v1  ;;  %v3828_v36 = vunpack.i.l.bf16 %v3827_v2  ;;  %v3829_v10 = vunpack.i.h.bf16 %v3827_v2 }
 0x2dc   : > { %3522 = vmatmul.msk.f32.vlgmr.msra.gmra.mxu1 %vm5956_vm14, %v3518_v59  ;;  %vm5969_vm14 = vmmov %vm5958_vm1 }
 0x2dd   : > { %3552 = vmatpush.msk.msrb.mxu0 %vm4700_vm7, %v1210_v7  ;;  %1314 = vmatpush.msrb.mxu1 %v3828_v36 }
 0x2df   : > { %1315 = vmatpush.msrb.mxu1 %v3829_v10 }
 0x2e0   : > { %3543 = vmatmul.msk.f32.gmra.mxu3 %vm5957_vm15, %v3535_v37  ;;  %v1338_v11 = vpop.permute.xlu0 %1337  ;;  %vm5970_vm15 = vmmov %vm5958_vm1 }
 0x2e2   : > { %v1208_v47 = vpop.permute.xlu1 %1207  ;;  %v3832_v34 = vpop.permute.xlu2 %3831 }
 0x2e3   : > { %3553 = vmatpush.msk.msrb.mxu0 %vm4700_vm7, %v1208_v47  ;;  %v3833_v51 = vunpack.i.l.bf16 %v3832_v34  ;;  %v3834_v48 = vunpack.i.h.bf16 %v3832_v34 }
 0x2e4   : > { %3523 = vmatmul.msk.f32.gmra.mxu1 %vm5958_vm1, %v3519_v46  ;;  %3554 = vmatmul.msk.f32.vlgmr.msrb.gmra.mxu0 %vm5959_vm2, %v3546_v19  ;;  %vm5972_vm2 = vmmov %vm5958_vm1  ;;  %v1655_v46 = vld [vmem:[%s5917_s9] sm:$0x3]  ;;  %v1661_v19 = vadd.s32 56, %v4544_v29 }
 0x2e5   : > { %1316 = vmatpush.msrb.mxu1 %v3833_v51  ;;  %v1662_v47 = vperm.slane %v1655_v46, 0  ;;  %v1663_v51 = vperm.slane %v1655_v46, 1 }
 0x2e7   : > { %1317 = vmatpush.msrb.mxu1 %v3834_v48  ;;  %v1660_v48 = vadd.s32 48, %v4544_v29 }
 0x2e8   : > { %3544 = vmatmul.msk.f32.gmra.mxu3 %vm5960_vm5, %v3536_v0  ;;  %v1404_v49 = vpop.permute.xlu0 %1403  ;;  %vm5973_vm5 = vmmov %vm5958_vm1  ;;  %v1659_v0 = vadd.s32 40, %v4544_v29 }
 0x2ea   : > { %v1340_v24 = vpop.permute.xlu1 %1339  ;;  %v1336_v32 = vpop.permute.xlu2 %1335 }
 0x2eb   : > { %v1126_v59 = vpop.f32.mrf.mxu2 }
 0x2ec   : > { %3524 = vmatmul.msk.f32.gmra.mxu1 %vm5961_vm6, %v3520_v55  ;;  %3555 = vmatmul.msk.f32.gmra.mxu0 %vm5962_vm3, %v3547_v8  ;;  %vm5974_vm6 = vmmov %vm5958_vm1 }
 0x2ed   : > { %vm5975_vm3 = vmmov %vm5958_vm1 }
 0x2f0   : > { %3545 = vmatmul.msk.f32.gmra.mxu3 %vm5963_vm4, %v3537_v41  ;;  %v1342_v25 = vpop.permute.xlu0 %1341  ;;  %vm5976_vm4 = vmmov %vm5958_vm1  ;;  %v1656_v41 = vadd.s32 16, %v4544_v29 }
 0x2f1   : > { %3570 = vmatpush.msk.msrb.mxu2 %vm4772_vm11, %v1342_v25 }
 0x2f2   : > { %v1406_v21 = vpop.permute.xlu1 %1405  ;;  %v1408_v18 = vpop.permute.xlu2 %1407 }
 0x2f3   : > { %3571 = vmatpush.msk.msrb.mxu2 %vm4772_vm11, %v1340_v24  ;;  %3582 = vmatpush.msk.msrb.mxu3 %vm4700_vm7, %v1408_v18  ;;  %v1129_v10 = vpop.f32.mrf.mxu2 }
 0x2f4   : > { %3525 = vmatmul.msk.f32.gmra.mxu1 %vm5964_vm8, %v3521_v56  ;;  %3556 = vmatmul.msk.f32.gmra.mxu0 %vm5965_vm9, %v3548_v57  ;;  %vm5977_vm8 = vmmov %vm5958_vm1 }
 0x2f5   : > { %3572 = vmatpush.msk.msrb.mxu2 %vm4772_vm11, %v1338_v11  ;;  %3583 = vmatpush.msk.msrb.mxu3 %vm4700_vm7, %v1406_v21  ;;  %vm5979_vm9 = vmmov %vm5958_vm1 }
 0x2f7   : > { %3573 = vmatpush.msk.msrb.mxu2 %vm4772_vm11, %v1336_v32  ;;  %3584 = vmatpush.msk.msrb.mxu3 %vm4700_vm7, %v1404_v49  ;;  %v1658_v49 = vadd.s32 32, %v4544_v29  ;;  %v1657_v32 = vadd.s32 24, %v4544_v29 }
 0x2f8   : > { %3574 = vmatmul.msk.f32.vlgmr.msrb.gmra.mxu2 %vm5966_vm10, %v3566_v20  ;;  %v1536_v9 = vpop.permute.xlu0 %1535  ;;  %vm5980_vm10 = vmmov %vm5958_vm1 }
 0x2f9   : > { %3602 = vmatpush.msk.msra.mxu1 %vm4772_vm11, %v1536_v9 }
 0x2fa   : > { %v1402_v6 = vpop.permute.xlu1 %1401  ;;  %v3842_v63 = vpop.permute.xlu2 %3841 }
 0x2fb   : > { %v3843_v31 = vunpack.i.l.bf16 %v3842_v63  ;;  %3585 = vmatpush.msk.msrb.mxu3 %vm4700_vm7, %v1402_v6  ;;  %v3844_v28 = vunpack.i.h.bf16 %v3842_v63  ;;  %vm5971_vm7 = vmmov %vm5958_vm1  ;;  %v1132_v55 = vpop.f32.mrf.mxu2 }
 0x2fc   : > { %3557 = vmatmul.msk.f32.gmra.mxu0 %vm5967_vm12, %v3549_v30  ;;  %3562 = vmatmul.msk.f32.vlgmr.msrb.gmra.mxu1 %vm5968_vm13, %v3558_v50  ;;  %vm5981_vm12 = vmmov %vm5958_vm1 }
 0x2fd   : > { %3586 = vmatmul.msk.f32.vlgmr.msrb.gmra.mxu3 %vm5969_vm14, %v3578_v13  ;;  %1508 = vmatpush.msra.mxu0 %v3843_v31  ;;  %vm5982_vm13 = vmmov %vm5958_vm1 }
 0x2fe   : > { %vm5983_vm14 = vmmov %vm5958_vm1 }
 0x2ff   : > { %1509 = vmatpush.msra.mxu0 %v3844_v28 }
 0x300   : > { %3575 = vmatmul.msk.f32.gmra.mxu2 %vm5970_vm15, %v3567_v23  ;;  %v1532_v45 = vpop.permute.xlu0 %1531  ;;  %vm5984_vm15 = vmmov %vm5958_vm1 }
 0x302   : > { %v3837_v5 = vpop.permute.xlu1 %3836  ;;  %v1534_v40 = vpop.permute.xlu2 %1533 }
 0x303   : > { %v3838_v58 = vunpack.i.l.bf16 %v3837_v5  ;;  %3603 = vmatpush.msk.msra.mxu1 %vm4772_vm11, %v1534_v40  ;;  %v3839_v12 = vunpack.i.h.bf16 %v3837_v5  ;;  %v1135_v57 = vpop.f32.mrf.mxu2 }
 0x304   : > { %3563 = vmatmul.msk.f32.gmra.mxu1 %vm5971_vm7, %v3559_v3  ;;  %vm5985_vm7 = vmmov %vm5958_vm1 }
 0x305   : > { %3587 = vmatmul.msk.f32.gmra.mxu3 %vm5958_vm1, %v3579_v62  ;;  %1510 = vmatpush.msra.mxu0 %v3838_v58 }
 0x306   : > { %3604 = vmatpush.msk.msra.mxu1 %vm4772_vm11, %v1532_v45 }
 0x307   : > { %1511 = vmatpush.msra.mxu0 %v3839_v12 }
 0x308   : > { %3576 = vmatmul.msk.f32.gmra.mxu2 %vm5972_vm2, %v3568_v39  ;;  %3594 = vmatmul.msk.f32.vlgmr.msra.gmra.mxu0 %vm5973_vm5, %v3590_v26  ;;  %vm1679_vm2 = vcmp.eq.s32.totalorder %v1661_v19, %v1663_v51  ;;  %vm1676_vm5 = vcmp.eq.s32.totalorder %v1660_v48, %v1662_v47 }
 0x309   : > { %3622 = vmatpush.msk.msra.mxu3 %vm1679_vm2, %v4000_v43  ;;  %vm1696_vm2 = vcmask 523264  }
 0x30a   : > { %v1530_v7 = vpop.permute.xlu1 %1529 }
 0x30b   : > { %3605 = vmatpush.msk.msra.mxu1 %vm4772_vm11, %v1530_v7  ;;  %vm5978_vm11 = vmmov %vm5958_vm1  ;;  %vm1678_vm1 = vcmp.eq.s32.totalorder %v1661_v19, %v1662_v47 }
 0x30c   : > { %3564 = vmatmul.msk.f32.gmra.mxu1 %vm5974_vm6, %v3560_v42  ;;  %3610 = vmatpush.msk.msra.mxu2 %vm1678_vm1, %v4000_v43  ;;  %vm1677_vm6 = vcmp.eq.s32.totalorder %v1660_v48, %v1663_v51  ;;  %vm1665_vm1 = vcmp.eq.s32.totalorder %v4544_v29, %v1663_v51  ;;  %v1598_v42 = vpop.permute.xlu2 %1597 }
 0x30d   : > { %3588 = vmatmul.msk.f32.gmra.mxu3 %vm5975_vm3, %v3580_v22  ;;  %vm1674_vm3 = vcmp.eq.s32.totalorder %v1659_v0, %v1662_v47 }
 0x30e   : > { %3611 = vmatpush.msk.msra.mxu2 %vm1676_vm5, %v4000_v43  ;;  %3623 = vmatpush.msk.msra.mxu3 %vm1677_vm6, %v4000_v43 }
 0x310   : > { %3577 = vmatmul.msk.f32.gmra.mxu2 %vm5976_vm4, %v3569_v54  ;;  %3595 = vmatmul.msk.f32.gmra.mxu0 %vm5977_vm8, %v3591_v38  ;;  %vm1675_vm4 = vcmp.eq.s32.totalorder %v1659_v0, %v1663_v51  ;;  %vm1672_vm8 = vcmp.eq.s32.totalorder %v1658_v49, %v1662_v47  ;;  %v1622_v38 = vpop.permute.xlu0 %1621 }
 0x311   : > { %3612 = vmatpush.msk.msra.mxu2 %vm1674_vm3, %v4000_v43  ;;  %3624 = vmatpush.msk.msra.mxu3 %vm1675_vm4, %v4000_v43 }
 0x313   : > { %3613 = vmatpush.msk.msra.mxu2 %vm1672_vm8, %v4000_v43  ;;  %vm1796_vm8 = vcmask 138240  }
 0x314   : > { %3565 = vmatmul.msk.f32.gmra.mxu1 %vm5978_vm11, %v3561_v44  ;;  %vm1673_vm11 = vcmp.eq.s32.totalorder %v1658_v49, %v1663_v51 }
 0x315   : > { %3589 = vmatmul.msk.f32.gmra.mxu3 %vm5979_vm9, %v3581_v52  ;;  %vm1670_vm9 = vcmp.eq.s32.totalorder %v1657_v32, %v1662_v47 }
 0x316   : > { %3625 = vmatpush.msk.msra.mxu3 %vm1673_vm11, %v4000_v43  ;;  %3614 = vmatpush.msk.msra.mxu2 %vm1670_vm9, %v4000_v43 }
 0x318   : > { %3596 = vmatmul.msk.f32.gmra.mxu0 %vm5980_vm10, %v3592_v53  ;;  %vm1671_vm10 = vcmp.eq.s32.totalorder %v1657_v32, %v1663_v51  ;;  %v1608_v32 = vpop.permute.xlu0 %1607 }
 0x319   : > { %3626 = vmatpush.msk.msra.mxu3 %vm1671_vm10, %v4000_v43 }
 0x31c   : > { %3606 = vmatmul.msk.f32.vlgmr.msra.gmra.mxu1 %vm5981_vm12, %v3598_v60  ;;  %vm1668_vm12 = vcmp.eq.s32.totalorder %v1656_v41, %v1662_v47 }
 0x31d   : > { %3615 = vmatpush.msk.msra.mxu2 %vm1668_vm12, %v4000_v43  ;;  %vm5942_vm12 = vcmask 1031168  }
 0x320   : > { %3597 = vmatmul.msk.f32.gmra.mxu0 %vm5982_vm13, %v3593_v16  ;;  %vm1669_vm13 = vcmp.eq.s32.totalorder %v1656_v41, %v1663_v51 }
 0x321   : > { %3627 = vmatpush.msk.msra.mxu3 %vm1669_vm13, %v4000_v43  ;;  %vm5941_vm13 = vcmask 916480  }
 0x324   : > { %3607 = vmatmul.msk.f32.gmra.mxu1 %vm5983_vm14, %v3599_v27  ;;  %vm1666_vm14 = vcmp.eq.s32.totalorder %v4549_v35, %v1662_v47 }
 0x325   : > { %3616 = vmatpush.msk.msra.mxu2 %vm1666_vm14, %v4000_v43  ;;  %vm2339_vm14 = vcmask 900096  }
 0x32c   : > { %3608 = vmatmul.msk.f32.gmra.mxu1 %vm5984_vm15, %v3600_v4  ;;  %vm1667_vm15 = vcmp.eq.s32.totalorder %v4549_v35, %v1663_v51 }
 0x32d   : > { %3628 = vmatpush.msk.msra.mxu3 %vm1667_vm15, %v4000_v43  ;;  %vm5944_vm15 = vcmask 785408  }
 0x32f   : > { %3629 = vmatpush.msk.msra.mxu3 %vm1665_vm1, %v4000_v43  ;;  %vm2242_vm1 = vcmask 908288  }
 0x334   : > { %3609 = vmatmul.msk.f32.gmra.mxu1 %vm5985_vm7, %v3601_v33  ;;  %vm1664_vm7 = vcmp.eq.s32.totalorder %v4544_v29, %v1662_v47 }
 0x335   : > { %3617 = vmatpush.msk.msra.mxu2 %vm1664_vm7, %v4000_v43  ;;  %vm1873_vm7 = vcmask 1039360  }
 0x359   : > { %v1085_v61 = vpop.f32.mrf.mxu1 }
 0x35a   : > { %v1127_v20 = vadd.f32 %v1126_v59, %v1085_v61 }
 0x35b   : > { %v1191_v1 = vpop.f32.mrf.mxu3 }
 0x35c   : > { %v1203_v35 = vadd.f32 %v1191_v1, %v1127_v20 }
 0x361   : > { %v4945_v15 = vpop.f32.mrf.mxu1  ;;  %v1257_v2 = vpop.f32.mrf.mxu0 }
 0x362   : > { %v1269_v6 = vadd.f32 %v1257_v2, %v1203_v35  ;;  %v1130_v13 = vadd.f32 %v1129_v10, %v4945_v15  ;;  %v1603_v2 = vpop.permute.xlu1 %1602 }
 0x363   : > { %v1194_v37 = vpop.f32.mrf.mxu3 }
 0x364   : > { %v1204_v23 = vadd.f32 %v1194_v37, %v1130_v13 }
 0x369   : > { %v4947_v36 = vpop.f32.mrf.mxu1  ;;  %v1260_v34 = vpop.f32.mrf.mxu0 }
 0x36a   : > { %v1270_v5 = vadd.f32 %v1260_v34, %v1204_v23  ;;  %v1133_v43 = vadd.f32 %v1132_v55, %v4947_v36 }
 0x36b   : > { %v1197_v24 = vpop.f32.mrf.mxu3 }
 0x36c   : > { %v1205_v7 = vadd.f32 %v1197_v24, %v1133_v43 }
 0x371   : > { %v4949_v11 = vpop.f32.mrf.mxu1  ;;  %v1263_v25 = vpop.f32.mrf.mxu0 }
 0x372   : > { %v1271_v44 = vadd.f32 %v1263_v25, %v1205_v7  ;;  %v1136_v60 = vadd.f32 %v1135_v57, %v4949_v11  ;;  %v1627_v11 = vpop.permute.xlu2 %1626  ;;  %v1632_v57 = vpop.permute.xlu1 %1631 }
 0x373   : > { %v1200_v21 = vpop.f32.mrf.mxu3 }
 0x374   : > { %v1206_v10 = vadd.f32 %v1200_v21, %v1136_v60 }
 0x379   : > { %v1319_v8 = vpop.f32.mrf.mxu1  ;;  %v1266_v18 = vpop.f32.mrf.mxu0 }
 0x37a   : > { %v1331_v31 = vadd.f32 %v1319_v8, %v1269_v6  ;;  %v1272_v19 = vadd.f32 %v1266_v18, %v1206_v10 }
 0x37b   : > { %v1385_v30 = vpop.f32.mrf.mxu2 }
 0x37c   : > { %v1397_v29 = vadd.f32 %v1385_v30, %v1331_v31  ;;  %v1637_v31 = vpop.permute.xlu0 %1636 }
 0x380   : > { %v1451_v50 = vpop.f32.mrf.mxu3 }
 0x381   : > { %v1322_v56 = vpop.f32.mrf.mxu1  ;;  %v1463_v40 = vadd.f32 %v1451_v50, %v1397_v29 }
 0x382   : > { %v1332_v58 = vadd.f32 %v1322_v56, %v1270_v5 }
 0x383   : > { %v1388_v3 = vpop.f32.mrf.mxu2 }
 0x384   : > { %v1398_v22 = vadd.f32 %v1388_v3, %v1332_v58 }
 0x385   : > { %v1513_v63 = vpop.f32.mrf.mxu0 }
 0x386   : > { %v1525_v45 = vadd.f32 %v1513_v63, %v1463_v40  ;;  %v1613_v63 = vpop.permute.xlu2 %1612 }
 0x388   : > { %v1454_v62 = vpop.f32.mrf.mxu3 }
 0x389   : > { %v1325_v9 = vpop.f32.mrf.mxu1  ;;  %v1464_v52 = vadd.f32 %v1454_v62, %v1398_v22 }
 0x38a   : > { %v1333_v27 = vadd.f32 %v1325_v9, %v1271_v44 }
 0x38b   : > { %v1391_v16 = vpop.f32.mrf.mxu2 }
 0x38c   : > { %v1399_v37 = vadd.f32 %v1391_v16, %v1333_v27 }
 0x38d   : > { %v1516_v12 = vpop.f32.mrf.mxu0 }
 0x38e   : > { %v1526_v4 = vadd.f32 %v1516_v12, %v1464_v52 }
 0x390   : > { %v1457_v61 = vpop.f32.mrf.mxu3 }
 0x391   : > { %v1328_v28 = vpop.f32.mrf.mxu1  ;;  %v1465_v47 = vadd.f32 %v1457_v61, %v1399_v37 }
 0x392   : > { %v1334_v51 = vadd.f32 %v1328_v28, %v1272_v19 }
 0x393   : > { %v1394_v49 = vpop.f32.mrf.mxu2 }
 0x394   : > { %v1400_v25 = vadd.f32 %v1394_v49, %v1334_v51 }
 0x395   : > { %v1519_v36 = vpop.f32.mrf.mxu0 }
 0x396   : > { %v1527_v48 = vadd.f32 %v1519_v36, %v1465_v47 }
 0x398   : > { %v1460_v41 = vpop.f32.mrf.mxu3 }
 0x399   : > { %v1579_v39 = vpop.f32.mrf.mxu1  ;;  %v1466_v18 = vadd.f32 %v1460_v41, %v1400_v25 }
 0x39a   : > { %v1591_v26 = vadd.f32 %v1579_v39, %v1525_v45 }
 0x39c   : > { %v1615_v54 = vmul.f32 %v1598_v42, %v1591_v26 }
 0x39d   : > { %v1522_v21 = vpop.f32.mrf.mxu0 }
 0x39e   : > { %v1639_v53 = vadd.f32 %v1622_v38, %v1615_v54  ;;  %v1528_v9 = vadd.f32 %v1522_v21, %v1466_v18  ;;  %v3990_v38 = vld [vmem:[%s5918_s10] sm:$0x3] }
 0x39f   : > { %vm1821_vm11 = vcmp.ge.s32.totalorder %v3990_v38, 1 }
 0x3a0   : > { %v1647_v33 = vmul.f32 0.2, %v1639_v53  ;;  %vm1643_vm5 = vcmp.gt.f32.partialorder %v1639_v53, 0.0  ;;  %v1823_v60 = vsel %vm1821_vm11, 1, %v3999_v14  ;;  %vm5943_vm11 = vcmask 769024  }
 0x3a1   : > { %v1582_v15 = vpop.f32.mrf.mxu1  ;;  %v1824_v16 = vperm.slane %v1823_v60, 0  ;;  %v1825_v27 = vperm.slane %v1823_v60, 1 }
 0x3a2   : > { %v1592_v59 = vadd.f32 %v1582_v15, %v1526_v4  ;;  %v1651_v1 = vsel %vm1643_vm5, %v1639_v53, %v1647_v33  ;;  %vm5992_vm5 = vcmask 261120   ;;  %v3777_v4 = vld [vmem:[%s5922_s14 + $0x20] sm:$0x7] }
 0x3a3   : > { %3618 = vmatmul.msk.f32.vlgmr.msra.gmra.mxu2 %vm1696_vm2, %v1651_v1  ;;  %3630 = vmatmul.msk.f32.vlgmr.msra.gmra.mxu3 %vm1696_vm2, %v1651_v1  ;;  %vm5031_vm9 = vcmp.eq.s32.totalorder %v1824_v16, 1  ;;  %vm5035_vm10 = vcmp.eq.s32.totalorder %v1825_v27, 1 }
 0x3a4   : > { %v1616_v46 = vmul.f32 %v1603_v2, %v1592_v59 }
 0x3a6   : > { %v1640_v34 = vadd.f32 %v1627_v11, %v1616_v46 }
 0x3a8   : > { %vm1644_vm6 = vcmp.gt.f32.partialorder %v1640_v34, 0.0  ;;  %v1648_v0 = vmul.f32 0.2, %v1640_v34 }
 0x3a9   : > { %v1585_v55 = vpop.f32.mrf.mxu1 }
 0x3aa   : > { %v1593_v8 = vadd.f32 %v1585_v55, %v1527_v48  ;;  %v1652_v24 = vsel %vm1644_vm6, %v1640_v34, %v1648_v0  ;;  %vm5993_vm6 = vmmov %vm5992_vm5 }
 0x3ab   : > { %3619 = vmatmul.msk.f32.gmra.mxu2 %vm1696_vm2, %v1652_v24  ;;  %3631 = vmatmul.msk.f32.gmra.mxu3 %vm1696_vm2, %v1652_v24 }
 0x3ac   : > { %v1617_v56 = vmul.f32 %v1608_v32, %v1593_v8 }
 0x3ae   : > { %v1641_v20 = vadd.f32 %v1632_v57, %v1617_v56 }
 0x3b0   : > { %vm1645_vm3 = vcmp.gt.f32.partialorder %v1641_v20, 0.0  ;;  %v1649_v30 = vmul.f32 0.2, %v1641_v20 }
 0x3b1   : > { %v1588_v35 = vpop.f32.mrf.mxu1 }
 0x3b2   : > { %v1594_v50 = vadd.f32 %v1588_v35, %v1528_v9  ;;  %v1653_v6 = vsel %vm1645_vm3, %v1641_v20, %v1649_v30  ;;  %vm5994_vm3 = vmmov %vm5992_vm5 }
 0x3b3   : > { %3620 = vmatmul.msk.f32.gmra.mxu2 %vm1696_vm2, %v1653_v6  ;;  %3632 = vmatmul.msk.f32.gmra.mxu3 %vm1696_vm2, %v1653_v6 }
 0x3b4   : > { %v1618_v13 = vmul.f32 %v1613_v63, %v1594_v50 }
 0x3b6   : > { %v1642_v28 = vadd.f32 %v1637_v31, %v1618_v13 }
 0x3b8   : > { %vm1646_vm4 = vcmp.gt.f32.partialorder %v1642_v28, 0.0  ;;  %v1650_v23 = vmul.f32 0.2, %v1642_v28 }
 0x3ba   : > { %v1654_v29 = vsel %vm1646_vm4, %v1642_v28, %v1650_v23  ;;  %vm5995_vm4 = vmmov %vm5994_vm3 }
 0x3bb   : > { %3621 = vmatmul.msk.f32.gmra.mxu2 %vm1696_vm2, %v1654_v29  ;;  %3633 = vmatmul.msk.f32.gmra.mxu3 %vm1696_vm2, %v1654_v29  ;;  %vm2558_vm2 = vcmask 777216  }
 0x426   : > { %v1726_v3 = vpop.f32.mrf.mxu2  ;;  %v1755_v5 = vpop.f32.mrf.mxu3 }
 0x427   : > { %1782 = vrot.lane.b32.xlu2 %v1755_v5, %s4010_s17  ;;  %1780 = vrot.lane.b32.xlu1 %v1726_v3, %s4010_s17 }
 0x42e   : > { %v1729_v40 = vpop.f32.mrf.mxu2  ;;  %v1758_v62 = vpop.f32.mrf.mxu3 }
 0x42f   : > { %1786 = vrot.lane.b32.xlu0 %v1758_v62, %s4010_s17  ;;  %1784 = vrot.lane.b32.xlu2 %v1729_v40, %s4010_s17 }
 0x436   : > { %v1732_v43 = vpop.f32.mrf.mxu2  ;;  %v1761_v58 = vpop.f32.mrf.mxu3 }
 0x437   : > { %1790 = vrot.lane.b32.xlu1 %v1761_v58, %s4010_s17  ;;  %1788 = vrot.lane.b32.xlu0 %v1732_v43, %s4010_s17 }
 0x43e   : > { %v1735_v45 = vpop.f32.mrf.mxu2  ;;  %v1764_v12 = vpop.f32.mrf.mxu3 }
 0x43f   : > { %1794 = vrot.lane.b32.xlu2 %v1764_v12, %s4010_s17  ;;  %1792 = vrot.lane.b32.xlu1 %v1735_v45, %s4010_s17 }
 0x481   : > { %v1783_v39 = vpop.permute.xlu2 %1782 }
 0x482   : > { %v5000_v42 = vsel %vm1796_vm8, %v1783_v39, 0.0 }
 0x489   : > { %v1785_v52 = vpop.permute.xlu2 %1784 }
 0x48a   : > { %v5075_v46 = vsel %vm1796_vm8, 0.0, %v1785_v52 }
 0x499   : > { %v1781_v26 = vpop.permute.xlu1 %1780  ;;  %v5039_v14 = vpop.permute.xlu2 %1794 }
 0x49a   : > { %v5003_v7 = vsel %vm1796_vm8, %v1781_v26, %v1783_v39  ;;  %v5006_v22 = vsel %vm1796_vm8, 0.0, %v1781_v26  ;;  %v5173_v18 = vsel %vm1796_vm8, %v5039_v14, 0.0 }
 0x49b   : > { %1999 = vrot.lane.b32.xlu0 %v5006_v22, %s4002_s20  ;;  %2001 = vrot.lane.b32.xlu1 %v5003_v7, %s4002_s20  ;;  %v3845_v54 = vpack.i.bf16 %v5000_v42, %v5003_v7 }
 0x49d   : > { %3846 = vrot.lane.b32.xlu2 %v3845_v54, %s4004_s24 }
 0x4a1   : > { %v1787_v44 = vpop.permute.xlu0 %1786 }
 0x4a2   : > { %v5064_v10 = vsel %vm1796_vm8, %v1785_v52, %v1787_v44  ;;  %v5067_v37 = vsel %vm1796_vm8, %v1787_v44, 0.0 }
 0x4a3   : > { %2107 = vrot.lane.b32.xlu0 %v5006_v22, %s4006_s26  ;;  %2109 = vrot.lane.b32.xlu1 %v5003_v7, %s4006_s26  ;;  %v3865_v11 = vpack.i.bf16 %v5006_v22, %v5067_v37  ;;  %v3860_v19 = vpack.i.bf16 %v5064_v10, %v5075_v46 }
 0x4a5   : > { %2003 = vrot.lane.b32.xlu2 %v5000_v42, %s4002_s20 }
 0x4a9   : > { %v1791_v53 = vpop.permute.xlu1 %1790  ;;  %v1789_v15 = vpop.permute.xlu0 %1788 }
 0x4aa   : > { %v1799_v2 = vsel %vm1796_vm8, %v1789_v15, %v1791_v53  ;;  %v5060_v36 = vsel %vm1796_vm8, 0.0, %v1789_v15  ;;  %v5129_v47 = vsel %vm1796_vm8, %v1791_v53, 0.0 }
 0x4ab   : > { %2315 = vrot.lane.b32.xlu0 %v5006_v22, %s5986_s19  ;;  %2317 = vrot.lane.b32.xlu1 %v5003_v7, %s5986_s19  ;;  %v3890_v34 = vpack.i.bf16 %v5129_v47, %v1799_v2  ;;  %v5181_v9 = vpack.i.bf16 %v5060_v36, %v5173_v18 }
 0x4ad   : > { %2111 = vrot.lane.b32.xlu2 %v5000_v42, %s4006_s26 }
 0x4b1   : > { %v1793_v61 = vpop.permute.xlu1 %1792 }
 0x4b2   : > { %v5043_v59 = vsel %vm1796_vm8, %v1793_v61, %v5039_v14  ;;  %v5046_v1 = vsel %vm1796_vm8, 0.0, %v1793_v61 }
 0x4b3   : > { %2423 = vrot.lane.b32.xlu0 %v5006_v22, %s5932_s28  ;;  %2425 = vrot.lane.b32.xlu1 %v5003_v7, %s5932_s28  ;;  %v5177_v20 = vpack.i.bf16 %v5043_v59, %v5046_v1 }
 0x4b4   : > { %3640 = vmatpush.msk.msrb.mxu2 %vm5031_vm9, %v5046_v1  ;;  %3646 = vmatpush.msk.msrb.mxu3 %vm5035_vm10, %v5043_v59 }
 0x4b5   : > { %3851 = vrot.lane.b32.xlu2 %v3845_v54, %s5991_s23 }
 0x4b6   : > { %3641 = vmatpush.msk.msrb.mxu2 %vm5031_vm9, %v5060_v36  ;;  %3647 = vmatpush.msk.msrb.mxu3 %vm5035_vm10, %v1799_v2 }
 0x4b8   : > { %3642 = vmatpush.msk.msrb.mxu2 %vm5031_vm9, %v5075_v46  ;;  %3648 = vmatpush.msk.msrb.mxu3 %vm5035_vm10, %v5064_v10 }
 0x4ba   : > { %3643 = vmatpush.msk.msrb.mxu2 %vm5031_vm9, %v5006_v22  ;;  %3649 = vmatpush.msk.msrb.mxu3 %vm5035_vm10, %v5003_v7 }
 0x4bb   : > { %3866 = vrot.lane.b32.xlu1 %v3865_v11, %s4004_s24  ;;  %3861 = vrot.lane.b32.xlu0 %v3860_v19, %s4004_s24 }
 0x4bd   : > { %2319 = vrot.lane.b32.xlu2 %v5000_v42, %s5986_s19 }
 0x4c3   : > { %2007 = vrot.lane.b32.xlu1 %v5064_v10, %s4002_s20  ;;  %2005 = vrot.lane.b32.xlu0 %v5075_v46, %s4002_s20 }
 0x4c5   : > { %2427 = vrot.lane.b32.xlu2 %v5000_v42, %s5932_s28 }
 0x4cb   : > { %2115 = vrot.lane.b32.xlu1 %v5064_v10, %s4006_s26  ;;  %2113 = vrot.lane.b32.xlu0 %v5075_v46, %s4006_s26 }
 0x4cd   : > { %3856 = vrot.lane.b32.xlu2 %v3845_v54, %s5930_s25 }
 0x4d3   : > { %3876 = vrot.lane.b32.xlu1 %v3865_v11, %s5991_s23  ;;  %3871 = vrot.lane.b32.xlu0 %v3860_v19, %s5991_s23 }
 0x4d5   : > { %2009 = vrot.lane.b32.xlu2 %v5067_v37, %s4002_s20 }
 0x4db   : > { %2323 = vrot.lane.b32.xlu1 %v5064_v10, %s5986_s19  ;;  %2321 = vrot.lane.b32.xlu0 %v5075_v46, %s5986_s19 }
 0x4dd   : > { %2117 = vrot.lane.b32.xlu2 %v5067_v37, %s4006_s26 }
 0x4e3   : > { %2431 = vrot.lane.b32.xlu1 %v5064_v10, %s5932_s28  ;;  %2429 = vrot.lane.b32.xlu0 %v5075_v46, %s5932_s28 }
 0x4e5   : > { %2325 = vrot.lane.b32.xlu2 %v5067_v37, %s5986_s19 }
 0x4eb   : > { %3886 = vrot.lane.b32.xlu1 %v3865_v11, %s5930_s25  ;;  %3881 = vrot.lane.b32.xlu0 %v3860_v19, %s5930_s25 }
 0x4ed   : > { %2433 = vrot.lane.b32.xlu2 %v5067_v37, %s5932_s28 }
 0x4f3   : > { %2011 = vrot.lane.b32.xlu0 %v5060_v36, %s4002_s20  ;;  %2013 = vrot.lane.b32.xlu1 %v1799_v2, %s4002_s20 }
 0x4f5   : > { %3891 = vrot.lane.b32.xlu2 %v3890_v34, %s4004_s24 }
 0x4f7   : > { %v5136_v51 = vpop.permute.xlu2 %3846 }
 0x4f8   : > { %v5940_v40 = vunpack.i.l.bf16 %v5136_v51 }
 0x4fb   : > { %2119 = vrot.lane.b32.xlu0 %v5060_v36, %s4006_s26  ;;  %2121 = vrot.lane.b32.xlu1 %v1799_v2, %s4006_s26 }
 0x4fd   : > { %2015 = vrot.lane.b32.xlu2 %v5129_v47, %s4002_s20 }
 0x4ff   : > { %v2004_v48 = vpop.permute.xlu2 %2003 }
 0x503   : > { %2327 = vrot.lane.b32.xlu0 %v5060_v36, %s5986_s19  ;;  %2329 = vrot.lane.b32.xlu1 %v1799_v2, %s5986_s19 }
 0x505   : > { %2123 = vrot.lane.b32.xlu2 %v5129_v47, %s4006_s26 }
 0x507   : > { %v2112_v0 = vpop.permute.xlu2 %2111 }
 0x50b   : > { %2435 = vrot.lane.b32.xlu0 %v5060_v36, %s5932_s28  ;;  %2437 = vrot.lane.b32.xlu1 %v1799_v2, %s5932_s28 }
 0x50d   : > { %v2002_v49 = vpop.permute.xlu1 %2001  ;;  %3896 = vrot.lane.b32.xlu2 %v3890_v34, %s5991_s23  ;;  %v2000_v55 = vpop.permute.xlu0 %1999 }
 0x50e   : > { %v5153_v8 = vsel %vm5942_vm12, %v2002_v49, %v2004_v48  ;;  %v5156_v24 = vsel %vm5942_vm12, %v2000_v55, %v2002_v49 }
 0x50f   : > { %v5158_v32 = vpop.permute.xlu2 %3851 }
 0x513   : > { %2643 = vrot.lane.b32.xlu0 %v5060_v36, %s5934_s27  ;;  %2645 = vrot.lane.b32.xlu1 %v1799_v2, %s5934_s27  ;;  %v5938_v2 = vunpack.i.l.bf16 %v5158_v32 }
 0x515   : > { %v2110_v41 = vpop.permute.xlu1 %2109  ;;  %2331 = vrot.lane.b32.xlu2 %v5129_v47, %s5986_s19  ;;  %v2108_v25 = vpop.permute.xlu0 %2107 }
 0x516   : > { %v5166_v56 = vsel %vm5941_vm13, %v2110_v41, %v2112_v0  ;;  %v5169_v57 = vsel %vm5941_vm13, %v2108_v25, %v2110_v41 }
 0x517   : > { %v2320_v21 = vpop.permute.xlu2 %2319 }
 0x51b   : > { %3906 = vrot.lane.b32.xlu0 %v5177_v20, %s4004_s24  ;;  %3911 = vrot.lane.b32.xlu1 %v5181_v9, %s4004_s24 }
 0x51d   : > { %v2318_v30 = vpop.permute.xlu1 %2317  ;;  %2439 = vrot.lane.b32.xlu2 %v5129_v47, %s5932_s28  ;;  %v2316_v35 = vpop.permute.xlu0 %2315 }
 0x51e   : > { %v5190_v50 = vsel %vm2339_vm14, %v2318_v30, %v2320_v21  ;;  %v5193_v6 = vsel %vm2339_vm14, %v2316_v35, %v2318_v30 }
 0x51f   : > { %v2428_v63 = vpop.permute.xlu2 %2427 }
 0x523   : > { %2017 = vrot.lane.b32.xlu0 %v5046_v1, %s4002_s20  ;;  %2019 = vrot.lane.b32.xlu1 %v5043_v59, %s4002_s20 }
 0x525   : > { %v2426_v13 = vpop.permute.xlu1 %2425  ;;  %3901 = vrot.lane.b32.xlu2 %v3890_v34, %s5930_s25  ;;  %v2424_v31 = vpop.permute.xlu0 %2423 }
 0x526   : > { %v5201_v28 = vsel %vm5944_vm15, %v2426_v13, %v2428_v63  ;;  %v5204_v23 = vsel %vm5944_vm15, %v2424_v31, %v2426_v13 }
 0x527   : > { %v5206_v29 = vpop.permute.xlu2 %3856 }
 0x52b   : > { %2125 = vrot.lane.b32.xlu0 %v5046_v1, %s4006_s26  ;;  %2127 = vrot.lane.b32.xlu1 %v5043_v59, %s4006_s26 }
 0x52d   : > { %v3867_v3 = vpop.permute.xlu1 %3866  ;;  %2021 = vrot.lane.b32.xlu2 %v5173_v18, %s4002_s20  ;;  %v5214_v5 = vpop.permute.xlu0 %3861 }
 0x52e   : > { %v3869_v62 = vunpack.i.h.bf16 %v3867_v3  ;;  %v3868_v43 = vunpack.i.l.bf16 %v3867_v3  ;;  %v3864_v58 = vunpack.i.h.bf16 %v5214_v5 }
 0x52f   : > { %v2010_v45 = vpop.permute.xlu2 %2009 }
 0x530   : > { %v5221_v12 = vsel %vm1873_vm7, %v3864_v58, %v3868_v43  ;;  %v5226_v39 = vsel %vm1873_vm7, %v3869_v62, %v5940_v40 }
 0x533   : > { %2637 = vrot.lane.b32.xlu0 %v5075_v46, %s5934_s27  ;;  %2639 = vrot.lane.b32.xlu1 %v5064_v10, %s5934_s27 }
 0x535   : > { %v2008_v26 = vpop.permute.xlu1 %2007  ;;  %2129 = vrot.lane.b32.xlu2 %v5173_v18, %s4006_s26  ;;  %v2006_v54 = vpop.permute.xlu0 %2005 }
 0x536   : > { %v5235_v38 = vsel %vm5942_vm12, %v2008_v26, %v2010_v45  ;;  %v5238_v44 = vsel %vm5942_vm12, %v2006_v54, %v2008_v26  ;;  %v1769_v45 = vld [vmem:[%s5920_s12 + $0x8] sm:$0xff] }
 0x537   : > { %v2118_v52 = vpop.permute.xlu2 %2117 }
 0x53b   : > { %3916 = vrot.lane.b32.xlu0 %v5177_v20, %s5991_s23  ;;  %3921 = vrot.lane.b32.xlu1 %v5181_v9, %s5991_s23 }
 0x53d   : > { %v2116_v53 = vpop.permute.xlu1 %2115  ;;  %2647 = vrot.lane.b32.xlu2 %v5129_v47, %s5934_s27  ;;  %v2114_v60 = vpop.permute.xlu0 %2113 }
 0x53e   : > { %v5247_v16 = vsel %vm5941_vm13, %v2116_v53, %v2118_v52  ;;  %v5250_v27 = vsel %vm5941_vm13, %v2114_v60, %v2116_v53  ;;  %v1770_v52 = vld [vmem:[%s5921_s13] sm:$0xff] }
 0x53f   : > { %v2326_v14 = vpop.permute.xlu2 %2325  ;;  %v1836_v53 = vld [vmem:[%s5919_s11] sm:$0xff] }
 0x540   : > { %3644 = vmatmul.msk.f32.vlgmr.msrb.gmra.mxu2 %vm5992_vm5, %v1836_v53  ;;  %3650 = vmatmul.msk.f32.vlgmr.msrb.gmra.mxu3 %vm5993_vm6, %v1836_v53 }
 0x543   : > { %2333 = vrot.lane.b32.xlu0 %v5046_v1, %s5986_s19  ;;  %2335 = vrot.lane.b32.xlu1 %v5043_v59, %s5986_s19 }
 0x545   : > { %v3877_v61 = vpop.permute.xlu1 %3876  ;;  %2337 = vrot.lane.b32.xlu2 %v5173_v18, %s5986_s19  ;;  %v5258_v15 = vpop.permute.xlu0 %3871 }
 0x546   : > { %v3879_v36 = vunpack.i.h.bf16 %v3877_v61  ;;  %v3878_v10 = vunpack.i.l.bf16 %v3877_v61  ;;  %v5939_v46 = vunpack.i.h.bf16 %v5258_v15 }
 0x547   : > { %v2434_v11 = vpop.permute.xlu2 %2433 }
 0x548   : > { %v5265_v19 = vsel %vm2242_vm1, %v5939_v46, %v3878_v10  ;;  %v5270_v47 = vsel %vm2242_vm1, %v3879_v36, %v5938_v2  ;;  %v1837_v10 = vld [vmem:[%s5919_s11 + $0x8] sm:$0xff]  ;;  %v1996_v46 = vperm.slane %v4364_v17, 1 }
 0x549   : > { %3645 = vmatmul.msk.f32.gmra.mxu2 %vm5994_vm3, %v1837_v10  ;;  %3651 = vmatmul.msk.f32.gmra.mxu3 %vm5995_vm4, %v1837_v10  ;;  %vm6001_vm4 = vmmov %vm5994_vm3 }
 0x54a   : > { %vm5405_vm6 = vcmp.eq.s32.totalorder %v1996_v46, 1 }
 0x54b   : > { %2441 = vrot.lane.b32.xlu0 %v5046_v1, %s5932_s28  ;;  %2443 = vrot.lane.b32.xlu1 %v5043_v59, %s5932_s28 }
 0x54d   : > { %v2324_v34 = vpop.permute.xlu1 %2323  ;;  %2445 = vrot.lane.b32.xlu2 %v5173_v18, %s5932_s28  ;;  %v2322_v48 = vpop.permute.xlu0 %2321 }
 0x54e   : > { %v5279_v0 = vsel %vm2339_vm14, %v2324_v34, %v2326_v14  ;;  %v5282_v49 = vsel %vm2339_vm14, %v2322_v48, %v2324_v34 }
 0x54f   : > { %v5284_v55 = vpop.permute.xlu2 %3891 }
 0x553   : > { %3926 = vrot.lane.b32.xlu0 %v5177_v20, %s5930_s25  ;;  %3931 = vrot.lane.b32.xlu1 %v5181_v9, %s5930_s25  ;;  %v5936_v9 = vunpack.i.l.bf16 %v5206_v29 }
 0x555   : > { %v2432_v41 = vpop.permute.xlu1 %2431  ;;  %2641 = vrot.lane.b32.xlu2 %v5067_v37, %s5934_s27  ;;  %v2430_v25 = vpop.permute.xlu0 %2429 }
 0x556   : > { %v5293_v21 = vsel %vm5944_vm15, %v2432_v41, %v2434_v11  ;;  %v5296_v30 = vsel %vm5944_vm15, %v2430_v25, %v2432_v41 }
 0x557   : > { %v5298_v35 = vpop.permute.xlu2 %2015 }
 0x55b   : > { %2649 = vrot.lane.b32.xlu0 %v5046_v1, %s5934_s27  ;;  %2651 = vrot.lane.b32.xlu1 %v5043_v59, %s5934_s27 }
 0x55d   : > { %v3887_v20 = vpop.permute.xlu1 %3886  ;;  %2653 = vrot.lane.b32.xlu2 %v5173_v18, %s5934_s27  ;;  %v5306_v37 = vpop.permute.xlu0 %3881 }
 0x55e   : > { %v3889_v63 = vunpack.i.h.bf16 %v3887_v20  ;;  %v3888_v13 = vunpack.i.l.bf16 %v3887_v20  ;;  %v5937_v31 = vunpack.i.h.bf16 %v5306_v37 }
 0x55f   : > { %v5310_v3 = vpop.permute.xlu2 %2123 }
 0x560   : > { %v5315_v1 = vsel %vm2558_vm2, %v5937_v31, %v3888_v13  ;;  %v5320_v59 = vsel %vm2558_vm2, %v3889_v63, %v5936_v9  ;;  %v3894_v13 = vunpack.i.h.bf16 %v5284_v55  ;;  %v3863_v9 = vunpack.i.l.bf16 %v5214_v5 }
 0x563   : > { %2631 = vrot.lane.b32.xlu0 %v5006_v22, %s5934_s27  ;;  %2633 = vrot.lane.b32.xlu1 %v5003_v7, %s5934_s27  ;;  %v1768_v22 = vld [vmem:[%s5920_s12] sm:$0xff]  ;;  %v1771_v7 = vld [vmem:[%s5921_s13 + $0x8] sm:$0xff] }
 0x565   : > { %v5326_v18 = vpop.permute.xlu1 %2013  ;;  %2635 = vrot.lane.b32.xlu2 %v5000_v42, %s5934_s27  ;;  %v5330_v62 = vpop.permute.xlu0 %2011 }
 0x567   : > { %v5332_v43 = vpop.permute.xlu2 %3896 }
 0x56b   : > { %2746 = vperm.xlu0 %3812, %v1769_v45   ;;  %2741 = vperm.xlu1 %3813, %v1768_v22   ;;  %v3893_v45 = vunpack.i.l.bf16 %v5284_v55  ;;  %v3849_v55 = vunpack.i.h.bf16 %v5136_v51 }
 0x56d   : > { %v5343_v26 = vpop.permute.xlu1 %2121  ;;  %2760 = vperm.xlu2 %3814, %v1771_v7   ;;  %v5345_v42 = vpop.permute.xlu0 %2119 }
 0x56f   : > { %v5347_v54 = vpop.permute.xlu2 %2331 }
 0x573   : > { %2755 = vperm.xlu0 %3812, %v1770_v52  }
 0x575   : > { %v5357_v60 = vpop.permute.xlu1 %2329  ;;  %v2328_v14 = vpop.permute.xlu0 %2327 }
 0x576   : > { %v5361_v61 = vsel %vm2339_vm14, %v2328_v14, %v5357_v60 }
 0x577   : > { %v5363_v36 = vpop.permute.xlu2 %2439 }
 0x57d   : > { %v5370_v11 = vpop.permute.xlu1 %2437  ;;  %v2436_v34 = vpop.permute.xlu0 %2435 }
 0x57e   : > { %v5374_v48 = vsel %vm5944_vm15, %v2436_v34, %v5370_v11 }
 0x57f   : > { %v5376_v41 = vpop.permute.xlu2 %3901 }
 0x585   : > { %v5378_v25 = vpop.permute.xlu1 %2645  ;;  %v2644_v20 = vpop.permute.xlu0 %2643 }
 0x586   : > { %v5382_v63 = vsel %vm5943_vm11, %v2644_v20, %v5378_v25  ;;  %v1995_v20 = vperm.slane %v4364_v17, 0  ;;  %v3634_v17 = vld [vmem:[%s5919_s11 + $0x10] sm:$0xff] }
 0x587   : > { %v2022_v52 = vpop.permute.xlu2 %2021 }
 0x588   : > { %vm5397_vm5 = vcmp.eq.s32.totalorder %v1995_v20, 1  ;;  %v3899_v20 = vunpack.i.h.bf16 %v5332_v43 }
 0x58d   : > { %v3912_v22 = vpop.permute.xlu1 %3911  ;;  %v3907_v7 = vpop.permute.xlu0 %3906 }
 0x58e   : > { %v3914_v53 = vunpack.i.h.bf16 %v3912_v22  ;;  %v3913_v14 = vunpack.i.l.bf16 %v3912_v22  ;;  %v3909_v10 = vunpack.i.h.bf16 %v3907_v7  ;;  %v3908_v34 = vunpack.i.l.bf16 %v3907_v7 }
 0x58f   : > { %v1879_v22 = vsel %vm1873_vm7, %v3893_v45, %v3894_v13  ;;  %v1876_v7 = vsel %vm1873_vm7, %v3863_v9, %v3864_v58  ;;  %v6000_v9 = vunpack.i.l.bf16 %v5136_v51  ;;  %v2029_v51 = vsel %vm5942_vm12, %v5326_v18, %v5298_v35 }
 0x590   : > { %v1880_v31 = vsel %vm1873_vm7, %v3908_v34, %v3909_v10  ;;  %v1881_v2 = vsel %vm1873_vm7, %v3909_v10, %v3913_v14  ;;  %v1878_v40 = vsel %vm1873_vm7, %v3914_v53, %v3893_v45  ;;  %v3653_v34 = vld [vmem:[%s5919_s11 + $0x28] sm:$0xff] }
 0x591   : > { %1908 = vmatpush.msrb.mxu0 %v1880_v31  ;;  %1931 = vmatpush.msrb.mxu1 %v1881_v2  ;;  %v1875_v13 = vsel %vm1873_vm7, %v6000_v9, %v3849_v55  ;;  %v3898_v55 = vunpack.i.l.bf16 %v5332_v43 }
 0x593   : > { %1909 = vmatpush.msrb.mxu0 %v1878_v40  ;;  %1932 = vmatpush.msrb.mxu1 %v1879_v22 }
 0x595   : > { %v2020_v31 = vpop.permute.xlu1 %2019  ;;  %v2018_v2 = vpop.permute.xlu0 %2017  ;;  %1910 = vmatpush.msrb.mxu0 %v1876_v7  ;;  %1933 = vmatpush.msrb.mxu1 %v5221_v12 }
 0x596   : > { %v2031_v5 = vsel %vm5942_vm12, %v2020_v31, %v2022_v52  ;;  %v2030_v58 = vsel %vm5942_vm12, %v2018_v2, %v2020_v31  ;;  %v2130_v12 = vpop.permute.xlu2 %2129  ;;  %v3873_v2 = vunpack.i.l.bf16 %v5258_v15 }
 0x597   : > { %1911 = vmatpush.msrb.mxu0 %v5226_v39  ;;  %1934 = vmatpush.msrb.mxu1 %v1875_v13  ;;  %v2028_v39 = vsel %vm5942_vm12, %v5330_v62, %v5326_v18  ;;  %v3635_v62 = vld [vmem:[%s5919_s11 + $0x18] sm:$0xff]  ;;  %vm6005_vm12 = vmmov %vm5994_vm3  ;;  %v6009_v13 = vunpack.i.h.bf16 %v5258_v15  ;;  %v2345_v15 = vsel %vm2339_vm14, %v5357_v60, %v5347_v54 }
 0x598   : > { %3636 = vmatmul.msk.f32.vlgmr.msrb.gmra.mxu0 %vm5994_vm3, %v3634_v17  ;;  %3638 = vmatmul.msk.f32.vlgmr.msrb.gmra.mxu1 %vm6001_vm4, %v3634_v17  ;;  %vm6002_vm4 = vmmov %vm5994_vm3  ;;  %v3854_v17 = vunpack.i.h.bf16 %v5158_v32 }
 0x599   : > { %3654 = vmatpush.msk.msra.mxu0 %vm5397_vm5, %v2030_v58  ;;  %3660 = vmatpush.msk.msra.mxu1 %vm5405_vm6, %v2031_v5  ;;  %v2248_v5 = vsel %vm2242_vm1, %v3898_v55, %v3899_v20  ;;  %v3701_v20 = vld [vmem:[%s5919_s11 + $0x68] sm:$0xff] }
 0x59b   : > { %3655 = vmatpush.msk.msra.mxu0 %vm5397_vm5, %v2028_v39  ;;  %3661 = vmatpush.msk.msra.mxu1 %vm5405_vm6, %v2029_v51 }
 0x59d   : > { %3656 = vmatpush.msk.msra.mxu0 %vm5397_vm5, %v5238_v44  ;;  %3662 = vmatpush.msk.msra.mxu1 %vm5405_vm6, %v5235_v38  ;;  %v2128_v46 = vpop.permute.xlu1 %2127  ;;  %v2126_v35 = vpop.permute.xlu0 %2125  ;;  %v2137_v38 = vsel %vm5941_vm13, %v5343_v26, %v5310_v3  ;;  %v2136_v44 = vsel %vm5941_vm13, %v5345_v42, %v5343_v26 }
 0x59e   : > { %v2139_v45 = vsel %vm5941_vm13, %v2128_v46, %v2130_v12  ;;  %v2138_v18 = vsel %vm5941_vm13, %v2126_v35, %v2128_v46  ;;  %vm6004_vm13 = vmmov %vm5994_vm3  ;;  %v2245_v12 = vsel %vm2242_vm1, %v3873_v2, %v6009_v13  ;;  %v3680_v35 = vld [vmem:[%s5919_s11 + $0x40] sm:$0xff]  ;;  %v3721_v2 = vld [vmem:[%s5919_s11 + $0x88] sm:$0xff] }
 0x59f   : > { %3657 = vmatpush.msk.msra.mxu0 %vm5397_vm5, %v5156_v24  ;;  %3663 = vmatpush.msk.msra.mxu1 %vm5405_vm6, %v5153_v8  ;;  %v5460_v24 = vpop.permute.xlu2 %2647  ;;  %v3666_v8 = vld [vmem:[%s5919_s11 + $0x30] sm:$0xff] }
 0x5a0   : > { %3668 = vmatpush.msk.msra.mxu2 %vm5031_vm9, %v2138_v18  ;;  %3674 = vmatpush.msk.msra.mxu3 %vm5035_vm10, %v2139_v45  ;;  %v6010_v45 = vunpack.i.l.bf16 %v5158_v32  ;;  %v3686_v32 = vld [vmem:[%s5919_s11 + $0x50] sm:$0xff] }
 0x5a1   : > { %3637 = vmatmul.msk.f32.gmra.mxu0 %vm5994_vm3, %v3635_v62  ;;  %3639 = vmatmul.msk.f32.gmra.mxu1 %vm6002_vm4, %v3635_v62  ;;  %vm6003_vm4 = vmmov %vm5994_vm3 }
 0x5a2   : > { %3669 = vmatpush.msk.msra.mxu2 %vm5031_vm9, %v2136_v44  ;;  %3675 = vmatpush.msk.msra.mxu3 %vm5035_vm10, %v2137_v38  ;;  %v2244_v18 = vsel %vm2242_vm1, %v6010_v45, %v3854_v17  ;;  %v3903_v38 = vunpack.i.l.bf16 %v5376_v41 }
 0x5a4   : > { %3670 = vmatpush.msk.msra.mxu2 %vm5031_vm9, %v5250_v27  ;;  %3676 = vmatpush.msk.msra.mxu3 %vm5035_vm10, %v5247_v16  ;;  %v3652_v16 = vld [vmem:[%s5919_s11 + $0x20] sm:$0xff] }
 0x5a5   : > { %v5475_v3 = vpop.permute.xlu1 %2639  ;;  %v5477_v26 = vpop.permute.xlu0 %2637 }
 0x5a6   : > { %3671 = vmatpush.msk.msra.mxu2 %vm5031_vm9, %v5169_v57  ;;  %3677 = vmatpush.msk.msra.mxu3 %vm5035_vm10, %v5166_v56  ;;  %v3667_v57 = vld [vmem:[%s5919_s11 + $0x38] sm:$0xff] }
 0x5a7   : > { %3672 = vmatmul.msk.f32.vlgmr.msra.gmra.mxu2 %vm5994_vm3, %v3666_v8  ;;  %3678 = vmatmul.msk.f32.vlgmr.msra.gmra.mxu3 %vm6003_vm4, %v3666_v8  ;;  %v2338_v27 = vpop.permute.xlu2 %2337  ;;  %vm6008_vm4 = vmmov %vm5994_vm3 }
 0x5a9   : > { %3658 = vmatmul.msk.f32.vlgmr.msra.gmra.mxu0 %vm6004_vm13, %v3652_v16  ;;  %3664 = vmatmul.msk.f32.vlgmr.msra.gmra.mxu1 %vm6005_vm12, %v3652_v16  ;;  %vm6006_vm12 = vmmov %vm5994_vm3  ;;  %v3883_v16 = vunpack.i.l.bf16 %v5306_v37 }
 0x5aa   : > { %vm6007_vm13 = vmmov %vm5994_vm3 }
 0x5ad   : > { %v3922_v42 = vpop.permute.xlu1 %3921  ;;  %v3917_v52 = vpop.permute.xlu0 %3916 }
 0x5ae   : > { %v3923_v56 = vunpack.i.l.bf16 %v3922_v42  ;;  %v3919_v53 = vunpack.i.h.bf16 %v3917_v52  ;;  %v3918_v10 = vunpack.i.l.bf16 %v3917_v52  ;;  %v3924_v22 = vunpack.i.h.bf16 %v3922_v42 }
 0x5af   : > { %3673 = vmatmul.msk.f32.gmra.mxu2 %vm6006_vm12, %v3667_v57  ;;  %3679 = vmatmul.msk.f32.gmra.mxu3 %vm6007_vm13, %v3667_v57  ;;  %v2446_v51 = vpop.permute.xlu2 %2445  ;;  %vm6011_vm12 = vmmov %vm5994_vm3 }
 0x5b0   : > { %v2249_v7 = vsel %vm2242_vm1, %v3918_v10, %v3919_v53  ;;  %v2250_v31 = vsel %vm2242_vm1, %v3919_v53, %v3923_v56  ;;  %v2247_v43 = vsel %vm2242_vm1, %v3924_v22, %v3898_v55  ;;  %vm6012_vm13 = vmmov %vm5994_vm3  ;;  %v6019_v56 = vunpack.i.h.bf16 %v5306_v37  ;;  %v3714_v37 = vld [vmem:[%s5919_s11 + $0x70] sm:$0xff] }
 0x5b1   : > { %3659 = vmatmul.msk.f32.gmra.mxu0 %vm5994_vm3, %v3653_v34  ;;  %3665 = vmatmul.msk.f32.gmra.mxu1 %vm6008_vm4, %v3653_v34  ;;  %vm6013_vm4 = vmmov %vm5994_vm3  ;;  %v6020_v55 = vunpack.i.l.bf16 %v5206_v29 }
 0x5b2   : > { %2277 = vmatpush.msrb.mxu0 %v2249_v7  ;;  %2300 = vmatpush.msrb.mxu1 %v2250_v31  ;;  %v2561_v53 = vsel %vm2558_vm2, %v3883_v16, %v6019_v56 }
 0x5b4   : > { %2278 = vmatpush.msrb.mxu0 %v2247_v43  ;;  %2301 = vmatpush.msrb.mxu1 %v2248_v5 }
 0x5b5   : > { %v2336_v58 = vpop.permute.xlu1 %2335  ;;  %v2334_v9 = vpop.permute.xlu0 %2333 }
 0x5b6   : > { %v2347_v39 = vsel %vm2339_vm14, %v2336_v58, %v2338_v27  ;;  %v2346_v46 = vsel %vm2339_vm14, %v2334_v9, %v2336_v58  ;;  %2279 = vmatpush.msrb.mxu0 %v2245_v12  ;;  %2302 = vmatpush.msrb.mxu1 %v5265_v19 }
 0x5b7   : > { %3688 = vmatpush.msk.msrb.mxu2 %vm5397_vm5, %v2346_v46  ;;  %3694 = vmatpush.msk.msrb.mxu3 %vm5405_vm6, %v2347_v39  ;;  %v2642_v60 = vpop.permute.xlu2 %2641 }
 0x5b8   : > { %2280 = vmatpush.msrb.mxu0 %v5270_v47  ;;  %2303 = vmatpush.msrb.mxu1 %v2244_v18 }
 0x5b9   : > { %3682 = vmatmul.msk.f32.vlgmr.msrb.gmra.mxu0 %vm6011_vm12, %v3680_v35  ;;  %3684 = vmatmul.msk.f32.vlgmr.msrb.gmra.mxu1 %vm6012_vm13, %v3680_v35  ;;  %vm6014_vm12 = vmmov %vm5994_vm3 }
 0x5ba   : > { %3689 = vmatpush.msk.msrb.mxu2 %vm5397_vm5, %v5361_v61  ;;  %3695 = vmatpush.msk.msrb.mxu3 %vm5405_vm6, %v2345_v15  ;;  %vm6015_vm13 = vmmov %vm5994_vm3 }
 0x5bc   : > { %3690 = vmatpush.msk.msrb.mxu2 %vm5397_vm5, %v5282_v49  ;;  %3696 = vmatpush.msk.msrb.mxu3 %vm5405_vm6, %v5279_v0  ;;  %v3681_v0 = vld [vmem:[%s5919_s11 + $0x48] sm:$0xff] }
 0x5bd   : > { %v2444_v19 = vpop.permute.xlu1 %2443  ;;  %v2442_v47 = vpop.permute.xlu0 %2441 }
 0x5be   : > { %v2455_v54 = vsel %vm5944_vm15, %v2444_v19, %v2446_v51  ;;  %3691 = vmatpush.msk.msrb.mxu2 %vm5397_vm5, %v5193_v6  ;;  %3697 = vmatpush.msk.msrb.mxu3 %vm5405_vm6, %v5190_v50  ;;  %v2454_v49 = vsel %vm5944_vm15, %v2442_v47, %v2444_v19  ;;  %v2453_v50 = vsel %vm5944_vm15, %v5370_v11, %v5363_v36  ;;  %v3687_v6 = vld [vmem:[%s5919_s11 + $0x58] sm:$0xff]  ;;  %vm6028_vm15 = vmmov %vm5994_vm3 }
 0x5bf   : > { %3692 = vmatmul.msk.f32.vlgmr.msrb.gmra.mxu2 %vm5994_vm3, %v3686_v32  ;;  %3698 = vmatmul.msk.f32.vlgmr.msrb.gmra.mxu3 %vm6013_vm4, %v3686_v32  ;;  %vm6016_vm4 = vmmov %vm5994_vm3 }
 0x5c0   : > { %3702 = vmatpush.msk.msra.mxu0 %vm5031_vm9, %v2454_v49  ;;  %3708 = vmatpush.msk.msra.mxu1 %vm5035_vm10, %v2455_v54 }
 0x5c1   : > { %3683 = vmatmul.msk.f32.gmra.mxu0 %vm6014_vm12, %v3681_v0  ;;  %3685 = vmatmul.msk.f32.gmra.mxu1 %vm6015_vm13, %v3681_v0  ;;  %vm6017_vm12 = vmmov %vm5994_vm3 }
 0x5c2   : > { %3703 = vmatpush.msk.msra.mxu0 %vm5031_vm9, %v5374_v48  ;;  %3709 = vmatpush.msk.msra.mxu1 %vm5035_vm10, %v2453_v50  ;;  %vm6018_vm13 = vmmov %vm5994_vm3 }
 0x5c3   : > { %v1965_v9 = vpop.f32.mrf.mxu2  ;;  %v1988_v13 = vpop.f32.mrf.mxu3 }
 0x5c4   : > { %3704 = vmatpush.msk.msra.mxu0 %vm5031_vm9, %v5296_v30  ;;  %3710 = vmatpush.msk.msra.mxu1 %vm5035_vm10, %v5293_v21  ;;  %v3700_v21 = vld [vmem:[%s5919_s11 + $0x60] sm:$0xff]  ;;  %v3904_v30 = vunpack.i.h.bf16 %v5376_v41  ;;  %v3859_v41 = vunpack.i.h.bf16 %v5206_v29  ;;  %v2661_v29 = vsel %vm5943_vm11, %v5378_v25, %v5460_v24 }
 0x5c5   : > { %v3932_v61 = vpop.permute.xlu1 %3931  ;;  %v3927_v36 = vpop.permute.xlu0 %3926 }
 0x5c6   : > { %v3933_v11 = vunpack.i.l.bf16 %v3932_v61  ;;  %v3929_v62 = vunpack.i.h.bf16 %v3927_v36  ;;  %v3928_v48 = vunpack.i.l.bf16 %v3927_v36  ;;  %3705 = vmatpush.msk.msra.mxu0 %vm5031_vm9, %v5204_v23  ;;  %3711 = vmatpush.msk.msra.mxu1 %vm5035_vm10, %v5201_v28  ;;  %v3934_v44 = vunpack.i.h.bf16 %v3932_v61  ;;  %v2654_v28 = vpop.permute.xlu2 %2653 }
 0x5c7   : > { %3693 = vmatmul.msk.f32.gmra.mxu2 %vm5994_vm3, %v3687_v6  ;;  %3699 = vmatmul.msk.f32.gmra.mxu3 %vm6016_vm4, %v3687_v6  ;;  %v2564_v57 = vsel %vm2558_vm2, %v3903_v38, %v3904_v30  ;;  %v2560_v22 = vsel %vm2558_vm2, %v6020_v55, %v3859_v41  ;;  %vm6021_vm4 = vmmov %vm5994_vm3 }
 0x5c8   : > { %v2565_v8 = vsel %vm2558_vm2, %v3928_v48, %v3929_v62  ;;  %v2566_v23 = vsel %vm2558_vm2, %v3929_v62, %v3933_v11  ;;  %v2563_v27 = vsel %vm2558_vm2, %v3934_v44, %v3903_v38 }
 0x5c9   : > { %3706 = vmatmul.msk.f32.vlgmr.msra.gmra.mxu0 %vm6017_vm12, %v3700_v21  ;;  %3712 = vmatmul.msk.f32.vlgmr.msra.gmra.mxu1 %vm6018_vm13, %v3700_v21  ;;  %vm6022_vm12 = vmmov %vm5994_vm3 }
 0x5ca   : > { %2593 = vmatpush.msra.mxu2 %v2565_v8  ;;  %2616 = vmatpush.msra.mxu3 %v2566_v23  ;;  %vm6023_vm13 = vmmov %vm5994_vm3 }
 0x5cc   : > { %2594 = vmatpush.msra.mxu2 %v2563_v27  ;;  %2617 = vmatpush.msra.mxu3 %v2564_v57  ;;  %v1968_v39 = vpop.f32.mrf.mxu2  ;;  %v1991_v46 = vpop.f32.mrf.mxu3 }
 0x5cd   : > { %v2652_v42 = vpop.permute.xlu1 %2651  ;;  %v2650_v52 = vpop.permute.xlu0 %2649 }
 0x5ce   : > { %v2663_v10 = vsel %vm5943_vm11, %v2652_v42, %v2654_v28  ;;  %v2662_v34 = vsel %vm5943_vm11, %v2650_v52, %v2652_v42  ;;  %2595 = vmatpush.msra.mxu2 %v2561_v53  ;;  %2618 = vmatpush.msra.mxu3 %v5315_v1  ;;  %v2658_v1 = vsel %vm5943_vm11, %v5477_v26, %v5475_v3  ;;  %v2636_v7 = vpop.permute.xlu2 %2635  ;;  %v3720_v26 = vld [vmem:[%s5919_s11 + $0x80] sm:$0xff] }
 0x5cf   : > { %3722 = vmatpush.msk.msrb.mxu0 %vm5397_vm5, %v2662_v34  ;;  %3728 = vmatpush.msk.msrb.mxu1 %vm5405_vm6, %v2663_v10 }
 0x5d0   : > { %2596 = vmatpush.msra.mxu2 %v5320_v59  ;;  %2619 = vmatpush.msra.mxu3 %v2560_v22  ;;  %v2659_v59 = vsel %vm5943_vm11, %v5475_v3, %v2642_v60  ;;  %v3715_v3 = vld [vmem:[%s5919_s11 + $0x78] sm:$0xff] }
 0x5d1   : > { %3707 = vmatmul.msk.f32.gmra.mxu0 %vm5994_vm3, %v3701_v20  ;;  %3713 = vmatmul.msk.f32.gmra.mxu1 %vm6021_vm4, %v3701_v20  ;;  %vm6024_vm4 = vmmov %vm5994_vm3 }
 0x5d2   : > { %3716 = vmatmul.msk.f32.vlgmr.msra.gmra.mxu2 %vm6022_vm12, %v3714_v37  ;;  %3718 = vmatmul.msk.f32.vlgmr.msra.gmra.mxu3 %vm6023_vm13, %v3714_v37  ;;  %vm6025_vm12 = vmmov %vm5994_vm3 }
 0x5d3   : > { %3723 = vmatpush.msk.msrb.mxu0 %vm5397_vm5, %v5382_v63  ;;  %3729 = vmatpush.msk.msrb.mxu1 %vm5405_vm6, %v2661_v29  ;;  %vm6026_vm13 = vmmov %vm5994_vm3 }
 0x5d5   : > { %3724 = vmatpush.msk.msrb.mxu0 %vm5397_vm5, %v2658_v1  ;;  %3730 = vmatpush.msk.msrb.mxu1 %vm5405_vm6, %v2659_v59  ;;  %v2634_v25 = vpop.permute.xlu1 %2633  ;;  %v2632_v24 = vpop.permute.xlu0 %2631 }
 0x5d6   : > { %v2657_v63 = vsel %vm5943_vm11, %v2634_v25, %v2636_v7  ;;  %v2656_v31 = vsel %vm5943_vm11, %v2632_v24, %v2634_v25  ;;  %vm6027_vm11 = vmmov %vm5994_vm3 }
 0x5d7   : > { %3725 = vmatpush.msk.msrb.mxu0 %vm5397_vm5, %v2656_v31  ;;  %3731 = vmatpush.msk.msrb.mxu1 %vm5405_vm6, %v2657_v63 }
 0x5d9   : > { %3726 = vmatmul.msk.f32.vlgmr.msrb.gmra.mxu0 %vm5994_vm3, %v3720_v26  ;;  %3732 = vmatmul.msk.f32.vlgmr.msrb.gmra.mxu1 %vm6024_vm4, %v3720_v26 }
 0x5da   : > { %3717 = vmatmul.msk.f32.gmra.mxu2 %vm6025_vm12, %v3715_v3  ;;  %3719 = vmatmul.msk.f32.gmra.mxu3 %vm6026_vm13, %v3715_v3 }
 0x5dd   : > { %v2747_v41 = vpop.permute.xlu0 %2746  ;;  %v2742_v26 = vpop.permute.xlu1 %2741 }
 0x5e1   : > { %3727 = vmatmul.msk.f32.gmra.mxu0 %vm6027_vm11, %v3721_v2  ;;  %3733 = vmatmul.msk.f32.gmra.mxu1 %vm6028_vm15, %v3721_v2 }
 0x615   : > { %v1913_v17 = vpop.f32.mrf.mxu0  ;;  %v1936_v43 = vpop.f32.mrf.mxu1 }
 0x616   : > { %v1966_v36 = vadd.f32 %v1965_v9, %v1913_v17  ;;  %v1989_v11 = vadd.f32 %v1988_v13, %v1936_v43 }
 0x61e   : > { %v1916_v5 = vpop.f32.mrf.mxu0  ;;  %v1939_v58 = vpop.f32.mrf.mxu1 }
 0x61f   : > { %v1969_v27 = vadd.f32 %v1968_v39, %v1916_v5  ;;  %v1992_v57 = vadd.f32 %v1991_v46, %v1939_v58  ;;  %v2756_v5 = vpop.permute.xlu0 %2755 }
 0x626   : > { %v2074_v12 = vpop.f32.mrf.mxu0  ;;  %v2097_v51 = vpop.f32.mrf.mxu1 }
 0x627   : > { %v2103_v62 = vadd.f32 %v2074_v12, %v1966_v36  ;;  %v2104_v48 = vadd.f32 %v2097_v51, %v1989_v11 }
 0x62a   : > { %v2182_v18 = vpop.f32.mrf.mxu2  ;;  %v2205_v15 = vpop.f32.mrf.mxu3 }
 0x62b   : > { %v2211_v38 = vadd.f32 %v2182_v18, %v2103_v62  ;;  %v2212_v44 = vadd.f32 %v2205_v15, %v2104_v48 }
 0x62e   : > { %v2077_v35 = vpop.f32.mrf.mxu0  ;;  %v2100_v45 = vpop.f32.mrf.mxu1 }
 0x62f   : > { %v2105_v56 = vadd.f32 %v2077_v35, %v1969_v27  ;;  %v2106_v53 = vadd.f32 %v2100_v45, %v1992_v57 }
 0x632   : > { %v2185_v47 = vpop.f32.mrf.mxu2  ;;  %v2208_v54 = vpop.f32.mrf.mxu3 }
 0x633   : > { %v2213_v22 = vadd.f32 %v2185_v47, %v2105_v56  ;;  %v2214_v37 = vadd.f32 %v2208_v54, %v2106_v53 }
 0x636   : > { %v2282_v32 = vpop.f32.mrf.mxu0  ;;  %v2305_v19 = vpop.f32.mrf.mxu1 }
 0x637   : > { %v2311_v16 = vadd.f32 %v2282_v32, %v2211_v38  ;;  %v2312_v28 = vadd.f32 %v2305_v19, %v2212_v44 }
 0x63e   : > { %v2285_v49 = vpop.f32.mrf.mxu0  ;;  %v2308_v0 = vpop.f32.mrf.mxu1 }
 0x63f   : > { %v2313_v25 = vadd.f32 %v2285_v49, %v2213_v22  ;;  %v2314_v24 = vadd.f32 %v2308_v0, %v2214_v37 }
 0x642   : > { %v2390_v60 = vpop.f32.mrf.mxu2  ;;  %v2413_v50 = vpop.f32.mrf.mxu3 }
 0x643   : > { %v2419_v42 = vadd.f32 %v2390_v60, %v2311_v16  ;;  %v2420_v52 = vadd.f32 %v2413_v50, %v2312_v28  ;;  %v2761_v50 = vpop.permute.xlu2 %2760 }
 0x646   : > { %v2498_v6 = vpop.f32.mrf.mxu0  ;;  %v2521_v61 = vpop.f32.mrf.mxu1 }
 0x647   : > { %v2527_v10 = vadd.f32 %v2498_v6, %v2419_v42  ;;  %v2528_v34 = vadd.f32 %v2521_v61, %v2420_v52 }
 0x64a   : > { %v2393_v21 = vpop.f32.mrf.mxu2  ;;  %v2416_v30 = vpop.f32.mrf.mxu3 }
 0x64b   : > { %v2421_v3 = vadd.f32 %v2393_v21, %v2313_v25  ;;  %v2422_v2 = vadd.f32 %v2416_v30, %v2314_v24 }
 0x64e   : > { %v2501_v8 = vpop.f32.mrf.mxu0  ;;  %v2524_v23 = vpop.f32.mrf.mxu1 }
 0x64f   : > { %v2529_v58 = vadd.f32 %v2501_v8, %v2421_v3  ;;  %v2530_v9 = vadd.f32 %v2524_v23, %v2422_v2  ;;  %v3734_v3 = vld [vmem:[%s5922_s14 + $0x4] sm:$0x7] }
 0x655   : > { %v2598_v20 = vpop.f32.mrf.mxu2  ;;  %v2621_v55 = vpop.f32.mrf.mxu3 }
 0x656   : > { %v2627_v29 = vadd.f32 %v2598_v20, %v2527_v10  ;;  %v2628_v1 = vadd.f32 %v2621_v55, %v2528_v34  ;;  %v2706_v59 = vpop.f32.mrf.mxu0  ;;  %v2729_v7 = vpop.f32.mrf.mxu1  ;;  %v2779_v10 = vld [vmem:[%s5923_s15] sm:$0x7] }
 0x658   : > { %v2735_v63 = vadd.f32 %v2706_v59, %v2627_v29  ;;  %v2736_v31 = vadd.f32 %v2729_v7, %v2628_v1 }
 0x65a   : > { %v2749_v17 = vmul.f32 %v2742_v26, %v2735_v63  ;;  %v2750_v43 = vmul.f32 %v2742_v26, %v2736_v31 }
 0x65c   : > { %v2763_v13 = vadd.f32 %v2756_v5, %v2749_v17  ;;  %v2764_v12 = vadd.f32 %v2756_v5, %v2750_v43  ;;  %v2808_v5 = vld [vmem:[%s5922_s14] sm:$0x7] }
 0x65d   : > { %v2601_v51 = vpop.f32.mrf.mxu2  ;;  %v2624_v39 = vpop.f32.mrf.mxu3 }
 0x65e   : > { %v2629_v46 = vadd.f32 %v2601_v51, %v2529_v58  ;;  %v2630_v35 = vadd.f32 %v2624_v39, %v2530_v9  ;;  %v2709_v45 = vpop.f32.mrf.mxu0  ;;  %v2732_v18 = vpop.f32.mrf.mxu1  ;;  %vm2768_vm15 = vcmp.gt.f32.partialorder %v2764_v12, 0.0  ;;  %v2772_v15 = vmul.f32 0.2, %v2764_v12 }
 0x65f   : > { %vm2767_vm11 = vcmp.gt.f32.partialorder %v2763_v13, 0.0  ;;  %v2771_v32 = vmul.f32 0.2, %v2763_v13 }
 0x660   : > { %v2737_v19 = vadd.f32 %v2709_v45, %v2629_v46  ;;  %v2738_v47 = vadd.f32 %v2732_v18, %v2630_v35  ;;  %v2776_v54 = vsel %vm2768_vm15, %v2764_v12, %v2772_v15  ;;  %v3743_v35 = vld [vmem:[%s5922_s14 + $0x8] sm:$0x7] }
 0x661   : > { %2786 = vrot.lane.b32.xlu1 %v2776_v54, %s4010_s17  ;;  %v2775_v49 = vsel %vm2767_vm11, %v2763_v13, %v2771_v32  ;;  %vm6036_vm11 = vcmask 916480  }
 0x662   : > { %v2751_v0 = vmul.f32 %v2747_v41, %v2737_v19  ;;  %v2752_v60 = vmul.f32 %v2747_v41, %v2738_v47  ;;  %2784 = vrot.lane.b32.xlu0 %v2775_v49, %s4010_s17 }
 0x664   : > { %v2765_v6 = vadd.f32 %v2761_v50, %v2751_v0  ;;  %v2766_v61 = vadd.f32 %v2761_v50, %v2752_v60 }
 0x666   : > { %vm2770_vm3 = vcmp.gt.f32.partialorder %v2766_v61, 0.0  ;;  %v2774_v36 = vmul.f32 0.2, %v2766_v61  ;;  %vm2769_vm4 = vcmp.gt.f32.partialorder %v2765_v6, 0.0  ;;  %v2773_v11 = vmul.f32 0.2, %v2765_v6 }
 0x668   : > { %v2778_v62 = vsel %vm2770_vm3, %v2766_v61, %v2774_v36  ;;  %v2777_v48 = vsel %vm2769_vm4, %v2765_v6, %v2773_v11 }
 0x669   : > { %2790 = vrot.lane.b32.xlu2 %v2778_v62, %s4010_s17  ;;  %2788 = vrot.lane.b32.xlu1 %v2777_v48, %s4010_s17  ;;  %s6029_s17 = smov 96  }
 0x6c3   : > { %v2791_v28 = vpop.permute.xlu2 %2790 }
 0x6c4   : > { %v2803_v27 = vsel %vm1796_vm8, %v2791_v28, 0.0 }
 0x6d3   : > { %v2787_v21 = vpop.permute.xlu1 %2786 }
 0x6d4   : > { %v2802_v30 = vsel %vm1796_vm8, %v2787_v21, 0.0  ;;  %v2785_v38 = vpop.permute.xlu0 %2784 }
 0x6d5   : > { %v5671_v44 = vsel %vm1796_vm8, %v2785_v38, %v2787_v21  ;;  %2925 = vrot.lane.b32.xlu1 %v2802_v30, %s4002_s20  ;;  %v5682_v23 = vsel %vm1796_vm8, 0.0, %v2785_v38  ;;  %v3757_v38 = vld [vmem:[%s5922_s14 + $0x10] sm:$0x7] }
 0x6d6   : > { %v3940_v8 = vpack.i.bf16 %v2802_v30, %v5671_v44 }
 0x6d8   : > { %3941 = vrot.lane.b32.xlu2 %v3940_v8, %s5991_s23  ;;  %3936 = vrot.lane.b32.xlu0 %v3940_v8, %s4004_s24 }
 0x6db   : > { %v2789_v16 = vpop.permute.xlu1 %2788 }
 0x6dc   : > { %v2793_v41 = vsel %vm1796_vm8, %v2789_v16, %v2791_v28  ;;  %v5704_v42 = vsel %vm1796_vm8, 0.0, %v2789_v16  ;;  %vm6032_vm8 = vcmask 1031168   ;;  %v3750_v16 = vld [vmem:[%s5922_s14 + $0xc] sm:$0x7] }
 0x6dd   : > { %2996 = vrot.lane.b32.xlu1 %v2802_v30, %s4006_s26  ;;  %v3950_v57 = vpack.i.bf16 %v2803_v27, %v2793_v41  ;;  %v3955_v52 = vpack.i.bf16 %v5682_v23, %v5704_v42  ;;  %vm6033_vm12 = vmmov %vm6032_vm8 }
 0x6de   : > { %vm6034_vm13 = vmmov %vm6032_vm8 }
 0x6df   : > { %vm6035_vm15 = vmmov %vm6032_vm8 }
 0x6e0   : > { %3134 = vrot.lane.b32.xlu2 %v2802_v30, %s5986_s19  ;;  %2923 = vrot.lane.b32.xlu0 %v5671_v44, %s4002_s20 }
 0x6e5   : > { %2992 = vrot.lane.b32.xlu1 %v5682_v23, %s4006_s26 }
 0x6e8   : > { %3203 = vrot.lane.b32.xlu2 %v5671_v44, %s6029_s17  ;;  %2994 = vrot.lane.b32.xlu0 %v5671_v44, %s4006_s26 }
 0x6ed   : > { %3132 = vrot.lane.b32.xlu1 %v5671_v44, %s5986_s19 }
 0x6f0   : > { %3946 = vrot.lane.b32.xlu2 %v3940_v8, %s6030_s18  ;;  %2921 = vrot.lane.b32.xlu0 %v5682_v23, %s4002_s20 }
 0x6f5   : > { %3130 = vrot.lane.b32.xlu1 %v5682_v23, %s5986_s19 }
 0x6f8   : > { %3205 = vrot.lane.b32.xlu0 %v2802_v30, %s6029_s17  ;;  %3951 = vrot.lane.b32.xlu2 %v3950_v57, %s4004_s24 }
 0x6fd   : > { %3201 = vrot.lane.b32.xlu1 %v5682_v23, %s6029_s17 }
 0x700   : > { %2931 = vrot.lane.b32.xlu0 %v2803_v27, %s4002_s20  ;;  %2929 = vrot.lane.b32.xlu2 %v2793_v41, %s4002_s20 }
 0x705   : > { %3956 = vrot.lane.b32.xlu1 %v3955_v52, %s4004_s24 }
 0x708   : > { %3138 = vrot.lane.b32.xlu0 %v2793_v41, %s5986_s19  ;;  %3002 = vrot.lane.b32.xlu2 %v2803_v27, %s4006_s26 }
 0x70d   : > { %3000 = vrot.lane.b32.xlu1 %v2793_v41, %s4006_s26 }
 0x710   : > { %3966 = vrot.lane.b32.xlu0 %v3955_v52, %s5991_s23  ;;  %2927 = vrot.lane.b32.xlu2 %v5704_v42, %s4002_s20  ;;  %s6031_s20 = smov 94  }
 0x715   : > { %3140 = vrot.lane.b32.xlu1 %v2803_v27, %s5986_s19 }
 0x718   : > { %3136 = vrot.lane.b32.xlu0 %v5704_v42, %s5986_s19  ;;  %2998 = vrot.lane.b32.xlu2 %v5704_v42, %s4006_s26 }
 0x71d   : > { %3971 = vrot.lane.b32.xlu1 %v3950_v57, %s6030_s18 }
 0x720   : > { %3211 = vrot.lane.b32.xlu0 %v2803_v27, %s6029_s17  ;;  %3961 = vrot.lane.b32.xlu2 %v3950_v57, %s5991_s23 }
 0x725   : > { %3207 = vrot.lane.b32.xlu1 %v5704_v42, %s6029_s17 }
 0x728   : > { %3976 = vrot.lane.b32.xlu0 %v3955_v52, %s6030_s18  ;;  %3209 = vrot.lane.b32.xlu2 %v2793_v41, %s6029_s17  ;;  %s501_s17 = scalar_lea.vmem %s5924_s16, %s3788_s29 }
 0x72d   : > { %3341 = vrot.lane.b32.xlu1 %v5671_v44, %s6031_s20 }
 0x730   : > { %3349 = vrot.lane.b32.xlu0 %v2803_v27, %s6031_s20  ;;  %3347 = vrot.lane.b32.xlu2 %v2793_v41, %s6031_s20 }
 0x732   : > { %v5733_v56 = vpop.permute.xlu2 %3941 }
 0x733   : > { %v3944_v6 = vunpack.i.h.bf16 %v5733_v56  ;;  %v3943_v61 = vunpack.i.l.bf16 %v5733_v56 }
 0x735   : > { %3339 = vrot.lane.b32.xlu1 %v5682_v23, %s6031_s20  ;;  %v3078_v21 = vsel %vm2242_vm1, %v3943_v61, %v3944_v6 }
 0x738   : > { %3345 = vrot.lane.b32.xlu0 %v5704_v42, %s6031_s20  ;;  %3343 = vrot.lane.b32.xlu2 %v2802_v30, %s6031_s20 }
 0x73a   : > { %v5740_v53 = vpop.permute.xlu2 %3134 }
 0x740   : > { %3412 = vperm.xlu2 %3814, %v2779_v10  }
 0x742   : > { %v5745_v34 = vpop.permute.xlu2 %3203 }
 0x747   : > { %v2926_v20 = vpop.permute.xlu1 %2925 }
 0x74a   : > { %v5747_v55 = vpop.permute.xlu2 %3946  ;;  %v3937_v22 = vpop.permute.xlu0 %3936 }
 0x74b   : > { %v3939_v59 = vunpack.i.h.bf16 %v3937_v22  ;;  %v3938_v7 = vunpack.i.l.bf16 %v3937_v22 }
 0x74d   : > { %v2828_v31 = vsel %vm1873_vm7, %v3938_v7, %v3939_v59 }
 0x74f   : > { %v5749_v37 = vpop.permute.xlu1 %2996 }
 0x752   : > { %v2924_v29 = vpop.permute.xlu0 %2923  ;;  %v3952_v1 = vpop.permute.xlu2 %3951 }
 0x753   : > { %v3954_v25 = vunpack.i.h.bf16 %v3952_v1  ;;  %v3953_v24 = vunpack.i.l.bf16 %v3952_v1  ;;  %v2934_v19 = vsel %vm6035_vm15, %v2924_v29, %v2926_v20  ;;  %v3760_v20 = vld [vmem:[%s5922_s14 + $0x14] sm:$0x7] }
 0x755   : > { %v2830_v63 = vsel %vm1873_vm7, %v3953_v24, %v3954_v25 }
 0x756   : > { %2872 = vmatpush.msrb.mxu3 %v2830_v63 }
 0x757   : > { %v2993_v26 = vpop.permute.xlu1 %2992 }
 0x758   : > { %2873 = vmatpush.msrb.mxu3 %v2828_v31 }
 0x759   : > { %3736 = vmatmul.msk.f32.vlgmr.msrb.gmra.mxu3 %vm946_vm0, %v3734_v3 }
 0x75a   : > { %3740 = vmatpush.msk.msra.mxu3 %vm5035_vm10, %v2793_v41  ;;  %v2995_v2 = vpop.permute.xlu0 %2994  ;;  %v2930_v17 = vpop.permute.xlu2 %2929 }
 0x75c   : > { %3741 = vmatpush.msk.msra.mxu3 %vm5035_vm10, %v5671_v44 }
 0x75f   : > { %v5762_v43 = vpop.permute.xlu1 %3132 }
 0x760   : > { %v3143_v22 = vsel %vm2339_vm14, %v5762_v43, %v5740_v53  ;;  %v3949_v53 = vunpack.i.h.bf16 %v5747_v55 }
 0x761   : > { %3742 = vmatmul.msk.f32.vlgmr.msra.gmra.mxu3 %vm946_vm0, %v2808_v5 }
 0x762   : > { %v2922_v58 = vpop.permute.xlu0 %2921  ;;  %v3003_v9 = vpop.permute.xlu2 %3002 }
 0x763   : > { %v2933_v46 = vsel %vm6033_vm12, %v2922_v58, %v2924_v29 }
 0x767   : > { %v5768_v13 = vpop.permute.xlu1 %3130 }
 0x768   : > { %v3142_v1 = vsel %vm2339_vm14, %v5768_v13, %v5762_v43 }
 0x76a   : > { %v5770_v12 = vpop.permute.xlu0 %3205  ;;  %v2928_v51 = vpop.permute.xlu2 %2927 }
 0x76b   : > { %v2935_v39 = vsel %vm6032_vm8, %v2928_v51, %v2930_v17 }
 0x76c   : > { %3744 = vmatpush.msk.msra.mxu0 %vm5397_vm5, %v2935_v39 }
 0x76e   : > { %3745 = vmatpush.msk.msra.mxu0 %vm5397_vm5, %v2933_v46 }
 0x76f   : > { %v5781_v45 = vpop.permute.xlu1 %3201  ;;  %3746 = vmatmul.msk.f32.vlgmr.msra.gmra.mxu0 %vm946_vm0, %v3743_v35 }
 0x772   : > { %v2932_v18 = vpop.permute.xlu0 %2931  ;;  %v2999_v15 = vpop.permute.xlu2 %2998 }
 0x773   : > { %v2936_v32 = vsel %vm6034_vm13, %v2930_v17, %v2932_v18 }
 0x774   : > { %3747 = vmatpush.msk.msra.mxu1 %vm5405_vm6, %v2936_v32 }
 0x776   : > { %3748 = vmatpush.msk.msra.mxu1 %vm5405_vm6, %v2934_v19 }
 0x777   : > { %v3957_v47 = vpop.permute.xlu1 %3956  ;;  %3749 = vmatmul.msk.f32.vlgmr.msra.gmra.mxu1 %vm946_vm0, %v3743_v35 }
 0x778   : > { %v3959_v54 = vunpack.i.h.bf16 %v3957_v47  ;;  %v3958_v49 = vunpack.i.l.bf16 %v3957_v47 }
 0x77a   : > { %v3139_v0 = vpop.permute.xlu0 %3138  ;;  %v3962_v60 = vpop.permute.xlu2 %3961  ;;  %v2829_v50 = vsel %vm1873_vm7, %v3958_v49, %v3953_v24  ;;  %v2827_v62 = vsel %vm1873_vm7, %v3959_v54, %v3938_v7  ;;  %vm6037_vm7 = vmmov %vm6036_vm11  ;;  %v3948_v7 = vunpack.i.l.bf16 %v5747_v55  ;;  %v3767_v55 = vld [vmem:[%s5922_s14 + $0x18] sm:$0x7] }
 0x77b   : > { %v3964_v36 = vunpack.i.h.bf16 %v3962_v60  ;;  %v3963_v11 = vunpack.i.l.bf16 %v3962_v60  ;;  %2852 = vmatpush.msrb.mxu2 %v2829_v50  ;;  %vm6038_vm3 = vmmov %vm6037_vm7 }
 0x77c   : > { %v3004_v28 = vsel %vm6038_vm3, %v2993_v26, %v2995_v2  ;;  %vm6039_vm4 = vmmov %vm6038_vm3  ;;  %v3287_v17 = vsel %vm2558_vm2, %v3948_v7, %v3949_v53 }
 0x77d   : > { %2853 = vmatpush.msrb.mxu2 %v2827_v62  ;;  %v3080_v48 = vsel %vm2242_vm1, %v3963_v11, %v3964_v36  ;;  %v3005_v41 = vsel %vm6039_vm4, %v2995_v2, %v5749_v37  ;;  %v3774_v2 = vld [vmem:[%s5922_s14 + $0x1c] sm:$0x7]  ;;  %vm3458_vm4 = vcmask 1043456  }
 0x77e   : > { %3122 = vmatpush.msrb.mxu1 %v3080_v48  ;;  %3735 = vmatmul.msk.f32.vlgmr.msrb.gmra.mxu2 %vm946_vm0, %v3734_v3 }
 0x77f   : > { %3737 = vmatpush.msk.msra.mxu2 %vm5031_vm9, %v5704_v42  ;;  %v3001_v30 = vpop.permute.xlu1 %3000 }
 0x780   : > { %3123 = vmatpush.msrb.mxu1 %v3078_v21  ;;  %v3006_v44 = vsel %vm6036_vm11, %v2999_v15, %v3001_v30  ;;  %v3007_v8 = vsel %vm6037_vm7, %v3001_v30, %v3003_v9 }
 0x781   : > { %3738 = vmatpush.msk.msra.mxu2 %vm5031_vm9, %v5682_v23  ;;  %3754 = vmatpush.msk.msrb.mxu3 %vm5035_vm10, %v3007_v8 }
 0x782   : > { %v3967_v27 = vpop.permute.xlu0 %3966  ;;  %3759 = vmatmul.msk.f32.vlgmr.msrb.gmra.mxu1 %vm946_vm0, %v3757_v38  ;;  %v3210_v25 = vpop.permute.xlu2 %3209 }
 0x783   : > { %3751 = vmatpush.msk.msrb.mxu2 %vm5031_vm9, %v3006_v44  ;;  %v3969_v57 = vunpack.i.h.bf16 %v3967_v27  ;;  %v3968_v23 = vunpack.i.l.bf16 %v3967_v27  ;;  %3755 = vmatpush.msk.msrb.mxu3 %vm5035_vm10, %v3005_v41 }
 0x784   : > { %3756 = vmatmul.msk.f32.vlgmr.msrb.gmra.mxu3 %vm946_vm0, %v3750_v16 }
 0x785   : > { %3752 = vmatpush.msk.msrb.mxu2 %vm5031_vm9, %v3004_v28  ;;  %v3079_v42 = vsel %vm2242_vm1, %v3968_v23, %v3963_v11  ;;  %v3077_v52 = vsel %vm2242_vm1, %v3969_v57, %v3943_v61  ;;  %vm6040_vm1 = vcmask 785408  }
 0x786   : > { %3102 = vmatpush.msrb.mxu0 %v3079_v42  ;;  %3739 = vmatmul.msk.f32.vlgmr.msra.gmra.mxu2 %vm946_vm0, %v2808_v5  ;;  %vm6042_vm8 = vmmov %vm6040_vm1 }
 0x787   : > { %v3141_v56 = vpop.permute.xlu1 %3140  ;;  %vm6043_vm12 = vmmov %vm6040_vm1 }
 0x788   : > { %3103 = vmatpush.msrb.mxu0 %v3077_v52  ;;  %v3145_v10 = vsel %vm2339_vm14, %v3139_v0, %v3141_v56  ;;  %v3213_v9 = vsel %vm6043_vm12, %v5781_v45, %v5745_v34 }
 0x789   : > { %3764 = vmatpush.msk.msra.mxu3 %vm5405_vm6, %v3145_v10  ;;  %3758 = vmatmul.msk.f32.vlgmr.msrb.gmra.mxu0 %vm946_vm0, %v3757_v38 }
 0x78a   : > { %v3137_v37 = vpop.permute.xlu0 %3136  ;;  %v3348_v13 = vpop.permute.xlu2 %3347 }
 0x78b   : > { %v3144_v29 = vsel %vm2339_vm14, %v3137_v37, %v3139_v0  ;;  %3765 = vmatpush.msk.msra.mxu3 %vm5405_vm6, %v3143_v22  ;;  %vm6041_vm14 = vmmov %vm6040_vm1 }
 0x78c   : > { %3761 = vmatpush.msk.msra.mxu2 %vm5397_vm5, %v3144_v29  ;;  %3766 = vmatmul.msk.f32.vlgmr.msra.gmra.mxu3 %vm946_vm0, %v3760_v20  ;;  %v3214_v43 = vsel %vm6041_vm14, %v5745_v34, %v5770_v12 }
 0x78e   : > { %3762 = vmatpush.msk.msra.mxu2 %vm5397_vm5, %v3142_v1 }
 0x78f   : > { %v3972_v59 = vpop.permute.xlu1 %3971  ;;  %3753 = vmatmul.msk.f32.vlgmr.msrb.gmra.mxu2 %vm946_vm0, %v3750_v16 }
 0x790   : > { %v3974_v24 = vunpack.i.h.bf16 %v3972_v59  ;;  %v3973_v63 = vunpack.i.l.bf16 %v3972_v59 }
 0x792   : > { %v3212_v31 = vpop.permute.xlu0 %3211  ;;  %v3289_v26 = vsel %vm2558_vm2, %v3973_v63, %v3974_v24  ;;  %v3344_v45 = vpop.permute.xlu2 %3343 }
 0x793   : > { %v3216_v3 = vsel %vm6040_vm1, %v3210_v25, %v3212_v31  ;;  %3331 = vmatpush.msrb.mxu3 %v3289_v26 }
 0x794   : > { %3771 = vmatpush.msk.msra.mxu1 %vm5035_vm10, %v3216_v3 }
 0x795   : > { %3332 = vmatpush.msrb.mxu3 %v3287_v17 }
 0x796   : > { %3772 = vmatpush.msk.msra.mxu1 %vm5035_vm10, %v3214_v43  ;;  %3776 = vmatmul.msk.f32.vlgmr.msrb.gmra.mxu3 %vm946_vm0, %v3774_v2  ;;  %vm6044_vm10 = vcmask 769024  }
 0x797   : > { %v3208_v5 = vpop.permute.xlu1 %3207  ;;  %3763 = vmatmul.msk.f32.vlgmr.msra.gmra.mxu2 %vm946_vm0, %v3760_v20  ;;  %3773 = vmatmul.msk.f32.vlgmr.msra.gmra.mxu1 %vm946_vm0, %v3767_v55 }
 0x798   : > { %v3215_v58 = vsel %vm6042_vm8, %v3208_v5, %v3210_v25 }
 0x799   : > { %3768 = vmatpush.msk.msra.mxu0 %vm5031_vm9, %v3215_v58 }
 0x79a   : > { %v3977_v12 = vpop.permute.xlu0 %3976  ;;  %v3413_v37 = vpop.permute.xlu2 %3412 }
 0x79b   : > { %v3979_v33 = vunpack.i.h.bf16 %v3977_v12  ;;  %v3978_v51 = vunpack.i.l.bf16 %v3977_v12  ;;  %3769 = vmatpush.msk.msra.mxu0 %vm5031_vm9, %v3213_v9  ;;  %vm6045_vm9 = vmmov %vm6044_vm10 }
 0x79c   : > { %3770 = vmatmul.msk.f32.vlgmr.msra.gmra.mxu0 %vm946_vm0, %v3767_v55 }
 0x79d   : > { %v3288_v39 = vsel %vm2558_vm2, %v3978_v51, %v3973_v63  ;;  %v3286_v46 = vsel %vm2558_vm2, %v3979_v33, %v3948_v7  ;;  %vm6046_vm2 = vmmov %vm6045_vm9 }
 0x79e   : > { %3311 = vmatpush.msrb.mxu2 %v3288_v39  ;;  %vm6047_vm13 = vmmov %vm6046_vm2 }
 0x79f   : > { %v3342_v35 = vpop.permute.xlu1 %3341 }
 0x7a0   : > { %3312 = vmatpush.msrb.mxu2 %v3286_v46  ;;  %v3352_v15 = vsel %vm6045_vm9, %v3342_v35, %v3344_v45 }
 0x7a1   : > { %3775 = vmatmul.msk.f32.vlgmr.msrb.gmra.mxu2 %vm946_vm0, %v3774_v2 }
 0x7a2   : > { %v3350_v18 = vpop.permute.xlu0 %3349 }
 0x7a3   : > { %v3354_v34 = vsel %vm6044_vm10, %v3348_v13, %v3350_v18 }
 0x7a4   : > { %3781 = vmatpush.msk.msrb.mxu1 %vm5405_vm6, %v3354_v34 }
 0x7a6   : > { %3782 = vmatpush.msk.msrb.mxu1 %vm5405_vm6, %v3352_v15 }
 0x7a7   : > { %3783 = vmatmul.msk.f32.vlgmr.msrb.gmra.mxu1 %vm946_vm0, %v3777_v4  ;;  %v3340_v32 = vpop.permute.xlu1 %3339 }
 0x7a8   : > { %v3351_v54 = vsel %vm6047_vm13, %v3340_v32, %v3342_v35 }
 0x7aa   : > { %v3346_v19 = vpop.permute.xlu0 %3345 }
 0x7ab   : > { %v3353_v47 = vsel %vm6046_vm2, %v3346_v19, %v3348_v13 }
 0x7ac   : > { %3778 = vmatpush.msk.msrb.mxu0 %vm5397_vm5, %v3353_v47 }
 0x7ae   : > { %3779 = vmatpush.msk.msrb.mxu0 %vm5397_vm5, %v3351_v54 }
 0x7af   : > { %3780 = vmatmul.msk.f32.vlgmr.msrb.gmra.mxu0 %vm946_vm0, %v3777_v4 }
 0x7dc   : > { %v2875_v49 = vpop.f32.mrf.mxu3 }
 0x7e4   : > { %v2918_v40 = vpop.f32.mrf.mxu3 }
 0x7e5   : > { %v2919_v61 = vadd.f32 %v2918_v40, %v2875_v49 }
 0x7ec   : > { %v2967_v36 = vpop.f32.mrf.mxu0 }
 0x7f4   : > { %v2987_v60 = vpop.f32.mrf.mxu1 }
 0x7f5   : > { %v2991_v62 = vadd.f32 %v2987_v60, %v2919_v61 }
 0x7ff   : > { %v3125_v11 = vpop.f32.mrf.mxu1 }
 0x801   : > { %v2855_v0 = vpop.f32.mrf.mxu2 }
 0x806   : > { %v3105_v44 = vpop.f32.mrf.mxu0 }
 0x807   : > { %v3058_v6 = vpop.f32.mrf.mxu3 }
 0x808   : > { %v3062_v21 = vadd.f32 %v3058_v6, %v2991_v62 }
 0x809   : > { %v2898_v50 = vpop.f32.mrf.mxu2 }
 0x80a   : > { %v2899_v38 = vadd.f32 %v2898_v50, %v2855_v0  ;;  %v3129_v8 = vadd.f32 %v3125_v11, %v3062_v21 }
 0x80c   : > { %v2990_v16 = vadd.f32 %v2967_v36, %v2899_v38 }
 0x80f   : > { %v3196_v30 = vpop.f32.mrf.mxu3 }
 0x810   : > { %v3200_v41 = vadd.f32 %v3196_v30, %v3129_v8 }
 0x812   : > { %v3038_v48 = vpop.f32.mrf.mxu2 }
 0x813   : > { %v3061_v28 = vadd.f32 %v3038_v48, %v2990_v16 }
 0x814   : > { %v3267_v14 = vpop.f32.mrf.mxu1 }
 0x815   : > { %v3271_v23 = vadd.f32 %v3267_v14, %v3200_v41  ;;  %v3128_v42 = vadd.f32 %v3105_v44, %v3061_v28 }
 0x819   : > { %v3334_v57 = vpop.f32.mrf.mxu3  ;;  %v3247_v56 = vpop.f32.mrf.mxu0 }
 0x81a   : > { %v3176_v27 = vpop.f32.mrf.mxu2  ;;  %v3338_v52 = vadd.f32 %v3334_v57, %v3271_v23 }
 0x81b   : > { %v3199_v20 = vadd.f32 %v3176_v27, %v3128_v42 }
 0x81d   : > { %v3270_v59 = vadd.f32 %v3247_v56, %v3199_v20 }
 0x824   : > { %v3405_v10 = vpop.f32.mrf.mxu1  ;;  %v3314_v1 = vpop.f32.mrf.mxu2 }
 0x825   : > { %v3409_v22 = vadd.f32 %v3405_v10, %v3338_v52  ;;  %v3337_v7 = vadd.f32 %v3314_v1, %v3270_v59 }
 0x827   : > { %v3416_v29 = vadd.f32 %v3413_v37, %v3409_v22 }
 0x829   : > { %v3785_v53 = vmul.f32 -1.442695, %v3416_v29 }
 0x82b   : > { %3982 = vpow2.f32 %v3785_v53 }
 0x82c   : > { %v3385_v25 = vpop.f32.mrf.mxu0 }
 0x82d   : > { %v3408_v24 = vadd.f32 %v3385_v25, %v3337_v7 }
 0x82f   : > { %v3415_v63 = vadd.f32 %v3413_v37, %v3408_v24 }
 0x831   : > { %v3983_v31 = vpop.eup %3982  ;;  %v3784_v26 = vmul.f32 -1.442695, %v3415_v63 }
 0x832   : > { %v3424_v3 = vadd.f32 1.0, %v3983_v31 }
 0x833   : > { %3984 = vpow2.f32 %v3784_v26 }
 0x834   : > { %3986 = vrcp.f32 %v3424_v3  ;;  %v3451_v12 = vand.u32 2147483648, %v3424_v3  ;;  %vm3445_vm5 = vweird.f32 %v3424_v3  ;;  %v3449_v33 = vand.u32 2147483647, %v3424_v3 }
 0x836   : > { %v3452_v35 = vor.u32 1.1754944e-38, %v3451_v12  ;;  %vm3450_vm15 = vcmp.eq.f32.partialorder %v3449_v33, 8.507059e+37 }
 0x839   : > { %v3985_v2 = vpop.eup %3984 }
 0x83a   : > { %v3987_v17 = vpop.eup %3986  ;;  %v3423_v55 = vadd.f32 1.0, %v3985_v2 }
 0x83b   : > { %v3441_v43 = vmul.f32 %v3987_v17, %v3424_v3  ;;  %vm3446_vm0 = vweird.f32 %v3987_v17 }
 0x83c   : > { %3988 = vrcp.f32 %v3423_v55  ;;  %vm3447_vm6 = vmor %vm3445_vm5, %vm3446_vm0  ;;  %v3436_v18 = vand.u32 2147483648, %v3423_v55  ;;  %v3434_v45 = vand.u32 2147483647, %v3423_v55  ;;  %vm3430_vm7 = vweird.f32 %v3423_v55 }
 0x83d   : > { %v3442_v5 = vsub.f32 1.0, %v3441_v43 }
 0x83e   : > { %v3437_v32 = vor.u32 1.1754944e-38, %v3436_v18  ;;  %vm3435_vm1 = vcmp.eq.f32.partialorder %v3434_v45, 8.507059e+37 }
 0x83f   : > { %v3443_v58 = vmul.f32 %v3987_v17, %v3442_v5 }
 0x841   : > { %v3444_v9 = vadd.f32 %v3987_v17, %v3443_v58 }
 0x842   : > { %v3989_v13 = vpop.eup %3988 }
 0x843   : > { %v3426_v51 = vmul.f32 %v3989_v13, %v3423_v55  ;;  %v3448_v39 = vsel %vm3447_vm6, %v3987_v17, %v3444_v9  ;;  %vm3431_vm11 = vweird.f32 %v3989_v13 }
 0x844   : > { %v3453_v4 = vsel %vm3450_vm15, %v3452_v35, %v3448_v39  ;;  %vm3432_vm3 = vmor %vm3430_vm7, %vm3431_vm11 }
 0x845   : > { %v3427_v46 = vsub.f32 1.0, %v3426_v51  ;;  %v3457_v19 = vrot.slane %v3453_v4, 4 }
 0x847   : > { %v3428_v34 = vmul.f32 %v3989_v13, %v3427_v46 }
 0x849   : > { %v3429_v15 = vadd.f32 %v3989_v13, %v3428_v34 }
 0x84b   : > { %v3433_v47 = vsel %vm3432_vm3, %v3989_v13, %v3429_v15 }
 0x84c   : > { %v3438_v54 = vsel %vm3435_vm1, %v3437_v32, %v3433_v47 }
 0x84d   : > { %v3459_v49 = vsel %vm3458_vm4, %v3438_v54, %v3457_v19 }
 0x84e   : > { %3461 = vst [vmem:[%s501_s17] sm:$0x77] %v3459_v49 }
 0x84f PF: > { %s26_s21 = sadd.s32 1, %s3997_s21  }
 0x850   : > { %p23_p4 = scmp.ge.s32.totalorder %s26_s21, 4  }
 0x852   :  { %25 = sbr.rel (!%p23_p4) target bundleno = 2 (0x2), region = 136 }

</bundles_post_ra>
